<compile_context>
chip_gen: v5e
topology: v5e:2x2
jax: 0.10.0
libtpu: 0.0.40
codegen_flags: <defaults>
</compile_context>

<pallas_src>
import jax
import jax.numpy as jnp
from jax.experimental import pallas as pl
from jax.experimental.pallas import tpu as pltpu

EPS = 1e-5


def _relu_conv1x1_bn_kernel(x_ref, w_ref, g_ref, b_ref, o_ref):
    # x_ref: [C_in,  P]     f32   (free reshape of NCHW for N == 1)
    # w_ref: [C_out, C_in]  bf16  (native PyTorch conv-weight layout)
    # g_ref: [C_out, 1]     f32   batchnorm gamma
    # b_ref: [C_out, 1]     f32   batchnorm beta
    # o_ref: [C_out, P]     f32   (free reshape back to NCHW)
    x = jnp.maximum(x_ref[...], 0.0).astype(jnp.bfloat16)            # ReLU (VPU) + bf16 cast
    y = jnp.dot(w_ref[...], x, preferred_element_type=jnp.float32)   # 1x1 conv as matmul (MXU, f32 acc)

    # BatchNorm (training mode): per-output-channel stats over the P pixels.
    inv_p = 1.0 / y.shape[1]
    mean = jnp.sum(y, axis=1, keepdims=True) * inv_p                 # [C_out, 1]
    d = y - mean
    var = jnp.sum(d * d, axis=1, keepdims=True) * inv_p              # two-pass variance (robust)

    # Fold the affine into per-channel scale/shift on the small column.
    scale = g_ref[...] * jax.lax.rsqrt(var + EPS)                    # rsqrt -> EUP
    o_ref[...] = (d * scale + b_ref[...]).astype(o_ref.dtype)


def prepare_params(conv_w_oihw, gamma, beta):
    """One-time (per-model, not per-call) parameter preparation."""
    c_out = conv_w_oihw.shape[0]
    w2 = conv_w_oihw.reshape(c_out, -1).astype(jnp.bfloat16)   # [C_out, C_in]  (1x1 kernel)
    g2 = gamma.astype(jnp.float32).reshape(c_out, 1)
    b2 = beta.astype(jnp.float32).reshape(c_out, 1)
    return w2, g2, b2


@jax.jit
def relu_conv1x1_bn(x_nchw, w_bf16, g2, b2):
    """x_nchw: [N, C_in, H, W]; w_bf16: [C_out, C_in] bf16; g2/b2: [C_out, 1] f32."""
    n, c_in, h, wdt = x_nchw.shape
    c_out = w_bf16.shape[0]
    p = n * h * wdt

    if n == 1:
        x_cp = x_nchw.reshape(c_in, p)                      # free reshape (no data movement)
    else:
        x_cp = jnp.transpose(x_nchw, (1, 0, 2, 3)).reshape(c_in, p)

    cost = pl.CostEstimate(
        flops=2 * p * c_in * c_out + 6 * p * c_out,         # matmul + BN elementwise/reductions
        transcendentals=c_out,                              # per-channel rsqrt
        bytes_accessed=(c_in * p * 4) + (c_out * c_in * 2) + (2 * c_out * 4) + (c_out * p * 4),
    )

    out_cp = pl.pallas_call(
        _relu_conv1x1_bn_kernel,
        out_shape=jax.ShapeDtypeStruct((c_out, p), jnp.float32),
        # Single invocation (no grid): every operand is a full-array block in VMEM.
        in_specs=[pl.BlockSpec(memory_space=pltpu.MemorySpace.VMEM)] * 4,
        out_specs=pl.BlockSpec(memory_space=pltpu.MemorySpace.VMEM),
        cost_estimate=cost,
    )(x_cp, w_bf16, g2, b2)

    if n == 1:
        return out_cp.reshape(n, c_out, h, wdt)             # free reshape back to NCHW
    return jnp.transpose(out_cp.reshape(c_out, n, h, wdt), (1, 0, 2, 3))


def _reference(x_nchw, conv_w_oihw, gamma, beta):
    # Pure-JAX f32 reference matching the PyTorch module's forward semantics.
    x = jnp.maximum(x_nchw, 0.0)
    w2 = conv_w_oihw.reshape(conv_w_oihw.shape[0], -1)
    y = jnp.einsum("oc,nchw->nohw", w2, x)
    mean = jnp.mean(y, axis=(0, 2, 3), keepdims=True)
    var = jnp.mean((y - mean) ** 2, axis=(0, 2, 3), keepdims=True)
    y_hat = (y - mean) / jnp.sqrt(var + EPS)
    return y_hat * gamma.reshape(1, -1, 1, 1) + beta.reshape(1, -1, 1, 1)


if __name__ == "__main__":
    key = jax.random.PRNGKey(0)
    k_x, k_w = jax.random.split(key)

    N, C, H, W = 1, 400, 7, 7  # matches the module's fixed shapes
    x = jax.random.normal(k_x, (N, C, H, W), dtype=jnp.float32)

    # Conv2d(400, 400, 1, 1, bias=False) weight: [400, 400, 1, 1]
    conv_w = jax.random.normal(k_w, (C, C, 1, 1), dtype=jnp.float32) * 0.05
    bn_gamma = jnp.ones((C,), dtype=jnp.float32)   # BatchNorm2d affine weight init
    bn_beta = jnp.zeros((C,), dtype=jnp.float32)   # BatchNorm2d affine bias init

    # One-time parameter prep (hoisted off the per-call path).
    w_bf16, g2, b2 = prepare_params(conv_w, bn_gamma, bn_beta)

    out = jax.block_until_ready(relu_conv1x1_bn(x, w_bf16, g2, b2))
    ref = _reference(x, conv_w, bn_gamma, bn_beta)

    assert out.shape == (N, C, H, W), out.shape
    # Tolerance covers the intentional bf16 matmul inputs (f32 accumulation);
    # any layout/statistics bug would produce O(1) errors and still fail this.
    assert jnp.allclose(out, ref, rtol=2e-2, atol=2e-2), "mismatch vs reference"

    print("KERNEL_OK")
</pallas_src>

<mosaic_0001>
module attributes {stable_mosaic.version = 11 : i64} {
  func.func @_relu_conv1x1_bn_kernel(%arg0: memref<400x49xf32, #tpu.memory_space<vmem>>, %arg1: memref<400x400xbf16, #tpu.memory_space<vmem>>, %arg2: memref<400x1xf32, #tpu.memory_space<vmem>>, %arg3: memref<400x1xf32, #tpu.memory_space<vmem>>, %arg4: memref<400x49xf32, #tpu.memory_space<vmem>>) attributes {dimension_semantics = [], scalar_prefetch = 0 : i64, scratch_operands = 0 : i64, tpu.core_type = #tpu.core_type<tc>} {
    %c0 = arith.constant 0 : index
    %c0_0 = arith.constant 0 : index
    %0 = vector.load %arg0[%c0, %c0_0] : memref<400x49xf32, #tpu.memory_space<vmem>>, vector<400x49xf32>
    %cst = arith.constant 0.000000e+00 : f32
    %1 = vector.broadcast %cst : f32 to vector<400x49xf32>
    %2 = arith.maximumf %0, %1 : vector<400x49xf32>
    %3 = arith.truncf %2 : vector<400x49xf32> to vector<400x49xbf16>
    %c0_1 = arith.constant 0 : index
    %c0_2 = arith.constant 0 : index
    %4 = vector.load %arg1[%c0_1, %c0_2] : memref<400x400xbf16, #tpu.memory_space<vmem>>, vector<400x400xbf16>
    %cst_3 = arith.constant dense<0.000000e+00> : vector<400x49xf32>
    %5 = tpu.matmul %4, %3, %cst_3 {dimension_numbers = #tpu.dot_dimension_numbers<[1], [0], [0], [1], [0, 0, 1, 1], [], []>} : vector<400x400xbf16>, vector<400x49xbf16>, vector<400x49xf32> -> vector<400x49xf32>
    %cst_4 = arith.constant dense<0.000000e+00> : vector<400xf32>
    %6 = vector.multi_reduction <add>, %5, %cst_4 [1] : vector<400x49xf32> to vector<400xf32>
    %7 = vector.shape_cast %6 : vector<400xf32> to vector<400x1xf32>
    %cst_5 = arith.constant 0.0204081628 : f32
    %8 = vector.broadcast %cst_5 : f32 to vector<400x1xf32>
    %9 = arith.mulf %7, %8 : vector<400x1xf32>
    %10 = vector.broadcast %9 : vector<400x1xf32> to vector<400x49xf32>
    %11 = arith.subf %5, %10 : vector<400x49xf32>
    %12 = arith.mulf %11, %11 : vector<400x49xf32>
    %cst_6 = arith.constant dense<0.000000e+00> : vector<400xf32>
    %13 = vector.multi_reduction <add>, %12, %cst_6 [1] : vector<400x49xf32> to vector<400xf32>
    %14 = vector.shape_cast %13 : vector<400xf32> to vector<400x1xf32>
    %cst_7 = arith.constant 0.0204081628 : f32
    %15 = vector.broadcast %cst_7 : f32 to vector<400x1xf32>
    %16 = arith.mulf %14, %15 : vector<400x1xf32>
    %c0_8 = arith.constant 0 : index
    %c0_9 = arith.constant 0 : index
    %17 = vector.load %arg2[%c0_8, %c0_9] : memref<400x1xf32, #tpu.memory_space<vmem>>, vector<400x1xf32>
    %cst_10 = arith.constant 9.99999974E-6 : f32
    %18 = vector.broadcast %cst_10 : f32 to vector<400x1xf32>
    %19 = arith.addf %16, %18 : vector<400x1xf32>
    %20 = math.rsqrt %19 : vector<400x1xf32>
    %21 = arith.mulf %17, %20 : vector<400x1xf32>
    %22 = vector.broadcast %21 : vector<400x1xf32> to vector<400x49xf32>
    %23 = arith.mulf %11, %22 : vector<400x49xf32>
    %c0_11 = arith.constant 0 : index
    %c0_12 = arith.constant 0 : index
    %24 = vector.load %arg3[%c0_11, %c0_12] : memref<400x1xf32, #tpu.memory_space<vmem>>, vector<400x1xf32>
    %25 = vector.broadcast %24 : vector<400x1xf32> to vector<400x49xf32>
    %26 = arith.addf %23, %25 : vector<400x49xf32>
    %c0_13 = arith.constant 0 : index
    %c0_14 = arith.constant 0 : index
    %27 = vector.load %arg4[%c0_13, %c0_14] : memref<400x49xf32, #tpu.memory_space<vmem>>, vector<400x49xf32>
    tpu.vector_store %arg4[%c0_13, %c0_14], %26 {strides = array<i32>} : memref<400x49xf32, #tpu.memory_space<vmem>>, vector<400x49xf32>,
    return
  }
}

</mosaic_0001>

<bundles_post_ra>
// kernel: relu_conv1x1_bn.1
= control target key start
LH: loop header
LB: loop body
LE: loop exit
PB: predicated region body
PF: predicated region fallthrough
CT: control target
= control target key end

     0   :  { %v3814_v0 = vmov 0   ;;  %vm718_vm0 = vcmask 130048   ;;  %vm1330_vm1 = vcmask 400384   ;;  %s6178_s3 = inlined_call_operand.vmem [shape: f32[400,1], index: 3, kind: input, shape index: {}]   ;;  %s6179_s0 = inlined_call_operand.vmem [shape: f32[400,49], index: 0, kind: input, shape index: {}]   ;;  %s6180_s1 = inlined_call_operand.vmem [shape: bf16[400,400], index: 1, kind: input, shape index: {}]   ;;  %s6181_s2 = inlined_call_operand.vmem [shape: f32[400,1], index: 2, kind: input, shape index: {}]   ;;  %s6182_s4 = inlined_call_operand.vmem [shape: f32[400,49], index: 4, kind: output, shape index: {}]  }
   0x1   :  { %3713 = vset.pattern.permute.xlu2 %v3814_v0  ;;  %3712 = vset.pattern.permute.xlu0 %v3814_v0  ;;  %v2783_v1 = vld [vmem:[%s6178_s3 + $0x10] sm:$0xff]  ;;  %v2782_v2 = vld [vmem:[%s6178_s3 + $0x8] sm:$0xff]  ;;  %v2781_v3 = vld [vmem:[%s6178_s3] sm:$0xff] }
   0x2   :  { %3711 = vset.pattern.permute.xlu1 %v3814_v0  ;;  %2843 = vperm.xlu2 %3713, %v2783_v1   ;;  %v32_v4 = vld [vmem:[%s6179_s0 + $0x70] sm:$0xff]  ;;  %v33_v5 = vld [vmem:[%s6179_s0 + $0x78] sm:$0xff]  ;;  %v2786_v17 = vld [vmem:[%s6178_s3 + $0x28] sm:$0xff] }
   0x3   :  { %v48_v6 = vld [vmem:[%s6179_s0 + $0xf0] sm:$0xff]  ;;  %2838 = vperm.xlu0 %3712, %v2782_v2   ;;  %2833 = vperm.xlu1 %3711, %v2781_v3   ;;  %v82_v7 = vmax.f32 %v32_v4, 0.0  ;;  %v83_v8 = vmax.f32 %v33_v5, 0.0  ;;  %v49_v9 = vld [vmem:[%s6179_s0 + $0xf8] sm:$0xff]  ;;  %v30_v18 = vld [vmem:[%s6179_s0 + $0x60] sm:$0xff] }
   0x4   :  { %v98_v10 = vmax.f32 %v48_v6, 0.0  ;;  %v64_v11 = vld [vmem:[%s6179_s0 + $0x170] sm:$0xff]  ;;  %v65_v12 = vld [vmem:[%s6179_s0 + $0x178] sm:$0xff]  ;;  %v99_v13 = vmax.f32 %v49_v9, 0.0  ;;  %v31_v19 = vld [vmem:[%s6179_s0 + $0x68] sm:$0xff]  ;;  %v80_v25 = vmax.f32 %v30_v18, 0.0 }
   0x5   :  { %v114_v14 = vmax.f32 %v64_v11, 0.0  ;;  %v115_v15 = vmax.f32 %v65_v12, 0.0  ;;  %v125_v16 = vpack.c.bf16 %v83_v8, %v82_v7  ;;  %v46_v20 = vld [vmem:[%s6179_s0 + $0xe0] sm:$0xff]  ;;  %v2784_v24 = vld [vmem:[%s6178_s3 + $0x18] sm:$0xff]  ;;  %v81_v26 = vmax.f32 %v31_v19, 0.0  ;;  %v47_v27 = vld [vmem:[%s6179_s0 + $0xe8] sm:$0xff] }
   0x6   :  { %v133_v21 = vpack.c.bf16 %v99_v13, %v98_v10  ;;  %v2785_v23 = vld [vmem:[%s6178_s3 + $0x20] sm:$0xff]  ;;  %v63_v29 = vld [vmem:[%s6179_s0 + $0x168] sm:$0xff]  ;;  %v96_v30 = vmax.f32 %v46_v20, 0.0  ;;  %v97_v31 = vmax.f32 %v47_v27, 0.0  ;;  %v28_v34 = vld [vmem:[%s6179_s0 + $0x50] sm:$0xff] }
   0x7   :  { %v141_v22 = vpack.c.bf16 %v115_v15, %v114_v14  ;;  %v62_v28 = vld [vmem:[%s6179_s0 + $0x160] sm:$0xff]  ;;  %794 = vmatpush.bf16.msra.mxu0 %v125_v16  ;;  %v113_v33 = vmax.f32 %v63_v29, 0.0  ;;  %v29_v35 = vld [vmem:[%s6179_s0 + $0x58] sm:$0xff]  ;;  %v124_v36 = vpack.c.bf16 %v81_v26, %v80_v25  ;;  %v78_v37 = vmax.f32 %v28_v34, 0.0  ;;  %v44_v39 = vld [vmem:[%s6179_s0 + $0xd0] sm:$0xff] }
   0x8   :  { %v112_v32 = vmax.f32 %v62_v28, 0.0  ;;  %928 = vmatpush.bf16.msra.mxu1 %v133_v21  ;;  %v79_v38 = vmax.f32 %v29_v35, 0.0  ;;  %v45_v40 = vld [vmem:[%s6179_s0 + $0xd8] sm:$0xff]  ;;  %v60_v41 = vld [vmem:[%s6179_s0 + $0x150] sm:$0xff]  ;;  %v132_v42 = vpack.c.bf16 %v97_v31, %v96_v30  ;;  %v94_v44 = vmax.f32 %v44_v39, 0.0  ;;  %v26_v49 = vld [vmem:[%s6179_s0 + $0x40] sm:$0xff] }
   0x9   :  { %1062 = vmatpush.bf16.msra.mxu2 %v141_v22  ;;  %v95_v45 = vmax.f32 %v45_v40, 0.0  ;;  %v61_v46 = vld [vmem:[%s6179_s0 + $0x158] sm:$0xff]  ;;  %v110_v47 = vmax.f32 %v60_v41, 0.0  ;;  %v27_v50 = vld [vmem:[%s6179_s0 + $0x48] sm:$0xff]  ;;  %v76_v51 = vmax.f32 %v26_v49, 0.0  ;;  %v42_v53 = vld [vmem:[%s6179_s0 + $0xc0] sm:$0xff] }
   0xa   :  { %v140_v43 = vpack.c.bf16 %v113_v33, %v112_v32  ;;  %2858 = vperm.xlu2 %3713, %v2786_v17   ;;  %v111_v48 = vmax.f32 %v61_v46, 0.0  ;;  %v77_v52 = vmax.f32 %v27_v50, 0.0  ;;  %v43_v54 = vld [vmem:[%s6179_s0 + $0xc8] sm:$0xff]  ;;  %v58_v55 = vld [vmem:[%s6179_s0 + $0x140] sm:$0xff]  ;;  %v123_v56 = vpack.c.bf16 %v79_v38, %v78_v37  ;;  %v24_v61 = vld [vmem:[%s6179_s0 + $0x30] sm:$0xff] }
   0xb   :  { %2853 = vperm.xlu0 %3712, %v2785_v23   ;;  %2848 = vperm.xlu1 %3711, %v2784_v24   ;;  %v131_v57 = vpack.c.bf16 %v95_v45, %v94_v44  ;;  %v92_v58 = vmax.f32 %v42_v53, 0.0  ;;  %v93_v59 = vmax.f32 %v43_v54, 0.0  ;;  %v59_v60 = vld [vmem:[%s6179_s0 + $0x148] sm:$0xff]  ;;  %v108_v63 = vmax.f32 %v58_v55, 0.0  ;;  %v25_v1 = vld [vmem:[%s6179_s0 + $0x38] sm:$0xff]  ;;  %v40_v2 = vld [vmem:[%s6179_s0 + $0xb0] sm:$0xff] }
   0xc   :  { %795 = vmatpush.bf16.msra.mxu0 %v124_v36  ;;  %929 = vmatpush.bf16.msra.mxu1 %v132_v42  ;;  %v139_v62 = vpack.c.bf16 %v111_v48, %v110_v47  ;;  %v109_v0 = vmax.f32 %v59_v60, 0.0  ;;  %v41_v3 = vld [vmem:[%s6179_s0 + $0xb8] sm:$0xff]  ;;  %v56_v4 = vld [vmem:[%s6179_s0 + $0x130] sm:$0xff]  ;;  %v2789_v6 = vld [vmem:[%s6178_s3 + $0x40] sm:$0xff]  ;;  %v122_v9 = vpack.c.bf16 %v77_v52, %v76_v51  ;;  %v74_v10 = vmax.f32 %v24_v61, 0.0 }
   0xd   :  { %1063 = vmatpush.bf16.msra.mxu2 %v140_v43  ;;  %v57_v5 = vld [vmem:[%s6179_s0 + $0x138] sm:$0xff]  ;;  %v2787_v8 = vld [vmem:[%s6178_s3 + $0x30] sm:$0xff]  ;;  %v130_v11 = vpack.c.bf16 %v93_v59, %v92_v58  ;;  %v75_v12 = vmax.f32 %v25_v1, 0.0  ;;  %v90_v13 = vmax.f32 %v40_v2, 0.0  ;;  %v91_v14 = vmax.f32 %v41_v3, 0.0  ;;  %v22_v15 = vld [vmem:[%s6179_s0 + $0x20] sm:$0xff] }
   0xe   :  { %v2788_v7 = vld [vmem:[%s6178_s3 + $0x38] sm:$0xff]  ;;  %v23_v16 = vld [vmem:[%s6179_s0 + $0x28] sm:$0xff]  ;;  %v38_v17 = vld [vmem:[%s6179_s0 + $0xa0] sm:$0xff]  ;;  %v138_v18 = vpack.c.bf16 %v109_v0, %v108_v63  ;;  %v106_v19 = vmax.f32 %v56_v4, 0.0  ;;  %v107_v20 = vmax.f32 %v57_v5, 0.0  ;;  %v72_v28 = vmax.f32 %v22_v15, 0.0 }
   0xf   :  { %v39_v21 = vld [vmem:[%s6179_s0 + $0xa8] sm:$0xff]  ;;  %v66_v22 = vld [vmem:[%s6179_s0 + $0x180] sm:$0xff]  ;;  %v73_v29 = vmax.f32 %v23_v16, 0.0  ;;  %v88_v30 = vmax.f32 %v38_v17, 0.0  ;;  %v20_v31 = vld [vmem:[%s6179_s0 + $0x10] sm:$0xff]  ;;  %v121_v34 = vpack.c.bf16 %v75_v12, %v74_v10  ;;  %v129_v35 = vpack.c.bf16 %v91_v14, %v90_v13 }
  0x10   :  { %796 = vmatpush.bf16.msra.mxu0 %v123_v56  ;;  %930 = vmatpush.bf16.msra.mxu1 %v131_v57  ;;  %v67_v23 = vld [vmem:[%s6179_s0 + $0x188] sm:$0xff]  ;;  %v54_v24 = vld [vmem:[%s6179_s0 + $0x120] sm:$0xff]  ;;  %v116_v26 = vmax.f32 %v66_v22, 0.0  ;;  %v21_v32 = vld [vmem:[%s6179_s0 + $0x18] sm:$0xff]  ;;  %v89_v36 = vmax.f32 %v39_v21, 0.0  ;;  %v137_v41 = vpack.c.bf16 %v107_v20, %v106_v19  ;;  %v70_v48 = vmax.f32 %v20_v31, 0.0 }
  0x11   :  { %1064 = vmatpush.bf16.msra.mxu2 %v139_v62  ;;  %v55_v25 = vld [vmem:[%s6179_s0 + $0x128] sm:$0xff]  ;;  %v117_v27 = vmax.f32 %v67_v23, 0.0  ;;  %v36_v33 = vld [vmem:[%s6179_s0 + $0x90] sm:$0xff]  ;;  %v37_v38 = vld [vmem:[%s6179_s0 + $0x98] sm:$0xff]  ;;  %v104_v42 = vmax.f32 %v54_v24, 0.0  ;;  %v71_v49 = vmax.f32 %v21_v32, 0.0  ;;  %v120_v54 = vpack.c.bf16 %v73_v29, %v72_v28 }
  0x12   :  { %2873 = vperm.xlu2 %3713, %v2789_v6   ;;  %v3611_v39 = vld [vmem:[%s6180_s1 + $0xc] sm:$0xf]  ;;  %v3197_v40 = vld [vmem:[%s6180_s1 + $0x18] sm:$0xf0]  ;;  %v105_v43 = vmax.f32 %v55_v25, 0.0  ;;  %v52_v45 = vld [vmem:[%s6179_s0 + $0x110] sm:$0xff]  ;;  %v128_v55 = vpack.c.bf16 %v89_v36, %v88_v30 }
  0x13   :  { %2868 = vperm.xlu0 %3712, %v2788_v7   ;;  %2863 = vperm.xlu1 %3711, %v2787_v8   ;;  %v142_v37 = vpack.c.bf16 %v117_v27, %v116_v26  ;;  %v3200_v44 = vor.u32 %v3611_v39, %v3197_v40  ;;  %v53_v46 = vld [vmem:[%s6179_s0 + $0x118] sm:$0xff]  ;;  %v86_v50 = vmax.f32 %v36_v33, 0.0  ;;  %v87_v51 = vmax.f32 %v37_v38, 0.0  ;;  %v2791_v52 = vld [vmem:[%s6178_s3 + $0x50] sm:$0xff]  ;;  %v2790_v53 = vld [vmem:[%s6178_s3 + $0x48] sm:$0xff] }
  0x14   :  { %797 = vmatpush.bf16.msra.mxu0 %v122_v9  ;;  %931 = vmatpush.bf16.msra.mxu1 %v130_v11  ;;  %v2792_v47 = vld [vmem:[%s6178_s3 + $0x58] sm:$0xff]  ;;  %v18_v56 = vld [vmem:[%s6179_s0] sm:$0xff]  ;;  %v136_v57 = vpack.c.bf16 %v105_v43, %v104_v42  ;;  %v102_v58 = vmax.f32 %v52_v45, 0.0  ;;  %v103_v59 = vmax.f32 %v53_v46, 0.0  ;;  %v19_v60 = vld [vmem:[%s6179_s0 + $0x8] sm:$0xff]  ;;  %v119_v1 = vpack.c.bf16 %v71_v49, %v70_v48 }
  0x15   :  { %1065 = vmatpush.bf16.msra.mxu2 %v138_v18  ;;  %1203 = vmatpush.bf16.msra.mxu3 %v142_v37  ;;  %v34_v61 = vld [vmem:[%s6179_s0 + $0x80] sm:$0xff]  ;;  %v35_v62 = vld [vmem:[%s6179_s0 + $0x88] sm:$0xff]  ;;  %v127_v2 = vpack.c.bf16 %v87_v51, %v86_v50  ;;  %v68_v3 = vmax.f32 %v18_v56, 0.0  ;;  %v69_v4 = vmax.f32 %v19_v60, 0.0  ;;  %v2795_v10 = vld [vmem:[%s6178_s3 + $0x70] sm:$0xff] }
  0x16   :  { %v50_v63 = vld [vmem:[%s6179_s0 + $0x100] sm:$0xff]  ;;  %v51_v0 = vld [vmem:[%s6179_s0 + $0x108] sm:$0xff]  ;;  %v84_v5 = vmax.f32 %v34_v61, 0.0  ;;  %v85_v6 = vmax.f32 %v35_v62, 0.0  ;;  %v135_v7 = vpack.c.bf16 %v103_v59, %v102_v58  ;;  %v3612_v16 = vld [vmem:[%s6180_s1 + $0xc] sm:$0xf0] }
  0x17   :  { %v100_v8 = vmax.f32 %v50_v63, 0.0  ;;  %v101_v9 = vmax.f32 %v51_v0, 0.0  ;;  %v2794_v11 = vld [vmem:[%s6178_s3 + $0x68] sm:$0xff]  ;;  %v2793_v12 = vld [vmem:[%s6178_s3 + $0x60] sm:$0xff]  ;;  %v118_v14 = vpack.c.bf16 %v69_v4, %v68_v3  ;;  %v3189_v18 = vld [vmem:[%s6180_s1 + $0x10] sm:$0xf0] }
  0x18   :  { %798 = vmatpush.bf16.msra.mxu0 %v121_v34  ;;  %932 = vmatpush.bf16.msra.mxu1 %v129_v35  ;;  %v3187_v13 = vld [vmem:[%s6180_s1] sm:$0xf]  ;;  %v126_v15 = vpack.c.bf16 %v85_v6, %v84_v5  ;;  %v3610_v17 = vld [vmem:[%s6180_s1 + $0x4] sm:$0xf]  ;;  %v3195_v20 = vld [vmem:[%s6180_s1 + $0x8] sm:$0xf] }
  0x19   :  { %1066 = vmatpush.bf16.msra.mxu2 %v137_v41  ;;  %3585 = vmatmul.msk.bf16.vlgmr.msra.gmra.mxu3 %vm718_vm0, %v3200_v44  ;;  %v134_v19 = vpack.c.bf16 %v101_v9, %v100_v8  ;;  %v3613_v21 = vld [vmem:[%s6180_s1 + $0x14] sm:$0xf0]  ;;  %v3615_v22 = vld [vmem:[%s6180_s1 + $0x2c] sm:$0xf]  ;;  %v3213_v23 = vld [vmem:[%s6180_s1 + $0x38] sm:$0xf0]  ;;  %v3188_v24 = vor.u32 %v3612_v16, %v3187_v13  ;;  %v3192_v25 = vor.u32 %v3610_v17, %v3189_v18 }
  0x1a   :  { %2888 = vperm.xlu2 %3713, %v2792_v47   ;;  %v3196_v26 = vor.u32 %v3613_v21, %v3195_v20  ;;  %v3216_v27 = vor.u32 %v3615_v22, %v3213_v23  ;;  %v2798_v28 = vld [vmem:[%s6178_s3 + $0x88] sm:$0xff]  ;;  %v2797_v29 = vld [vmem:[%s6178_s3 + $0x80] sm:$0xff]  ;;  %v2796_v30 = vld [vmem:[%s6178_s3 + $0x78] sm:$0xff] }
  0x1b   :  { %2883 = vperm.xlu0 %3712, %v2791_v52   ;;  %2878 = vperm.xlu1 %3711, %v2790_v53   ;;  %v2801_v31 = vld [vmem:[%s6178_s3 + $0xa0] sm:$0xff]  ;;  %v2800_v32 = vld [vmem:[%s6178_s3 + $0x98] sm:$0xff]  ;;  %v2799_v33 = vld [vmem:[%s6178_s3 + $0x90] sm:$0xff] }
  0x1c   :  { %799 = vmatpush.bf16.msra.mxu0 %v120_v54  ;;  %933 = vmatpush.bf16.msra.mxu1 %v128_v55  ;;  %v3203_v34 = vld [vmem:[%s6180_s1 + $0x20] sm:$0xf]  ;;  %v3616_v35 = vld [vmem:[%s6180_s1 + $0x2c] sm:$0xf0]  ;;  %v3614_v36 = vld [vmem:[%s6180_s1 + $0x24] sm:$0xf] }
  0x1d   :  { %1067 = vmatpush.bf16.msra.mxu2 %v136_v57  ;;  %v3205_v37 = vld [vmem:[%s6180_s1 + $0x30] sm:$0xf0]  ;;  %v3211_v38 = vld [vmem:[%s6180_s1 + $0x28] sm:$0xf]  ;;  %v3617_v39 = vld [vmem:[%s6180_s1 + $0x34] sm:$0xf0]  ;;  %v3204_v42 = vor.u32 %v3616_v35, %v3203_v34 }
  0x1e   :  { %v3619_v40 = vld [vmem:[%s6180_s1 + $0x4c] sm:$0xf]  ;;  %v3229_v41 = vld [vmem:[%s6180_s1 + $0x58] sm:$0xf0]  ;;  %v3208_v43 = vor.u32 %v3614_v36, %v3205_v37  ;;  %v3212_v44 = vor.u32 %v3617_v39, %v3211_v38  ;;  %v2803_v47 = vld [vmem:[%s6178_s3 + $0xb0] sm:$0xff] }
  0x1f   :  { %v3232_v45 = vor.u32 %v3619_v40, %v3229_v41  ;;  %v2804_v46 = vld [vmem:[%s6178_s3 + $0xb8] sm:$0xff]  ;;  %v2802_v48 = vld [vmem:[%s6178_s3 + $0xa8] sm:$0xff]  ;;  %v2807_v49 = vld [vmem:[%s6178_s3 + $0xd0] sm:$0xff] }
  0x20   :  { %800 = vmatpush.bf16.msra.mxu0 %v119_v1  ;;  %934 = vmatpush.bf16.msra.mxu1 %v127_v2  ;;  %v2806_v50 = vld [vmem:[%s6178_s3 + $0xc8] sm:$0xff]  ;;  %v2805_v51 = vld [vmem:[%s6178_s3 + $0xc0] sm:$0xff]  ;;  %v3620_v53 = vld [vmem:[%s6180_s1 + $0x4c] sm:$0xf0] }
  0x21   :  { %1068 = vmatpush.bf16.msra.mxu2 %v135_v7  ;;  %v3219_v52 = vld [vmem:[%s6180_s1 + $0x40] sm:$0xf]  ;;  %v3618_v54 = vld [vmem:[%s6180_s1 + $0x44] sm:$0xf]  ;;  %v3221_v55 = vld [vmem:[%s6180_s1 + $0x50] sm:$0xf0] }
  0x22   :  { %2903 = vperm.xlu2 %3713, %v2795_v10   ;;  %v3227_v56 = vld [vmem:[%s6180_s1 + $0x48] sm:$0xf]  ;;  %v3621_v57 = vld [vmem:[%s6180_s1 + $0x54] sm:$0xf0]  ;;  %v3623_v58 = vld [vmem:[%s6180_s1 + $0x6c] sm:$0xf]  ;;  %v3220_v60 = vor.u32 %v3620_v53, %v3219_v52  ;;  %v3224_v61 = vor.u32 %v3618_v54, %v3221_v55 }
  0x23   :  { %2898 = vperm.xlu0 %3712, %v2794_v11   ;;  %2893 = vperm.xlu1 %3711, %v2793_v12   ;;  %v3245_v59 = vld [vmem:[%s6180_s1 + $0x78] sm:$0xf0]  ;;  %v3228_v62 = vor.u32 %v3621_v57, %v3227_v56  ;;  %v2810_v0 = vld [vmem:[%s6178_s3 + $0xe8] sm:$0xff]  ;;  %v2809_v1 = vld [vmem:[%s6178_s3 + $0xe0] sm:$0xff] }
  0x24   :  { %801 = vmatpush.bf16.msra.mxu0 %v118_v14  ;;  %935 = vmatpush.bf16.msra.mxu1 %v126_v15  ;;  %v3248_v63 = vor.u32 %v3623_v58, %v3245_v59  ;;  %v2808_v2 = vld [vmem:[%s6178_s3 + $0xd8] sm:$0xff]  ;;  %v2813_v3 = vld [vmem:[%s6178_s3 + $0x100] sm:$0xff]  ;;  %v2811_v5 = vld [vmem:[%s6178_s3 + $0xf0] sm:$0xff] }
  0x25   :  { %1069 = vmatpush.bf16.msra.mxu2 %v134_v19  ;;  %v2812_v4 = vld [vmem:[%s6178_s3 + $0xf8] sm:$0xff]  ;;  %v3235_v6 = vld [vmem:[%s6180_s1 + $0x60] sm:$0xf]  ;;  %v3624_v7 = vld [vmem:[%s6180_s1 + $0x6c] sm:$0xf0] }
  0x26   :  { %v3622_v8 = vld [vmem:[%s6180_s1 + $0x64] sm:$0xf]  ;;  %v3237_v9 = vld [vmem:[%s6180_s1 + $0x70] sm:$0xf0]  ;;  %v3243_v10 = vld [vmem:[%s6180_s1 + $0x68] sm:$0xf]  ;;  %v3236_v14 = vor.u32 %v3624_v7, %v3235_v6 }
  0x27   :  { %802 = vmatmul.bf16.vlgmr.msra.gmra.mxu0 %v3188_v24  ;;  %936 = vmatmul.bf16.vlgmr.msra.gmra.mxu1 %v3192_v25  ;;  %v3625_v11 = vld [vmem:[%s6180_s1 + $0x74] sm:$0xf0]  ;;  %v3627_v12 = vld [vmem:[%s6180_s1 + $0x8c] sm:$0xf]  ;;  %v3261_v13 = vld [vmem:[%s6180_s1 + $0x98] sm:$0xf0]  ;;  %v3240_v15 = vor.u32 %v3622_v8, %v3237_v9 }
  0x28   :  { %1070 = vmatmul.bf16.vlgmr.msra.gmra.mxu2 %v3196_v26  ;;  %v3244_v16 = vor.u32 %v3625_v11, %v3243_v10  ;;  %v3264_v17 = vor.u32 %v3627_v12, %v3261_v13  ;;  %v2816_v18 = vld [vmem:[%s6178_s3 + $0x118] sm:$0xff]  ;;  %v2815_v19 = vld [vmem:[%s6178_s3 + $0x110] sm:$0xff]  ;;  %v2814_v20 = vld [vmem:[%s6178_s3 + $0x108] sm:$0xff] }
  0x29   :  { %3586 = vmatmul.msk.bf16.gmra.mxu3 %vm718_vm0, %v3216_v27  ;;  %v2819_v21 = vld [vmem:[%s6178_s3 + $0x130] sm:$0xff]  ;;  %v2818_v22 = vld [vmem:[%s6178_s3 + $0x128] sm:$0xff]  ;;  %v2817_v23 = vld [vmem:[%s6178_s3 + $0x120] sm:$0xff] }
  0x2a   :  { %2918 = vperm.xlu2 %3713, %v2798_v28   ;;  %v3251_v24 = vld [vmem:[%s6180_s1 + $0x80] sm:$0xf]  ;;  %v3628_v25 = vld [vmem:[%s6180_s1 + $0x8c] sm:$0xf0]  ;;  %v3626_v26 = vld [vmem:[%s6180_s1 + $0x84] sm:$0xf] }
  0x2b   :  { %2913 = vperm.xlu0 %3712, %v2797_v29   ;;  %2908 = vperm.xlu1 %3711, %v2796_v30   ;;  %v3253_v27 = vld [vmem:[%s6180_s1 + $0x90] sm:$0xf0]  ;;  %v3259_v28 = vld [vmem:[%s6180_s1 + $0x88] sm:$0xf]  ;;  %v3629_v29 = vld [vmem:[%s6180_s1 + $0x94] sm:$0xf0] }
  0x2c   :  { %v3631_v30 = vld [vmem:[%s6180_s1 + $0xac] sm:$0xf]  ;;  %v3260_v34 = vor.u32 %v3629_v29, %v3259_v28  ;;  %v2821_v37 = vld [vmem:[%s6178_s3 + $0x140] sm:$0xff]  ;;  %v2820_v38 = vld [vmem:[%s6178_s3 + $0x138] sm:$0xff] }
  0x2d   :  { %v2822_v36 = vld [vmem:[%s6178_s3 + $0x148] sm:$0xff]  ;;  %v2825_v39 = vld [vmem:[%s6178_s3 + $0x160] sm:$0xff]  ;;  %v2824_v40 = vld [vmem:[%s6178_s3 + $0x158] sm:$0xff] }
  0x2e   :  { %v2823_v41 = vld [vmem:[%s6178_s3 + $0x150] sm:$0xff]  ;;  %v2826_v55 = vld [vmem:[%s6178_s3 + $0x168] sm:$0xff]  ;;  %v3283_v56 = vld [vmem:[%s6180_s1 + $0xc0] sm:$0xf] }
  0x2f   :  { %v2827_v54 = vld [vmem:[%s6178_s3 + $0x170] sm:$0xff]  ;;  %v3634_v58 = vld [vmem:[%s6180_s1 + $0xc4] sm:$0xf]  ;;  %v3299_v6 = vld [vmem:[%s6180_s1 + $0xe0] sm:$0xf] }
  0x30   :  { %v3636_v57 = vld [vmem:[%s6180_s1 + $0xcc] sm:$0xf0]  ;;  %v3285_v59 = vld [vmem:[%s6180_s1 + $0xd0] sm:$0xf0]  ;;  %v3638_v8 = vld [vmem:[%s6180_s1 + $0xe4] sm:$0xf] }
  0x31   :  { %v3640_v7 = vld [vmem:[%s6180_s1 + $0xec] sm:$0xf0]  ;;  %v3301_v9 = vld [vmem:[%s6180_s1 + $0xf0] sm:$0xf0]  ;;  %v3307_v10 = vld [vmem:[%s6180_s1 + $0xe8] sm:$0xf] }
  0x32   :  { %2933 = vperm.xlu2 %3713, %v2801_v31   ;;  %v3277_v31 = vld [vmem:[%s6180_s1 + $0xb8] sm:$0xf0]  ;;  %v3641_v11 = vld [vmem:[%s6180_s1 + $0xf4] sm:$0xf0]  ;;  %v3643_v12 = vld [vmem:[%s6180_s1 + $0x10c] sm:$0xf] }
  0x33   :  { %2928 = vperm.xlu0 %3712, %v2800_v32   ;;  %2923 = vperm.xlu1 %3711, %v2799_v33   ;;  %v3252_v32 = vor.u32 %v3628_v25, %v3251_v24  ;;  %v3256_v33 = vor.u32 %v3626_v26, %v3253_v27  ;;  %v3280_v35 = vor.u32 %v3631_v30, %v3277_v31  ;;  %v3325_v13 = vld [vmem:[%s6180_s1 + $0x118] sm:$0xf0]  ;;  %v3642_v24 = vld [vmem:[%s6180_s1 + $0x104] sm:$0xf]  ;;  %v3317_v25 = vld [vmem:[%s6180_s1 + $0x110] sm:$0xf0] }
  0x34   :  { %v3323_v26 = vld [vmem:[%s6180_s1 + $0x108] sm:$0xf]  ;;  %v3645_v27 = vld [vmem:[%s6180_s1 + $0x114] sm:$0xf0]  ;;  %v3647_v28 = vld [vmem:[%s6180_s1 + $0x12c] sm:$0xf] }
  0x35   :  { %v3341_v29 = vld [vmem:[%s6180_s1 + $0x138] sm:$0xf0] }
  0x37   :  { %807 = vmatmul.bf16.gmra.mxu0 %v3204_v42  ;;  %941 = vmatmul.bf16.gmra.mxu1 %v3208_v43  ;;  %v3267_v42 = vld [vmem:[%s6180_s1 + $0xa0] sm:$0xf]  ;;  %v3632_v43 = vld [vmem:[%s6180_s1 + $0xac] sm:$0xf0] }
  0x38   :  { %1075 = vmatmul.bf16.gmra.mxu2 %v3212_v44  ;;  %v3630_v44 = vld [vmem:[%s6180_s1 + $0xa4] sm:$0xf] }
  0x39   :  { %3587 = vmatmul.msk.bf16.gmra.mxu3 %vm718_vm0, %v3232_v45  ;;  %v3269_v45 = vld [vmem:[%s6180_s1 + $0xb0] sm:$0xf0] }
  0x3a   :  { %2948 = vperm.xlu2 %3713, %v2804_v46   ;;  %v3275_v46 = vld [vmem:[%s6180_s1 + $0xa8] sm:$0xf] }
  0x3b   :  { %2943 = vperm.xlu0 %3712, %v2803_v47   ;;  %2938 = vperm.xlu1 %3711, %v2802_v48   ;;  %v3633_v47 = vld [vmem:[%s6180_s1 + $0xb4] sm:$0xf0]  ;;  %v3635_v48 = vld [vmem:[%s6180_s1 + $0xcc] sm:$0xf] }
  0x3c   :  { %v3276_v52 = vor.u32 %v3633_v47, %v3275_v46 }
  0x42   :  { %2963 = vperm.xlu2 %3713, %v2807_v49   ;;  %v3293_v49 = vld [vmem:[%s6180_s1 + $0xd8] sm:$0xf0] }
  0x43   :  { %2958 = vperm.xlu0 %3712, %v2806_v50   ;;  %2953 = vperm.xlu1 %3711, %v2805_v51   ;;  %v3268_v50 = vor.u32 %v3632_v43, %v3267_v42  ;;  %v3272_v51 = vor.u32 %v3630_v44, %v3269_v45  ;;  %v3296_v53 = vor.u32 %v3635_v48, %v3293_v49  ;;  %v3331_v48 = vld [vmem:[%s6180_s1 + $0x120] sm:$0xf]  ;;  %v3648_v49 = vld [vmem:[%s6180_s1 + $0x12c] sm:$0xf0] }
  0x47   :  { %812 = vmatmul.bf16.gmra.mxu0 %v3220_v60  ;;  %946 = vmatmul.bf16.gmra.mxu1 %v3224_v61  ;;  %v3291_v60 = vld [vmem:[%s6180_s1 + $0xc8] sm:$0xf]  ;;  %v3637_v61 = vld [vmem:[%s6180_s1 + $0xd4] sm:$0xf0] }
  0x48   :  { %1080 = vmatmul.bf16.gmra.mxu2 %v3228_v62  ;;  %v3639_v62 = vld [vmem:[%s6180_s1 + $0xec] sm:$0xf] }
  0x49   :  { %3588 = vmatmul.msk.bf16.gmra.mxu3 %vm718_vm0, %v3248_v63  ;;  %v3309_v63 = vld [vmem:[%s6180_s1 + $0xf8] sm:$0xf0] }
  0x4a   :  { %2978 = vperm.xlu2 %3713, %v2810_v0   ;;  %v3284_v0 = vor.u32 %v3636_v57, %v3283_v56  ;;  %v3651_v56 = vld [vmem:[%s6180_s1 + $0x14c] sm:$0xf]  ;;  %v3357_v57 = vld [vmem:[%s6180_s1 + $0x158] sm:$0xf0] }
  0x4b   :  { %2973 = vperm.xlu0 %3712, %v2809_v1   ;;  %2968 = vperm.xlu1 %3711, %v2808_v2   ;;  %v3288_v1 = vor.u32 %v3634_v58, %v3285_v59  ;;  %v3292_v2 = vor.u32 %v3637_v61, %v3291_v60  ;;  %v3332_v60 = vor.u32 %v3648_v49, %v3331_v48 }
  0x52   :  { %2993 = vperm.xlu2 %3713, %v2813_v3  }
  0x53   :  { %2988 = vperm.xlu0 %3712, %v2812_v4   ;;  %2983 = vperm.xlu1 %3711, %v2811_v5   ;;  %v3312_v4 = vor.u32 %v3639_v62, %v3309_v63 }
  0x57   :  { %817 = vmatmul.bf16.gmra.mxu0 %v3236_v14  ;;  %951 = vmatmul.bf16.gmra.mxu1 %v3240_v15  ;;  %v3300_v14 = vor.u32 %v3640_v7, %v3299_v6  ;;  %v3304_v15 = vor.u32 %v3638_v8, %v3301_v9 }
  0x58   :  { %1085 = vmatmul.bf16.gmra.mxu2 %v3244_v16  ;;  %v3308_v16 = vor.u32 %v3641_v11, %v3307_v10 }
  0x59   :  { %3589 = vmatmul.msk.bf16.gmra.mxu3 %vm718_vm0, %v3264_v17 }
  0x5a   :  { %3008 = vperm.xlu2 %3713, %v2816_v18   ;;  %v3328_v18 = vor.u32 %v3643_v12, %v3325_v13 }
  0x5b   :  { %3003 = vperm.xlu0 %3712, %v2815_v19   ;;  %2998 = vperm.xlu1 %3711, %v2814_v20  }
  0x5c   :  { %v4381_v47 = vpop.permute.xlu2 %2843 }
  0x62   :  { %3023 = vperm.xlu2 %3713, %v2819_v21  }
  0x63   :  { %3018 = vperm.xlu0 %3712, %v2818_v22   ;;  %3013 = vperm.xlu1 %3711, %v2817_v23   ;;  %v3315_v22 = vld [vmem:[%s6180_s1 + $0x100] sm:$0xf]  ;;  %v3644_v23 = vld [vmem:[%s6180_s1 + $0x10c] sm:$0xf0] }
  0x64   :  { %v3316_v31 = vor.u32 %v3644_v23, %v3315_v22  ;;  %v4417_v10 = vpop.permute.xlu2 %2858  ;;  %v3652_v22 = vld [vmem:[%s6180_s1 + $0x14c] sm:$0xf0] }
  0x67   :  { %822 = vmatmul.bf16.gmra.mxu0 %v3252_v32  ;;  %956 = vmatmul.bf16.gmra.mxu1 %v3256_v33  ;;  %v3320_v32 = vor.u32 %v3642_v24, %v3317_v25  ;;  %v3650_v24 = vld [vmem:[%s6180_s1 + $0x144] sm:$0xf]  ;;  %v3349_v25 = vld [vmem:[%s6180_s1 + $0x150] sm:$0xf0] }
  0x68   :  { %1090 = vmatmul.bf16.gmra.mxu2 %v3260_v34 }
  0x69   :  { %3590 = vmatmul.msk.bf16.gmra.mxu3 %vm718_vm0, %v3280_v35  ;;  %v3324_v35 = vor.u32 %v3645_v27, %v3323_v26  ;;  %v3355_v27 = vld [vmem:[%s6180_s1 + $0x148] sm:$0xf] }
  0x6a   :  { %3038 = vperm.xlu2 %3713, %v2822_v36   ;;  %v3344_v36 = vor.u32 %v3647_v28, %v3341_v29  ;;  %v3653_v28 = vld [vmem:[%s6180_s1 + $0x154] sm:$0xf0] }
  0x6b   :  { %3033 = vperm.xlu0 %3712, %v2821_v37   ;;  %3028 = vperm.xlu1 %3711, %v2820_v38  }
  0x72   :  { %3053 = vperm.xlu2 %3713, %v2825_v39  }
  0x73   :  { %3048 = vperm.xlu0 %3712, %v2824_v40   ;;  %3043 = vperm.xlu1 %3711, %v2823_v41  }
  0x75   :  { %v4312_v3 = vpop.permute.xlu0 %2838  ;;  %v4341_v17 = vpop.permute.xlu1 %2833 }
  0x77   :  { %827 = vmatmul.bf16.gmra.mxu0 %v3268_v50  ;;  %961 = vmatmul.bf16.gmra.mxu1 %v3272_v51  ;;  %v3646_v51 = vld [vmem:[%s6180_s1 + $0x124] sm:$0xf] }
  0x78   :  { %1095 = vmatmul.bf16.gmra.mxu2 %v3276_v52  ;;  %v3333_v52 = vld [vmem:[%s6180_s1 + $0x130] sm:$0xf0] }
  0x79   :  { %3591 = vmatmul.msk.bf16.gmra.mxu3 %vm718_vm0, %v3296_v53  ;;  %v3339_v53 = vld [vmem:[%s6180_s1 + $0x128] sm:$0xf]  ;;  %v3336_v61 = vor.u32 %v3646_v51, %v3333_v52 }
  0x7b   :  { %3063 = vperm.xlu0 %3712, %v2827_v54   ;;  %3058 = vperm.xlu1 %3711, %v2826_v55   ;;  %v3649_v54 = vld [vmem:[%s6180_s1 + $0x134] sm:$0xf0] }
  0x7d   :  { %v4315_v5 = vpop.permute.xlu0 %2853  ;;  %v4346_v21 = vpop.permute.xlu1 %2848 }
  0x85   :  { %v4343_v19 = vpop.permute.xlu0 %2868  ;;  %v4374_v39 = vpop.permute.xlu1 %2863 }
  0x86   :  { %6205 = vst [vmem:[#allocation2_spill] sm:$0xff] %v4343_v19 }
  0x87   :  { %832 = vmatmul.bf16.gmra.mxu0 %v3284_v0  ;;  %966 = vmatmul.bf16.gmra.mxu1 %v3288_v1  ;;  %v3340_v1 = vor.u32 %v3649_v54, %v3339_v53 }
  0x88   :  { %1100 = vmatmul.bf16.gmra.mxu2 %v3292_v2  ;;  %v3360_v2 = vor.u32 %v3651_v56, %v3357_v57 }
  0x89   :  { %3592 = vmatmul.msk.bf16.gmra.mxu3 %vm718_vm0, %v3312_v4 }
  0x8d   :  { %v4372_v30 = vpop.permute.xlu0 %2883  ;;  %v4409_v58 = vpop.permute.xlu1 %2878 }
  0x8e   :  { %6206 = vst [vmem:[#allocation3_spill] sm:$0xff] %v4372_v30 }
  0x95   :  { %v4377_v44 = vpop.permute.xlu0 %2898 }
  0x96   :  { %6207 = vst [vmem:[#allocation4_spill] sm:$0xff] %v4377_v44 }
  0x97   :  { %837 = vmatmul.bf16.gmra.mxu0 %v3300_v14  ;;  %971 = vmatmul.bf16.gmra.mxu1 %v3304_v15  ;;  %v4420_v15 = vpop.permute.xlu1 %2893 }
  0x98   :  { %1105 = vmatmul.bf16.gmra.mxu2 %v3308_v16 }
  0x99   :  { %3593 = vmatmul.msk.bf16.gmra.mxu3 %vm718_vm0, %v3328_v18 }
  0x9c   :  { %v1205_v20 = vpop.f32.mrf.mxu3 }
  0x9d   :  { %v4413_v7 = vpop.permute.xlu0 %2913 }
  0x9e   :  { %6208 = vst [vmem:[#allocation5_spill] sm:$0xff] %v4413_v7 }
  0x9f   :  { %v4456_v48 = vpop.permute.xlu1 %2908 }
  0xa0   :  { %6211 = vst [vmem:[#allocation8_spill] sm:$0xff] %v4456_v48 }
  0xa4   :  { %v803_v33 = vpop.f32.mrf.mxu0  ;;  %v937_v34 = vpop.f32.mrf.mxu1 }
  0xa5   :  { %v1207_v37 = vpop.f32.mrf.mxu3  ;;  %v938_v38 = vadd.f32 %v937_v34, %v803_v33  ;;  %v4438_v26 = vpop.permute.xlu0 %2928 }
  0xa6   :  { %6209 = vst [vmem:[#allocation6_spill] sm:$0xff] %v4438_v26  ;;  %v4452_v33 = vpop.permute.xlu2 %2873 }
  0xa7   :  { %842 = vmatmul.bf16.gmra.mxu0 %v3316_v31  ;;  %976 = vmatmul.bf16.gmra.mxu1 %v3320_v32  ;;  %v3655_v31 = vld [vmem:[%s6180_s1 + $0x16c] sm:$0xf]  ;;  %v3373_v32 = vld [vmem:[%s6180_s1 + $0x178] sm:$0xf0]  ;;  %6210 = vst [vmem:[#allocation7_spill] sm:$0xff] %v4452_v33 }
  0xa8   :  { %1110 = vmatmul.bf16.gmra.mxu2 %v3324_v35 }
  0xa9   :  { %3594 = vmatmul.msk.bf16.gmra.mxu3 %vm718_vm0, %v3344_v36  ;;  %v3352_v36 = vor.u32 %v3650_v24, %v3349_v25 }
  0xab   :  { %v1071_v40 = vpop.f32.mrf.mxu2 }
  0xac   :  { %v1072_v41 = vadd.f32 %v1071_v40, %v938_v38  ;;  %v805_v42 = vpop.f32.mrf.mxu0  ;;  %v939_v43 = vpop.f32.mrf.mxu1 }
  0xad   :  { %v1210_v46 = vpop.f32.mrf.mxu3  ;;  %v940_v55 = vadd.f32 %v939_v43, %v805_v42  ;;  %v3376_v42 = vor.u32 %v3655_v31, %v3373_v32  ;;  %v4461_v51 = vpop.permute.xlu0 %2943 }
  0xae   :  { %v4379_v45 = vadd.f32 %v1205_v20, %v1072_v41  ;;  %v3347_v20 = vld [vmem:[%s6180_s1 + $0x140] sm:$0xf]  ;;  %v3356_v41 = vor.u32 %v3653_v28, %v3355_v27  ;;  %6212 = vst [vmem:[#allocation9_spill] sm:$0xff] %v4461_v51  ;;  %v4463_v56 = vpop.permute.xlu2 %2888 }
  0xaf   :  { %v3348_v35 = vor.u32 %v3652_v22, %v3347_v20  ;;  %6213 = vst [vmem:[#allocation10_spill] sm:$0xff] %v4463_v56 }
  0xb0   :  { %v1331_v50 = vsel %vm1330_vm1, %v4379_v45, 0.0 }
  0xb1   :  { %1332 = vadd.xlane.f32.xlu0 %v1331_v50 }
  0xb3   :  { %v1073_v59 = vpop.f32.mrf.mxu2 }
  0xb4   :  { %v1074_v62 = vadd.f32 %v1073_v59, %v940_v55  ;;  %v808_v63 = vpop.f32.mrf.mxu0  ;;  %v942_v0 = vpop.f32.mrf.mxu1 }
  0xb5   :  { %v1212_v6 = vpop.f32.mrf.mxu3  ;;  %v943_v8 = vadd.f32 %v942_v0, %v808_v63  ;;  %v3654_v63 = vld [vmem:[%s6180_s1 + $0x164] sm:$0xf]  ;;  %v3365_v0 = vld [vmem:[%s6180_s1 + $0x170] sm:$0xf0]  ;;  %v4495_v24 = vpop.permute.xlu0 %2958 }
  0xb6   :  { %v4411_v4 = vadd.f32 %v1207_v37, %v1074_v62  ;;  %6215 = vst [vmem:[#allocation12_spill] sm:$0xff] %v4495_v24 }
  0xb7   :  { %847 = vmatmul.bf16.gmra.mxu0 %v3332_v60  ;;  %981 = vmatmul.bf16.gmra.mxu1 %v3336_v61  ;;  %v3363_v60 = vld [vmem:[%s6180_s1 + $0x160] sm:$0xf]  ;;  %v3656_v61 = vld [vmem:[%s6180_s1 + $0x16c] sm:$0xf0] }
  0xb8   :  { %1115 = vmatmul.bf16.gmra.mxu2 %v3340_v1  ;;  %v1334_v9 = vsel %vm1330_vm1, %v4411_v4, 0.0  ;;  %v4481_v1 = vpop.permute.xlu1 %2923 }
  0xb9   :  { %1335 = vadd.xlane.f32.xlu0 %v1334_v9  ;;  %3595 = vmatmul.msk.bf16.gmra.mxu3 %vm718_vm0, %v3360_v2  ;;  %6214 = vst [vmem:[#allocation11_spill] sm:$0xff] %v4481_v1  ;;  %v3371_v2 = vld [vmem:[%s6180_s1 + $0x168] sm:$0xf]  ;;  %v3659_v9 = vld [vmem:[%s6180_s1 + $0x18c] sm:$0xf] }
  0xbb   :  { %v1076_v11 = vpop.f32.mrf.mxu2 }
  0xbc   :  { %v1077_v12 = vadd.f32 %v1076_v11, %v943_v8  ;;  %v810_v13 = vpop.f32.mrf.mxu0  ;;  %v944_v14 = vpop.f32.mrf.mxu1  ;;  %v3389_v11 = vld [vmem:[%s6180_s1 + $0x198] sm:$0xf0] }
  0xbd   :  { %v1215_v18 = vpop.f32.mrf.mxu3  ;;  %v945_v29 = vadd.f32 %v944_v14, %v810_v13  ;;  %v3364_v13 = vor.u32 %v3656_v61, %v3363_v60  ;;  %v3368_v14 = vor.u32 %v3654_v63, %v3365_v0  ;;  %v3392_v25 = vor.u32 %v3659_v9, %v3389_v11  ;;  %v3663_v61 = vld [vmem:[%s6180_s1 + $0x1ac] sm:$0xf] }
  0xbe   :  { %v4422_v16 = vadd.f32 %v1210_v46, %v1077_v12 }
  0xc0   :  { %v1337_v23 = vsel %vm1330_vm1, %v4422_v16, 0.0 }
  0xc1   :  { %1338 = vadd.xlane.f32.xlu1 %v1337_v23 }
  0xc3   :  { %v1078_v34 = vpop.f32.mrf.mxu2 }
  0xc4   :  { %v1079_v37 = vadd.f32 %v1078_v34, %v945_v29  ;;  %v813_v38 = vpop.f32.mrf.mxu0  ;;  %v947_v40 = vpop.f32.mrf.mxu1 }
  0xc5   :  { %v1217_v46 = vpop.f32.mrf.mxu3  ;;  %v948_v49 = vadd.f32 %v947_v40, %v813_v38  ;;  %v4499_v29 = vpop.permute.xlu2 %2903 }
  0xc6   :  { %v4454_v43 = vadd.f32 %v1212_v6, %v1079_v37  ;;  %v3657_v6 = vld [vmem:[%s6180_s1 + $0x174] sm:$0xf0]  ;;  %6216 = vst [vmem:[#allocation13_spill] sm:$0xff] %v4499_v29  ;;  %v4504_v34 = vpop.permute.xlu1 %2938 }
  0xc7   :  { %852 = vmatmul.bf16.gmra.mxu0 %v3348_v35  ;;  %986 = vmatmul.bf16.gmra.mxu1 %v3352_v36  ;;  %v3372_v23 = vor.u32 %v3657_v6, %v3371_v2  ;;  %6217 = vst [vmem:[#allocation14_spill] sm:$0xff] %v4504_v34 }
  0xc8   :  { %1120 = vmatmul.bf16.gmra.mxu2 %v3356_v41  ;;  %v1340_v50 = vsel %vm1330_vm1, %v4454_v43, 0.0 }
  0xc9   :  { %1341 = vadd.xlane.f32.xlu1 %v1340_v50  ;;  %3596 = vmatmul.msk.bf16.gmra.mxu3 %vm718_vm0, %v3376_v42  ;;  %v4508_v42 = vpop.permute.xlu0 %2973 }
  0xca   :  { %6218 = vst [vmem:[#allocation15_spill] sm:$0xff] %v4508_v42 }
  0xcb   :  { %v1081_v52 = vpop.f32.mrf.mxu2 }
  0xcc   :  { %v1082_v53 = vadd.f32 %v1081_v52, %v948_v49  ;;  %v815_v54 = vpop.f32.mrf.mxu0  ;;  %v949_v55 = vpop.f32.mrf.mxu1  ;;  %v3660_v49 = vld [vmem:[%s6180_s1 + $0x18c] sm:$0xf0]  ;;  %v3658_v52 = vld [vmem:[%s6180_s1 + $0x184] sm:$0xf] }
  0xcd   :  { %v1220_v59 = vpop.f32.mrf.mxu3  ;;  %v950_v8 = vadd.f32 %v949_v55, %v815_v54  ;;  %v4524_v54 = vpop.permute.xlu2 %2918  ;;  %v3387_v55 = vld [vmem:[%s6180_s1 + $0x188] sm:$0xf] }
  0xce   :  { %v4465_v57 = vadd.f32 %v1215_v18, %v1082_v53  ;;  %v3381_v53 = vld [vmem:[%s6180_s1 + $0x190] sm:$0xf0]  ;;  %6219 = vst [vmem:[#allocation16_spill] sm:$0xff] %v4524_v54 }
  0xcf   :  { %v3384_v2 = vor.u32 %v3658_v52, %v3381_v53  ;;  %v3662_v52 = vld [vmem:[%s6180_s1 + $0x1a4] sm:$0xf]  ;;  %v3403_v53 = vld [vmem:[%s6180_s1 + $0x1a8] sm:$0xf] }
  0xd0   :  { %v1343_v62 = vsel %vm1330_vm1, %v4465_v57, 0.0 }
  0xd1   :  { %1344 = vadd.xlane.f32.xlu2 %v1343_v62  ;;  %v3405_v62 = vld [vmem:[%s6180_s1 + $0x1b8] sm:$0xf0] }
  0xd3   :  { %v1083_v12 = vpop.f32.mrf.mxu2 }
  0xd4   :  { %v1084_v18 = vadd.f32 %v1083_v12, %v950_v8  ;;  %v818_v20 = vpop.f32.mrf.mxu0  ;;  %v952_v22 = vpop.f32.mrf.mxu1 }
  0xd5   :  { %v1222_v28 = vpop.f32.mrf.mxu3  ;;  %v953_v31 = vadd.f32 %v952_v22, %v818_v20  ;;  %v4538_v12 = vpop.permute.xlu1 %2953 }
  0xd6   :  { %v4497_v27 = vadd.f32 %v1217_v46, %v1084_v18  ;;  %v3379_v46 = vld [vmem:[%s6180_s1 + $0x180] sm:$0xf]  ;;  %6220 = vst [vmem:[#allocation17_spill] sm:$0xff] %v4538_v12 }
  0xd7   :  { %857 = vmatmul.bf16.gmra.mxu0 %v3364_v13  ;;  %991 = vmatmul.bf16.gmra.mxu1 %v3368_v14  ;;  %v3380_v0 = vor.u32 %v3660_v49, %v3379_v46  ;;  %v3408_v13 = vor.u32 %v3663_v61, %v3405_v62  ;;  %v3395_v46 = vld [vmem:[%s6180_s1 + $0x1a0] sm:$0xf]  ;;  %v3664_v49 = vld [vmem:[%s6180_s1 + $0x1ac] sm:$0xf0]  ;;  %v3421_v61 = vld [vmem:[%s6180_s1 + $0x1d8] sm:$0xf0] }
  0xd8   :  { %1125 = vmatmul.bf16.gmra.mxu2 %v3372_v23  ;;  %v1346_v32 = vsel %vm1330_vm1, %v4497_v27, 0.0  ;;  %v4544_v23 = vpop.permute.xlu0 %2988 }
  0xd9   :  { %1347 = vadd.xlane.f32.xlu2 %v1346_v32  ;;  %3597 = vmatmul.msk.bf16.gmra.mxu3 %vm718_vm0, %v3392_v25  ;;  %6221 = vst [vmem:[#allocation18_spill] sm:$0xff] %v4544_v23  ;;  %v4547_v25 = vpop.permute.xlu2 %2933 }
  0xda   :  { %6222 = vst [vmem:[#allocation19_spill] sm:$0xff] %v4547_v25 }
  0xdb   :  { %v1086_v35 = vpop.f32.mrf.mxu2 }
  0xdc   :  { %v1087_v36 = vadd.f32 %v1086_v35, %v953_v31  ;;  %v820_v37 = vpop.f32.mrf.mxu0  ;;  %v954_v38 = vpop.f32.mrf.mxu1 }
  0xdd   :  { %v1225_v41 = vpop.f32.mrf.mxu3  ;;  %v955_v60 = vadd.f32 %v954_v38, %v820_v37  ;;  %v4551_v38 = vpop.permute.xlu1 %2968 }
  0xde   :  { %v4506_v40 = vadd.f32 %v1220_v59, %v1087_v36  ;;  %v3661_v59 = vld [vmem:[%s6180_s1 + $0x194] sm:$0xf0]  ;;  %6223 = vst [vmem:[#allocation20_spill] sm:$0xff] %v4551_v38 }
  0xdf   :  { %v3388_v11 = vor.u32 %v3661_v59, %v3387_v55  ;;  %v3665_v55 = vld [vmem:[%s6180_s1 + $0x1b4] sm:$0xf0] }
  0xe0   :  { %v1349_v50 = vsel %vm1330_vm1, %v4506_v40, 0.0  ;;  %v4579_v62 = vpop.permute.xlu0 %3003 }
  0xe1   :  { %1350 = vadd.xlane.f32.xlu0 %v1349_v50  ;;  %6224 = vst [vmem:[#allocation21_spill] sm:$0xff] %v4579_v62 }
  0xe3   :  { %v1088_v63 = vpop.f32.mrf.mxu2 }
  0xe4   :  { %v1089_v6 = vadd.f32 %v1088_v63, %v955_v60  ;;  %v823_v8 = vpop.f32.mrf.mxu0  ;;  %v957_v9 = vpop.f32.mrf.mxu1  ;;  %v3667_v60 = vld [vmem:[%s6180_s1 + $0x1cc] sm:$0xf] }
  0xe5   :  { %v1227_v18 = vpop.f32.mrf.mxu3  ;;  %v958_v20 = vadd.f32 %v957_v9, %v823_v8 }
  0xe6   :  { %v4540_v14 = vadd.f32 %v1222_v28, %v1089_v6 }
  0xe7   :  { %862 = vmatmul.bf16.gmra.mxu0 %v3380_v0  ;;  %996 = vmatmul.bf16.gmra.mxu1 %v3384_v2  ;;  %v3396_v0 = vor.u32 %v3664_v49, %v3395_v46 }
  0xe8   :  { %1130 = vmatmul.bf16.gmra.mxu2 %v3388_v11  ;;  %v1352_v22 = vsel %vm1330_vm1, %v4540_v14, 0.0  ;;  %v3404_v11 = vor.u32 %v3665_v55, %v3403_v53 }
  0xe9   :  { %1353 = vadd.xlane.f32.xlu1 %v1352_v22  ;;  %3598 = vmatmul.msk.bf16.gmra.mxu3 %vm718_vm0, %v3408_v13  ;;  %v4581_v13 = vpop.permute.xlu2 %2948 }
  0xea   :  { %6225 = vst [vmem:[#allocation22_spill] sm:$0xff] %v4581_v13 }
  0xeb   :  { %v1091_v31 = vpop.f32.mrf.mxu2 }
  0xec   :  { %v1092_v32 = vadd.f32 %v1091_v31, %v958_v20  ;;  %v825_v35 = vpop.f32.mrf.mxu0  ;;  %v959_v28 = vpop.f32.mrf.mxu1  ;;  %v3424_v20 = vor.u32 %v3667_v60, %v3421_v61  ;;  %v3668_v60 = vld [vmem:[%s6180_s1 + $0x1cc] sm:$0xf0] }
  0xed   :  { %v1230_v37 = vpop.f32.mrf.mxu3  ;;  %v960_v59 = vadd.f32 %v959_v28, %v825_v35  ;;  %v4587_v28 = vpop.permute.xlu1 %2983 }
  0xee   :  { %v4549_v36 = vadd.f32 %v1225_v41, %v1092_v32  ;;  %v3397_v41 = vld [vmem:[%s6180_s1 + $0x1b0] sm:$0xf0]  ;;  %6226 = vst [vmem:[#allocation23_spill] sm:$0xff] %v4587_v28 }
  0xef   :  { %v3400_v2 = vor.u32 %v3662_v52, %v3397_v41  ;;  %v4590_v41 = vpop.permute.xlu0 %3018 }
  0xf0   :  { %v1355_v50 = vsel %vm1330_vm1, %v4549_v36, 0.0  ;;  %6227 = vst [vmem:[#allocation24_spill] sm:$0xff] %v4590_v41 }
  0xf1   :  { %1356 = vadd.xlane.f32.xlu2 %v1355_v50  ;;  %v4594_v55 = vpop.permute.xlu2 %2963 }
  0xf2   :  { %6228 = vst [vmem:[#allocation25_spill] sm:$0xff] %v4594_v55 }
  0xf3   :  { %v1093_v63 = vpop.f32.mrf.mxu2 }
  0xf4   :  { %v1094_v6 = vadd.f32 %v1093_v63, %v960_v59  ;;  %v828_v8 = vpop.f32.mrf.mxu0  ;;  %v962_v9 = vpop.f32.mrf.mxu1  ;;  %v3411_v59 = vld [vmem:[%s6180_s1 + $0x1c0] sm:$0xf]  ;;  %v3666_v63 = vld [vmem:[%s6180_s1 + $0x1c4] sm:$0xf] }
  0xf5   :  { %v1232_v31 = vpop.f32.mrf.mxu3  ;;  %v963_v32 = vadd.f32 %v962_v9, %v828_v8  ;;  %v3671_v8 = vld [vmem:[%s6180_s1 + $0x1ec] sm:$0xf]  ;;  %v3437_v9 = vld [vmem:[%s6180_s1 + $0x1f8] sm:$0xf0] }
  0xf6   :  { %v4583_v22 = vadd.f32 %v1227_v18, %v1094_v6  ;;  %v3440_v62 = vor.u32 %v3671_v8, %v3437_v9  ;;  %v3435_v8 = vld [vmem:[%s6180_s1 + $0x1e8] sm:$0xf]  ;;  %v3673_v9 = vld [vmem:[%s6180_s1 + $0x1f4] sm:$0xf0] }
  0xf7   :  { %867 = vmatmul.bf16.gmra.mxu0 %v3396_v0  ;;  %1001 = vmatmul.bf16.gmra.mxu1 %v3400_v2  ;;  %v3419_v0 = vld [vmem:[%s6180_s1 + $0x1c8] sm:$0xf]  ;;  %v3669_v2 = vld [vmem:[%s6180_s1 + $0x1d4] sm:$0xf0] }
  0xf8   :  { %1135 = vmatmul.bf16.gmra.mxu2 %v3404_v11  ;;  %v1358_v35 = vsel %vm1330_vm1, %v4583_v22, 0.0  ;;  %v4622_v11 = vpop.permute.xlu1 %2998  ;;  %v3420_v41 = vor.u32 %v3669_v2, %v3419_v0 }
  0xf9   :  { %1359 = vadd.xlane.f32.xlu0 %v1358_v35  ;;  %3599 = vmatmul.msk.bf16.gmra.mxu3 %vm718_vm0, %v3424_v20  ;;  %6229 = vst [vmem:[#allocation26_spill] sm:$0xff] %v4622_v11  ;;  %v4630_v11 = vpop.permute.xlu2 %2978 }
  0xfa   :  { %6231 = vst [vmem:[#allocation28_spill] sm:$0xff] %v4630_v11 }
  0xfb   :  { %v1096_v46 = vpop.f32.mrf.mxu2 }
  0xfc   :  { %v1097_v49 = vadd.f32 %v1096_v46, %v963_v32  ;;  %v830_v50 = vpop.f32.mrf.mxu0  ;;  %v964_v52 = vpop.f32.mrf.mxu1  ;;  %v3412_v32 = vor.u32 %v3668_v60, %v3411_v59 }
  0xfd   :  { %v1235_v53 = vpop.f32.mrf.mxu3  ;;  %v965_v6 = vadd.f32 %v964_v52, %v830_v50  ;;  %v4626_v52 = vpop.permute.xlu0 %3033 }
  0xfe   :  { %v4592_v18 = vadd.f32 %v1230_v37, %v1097_v49  ;;  %v3413_v37 = vld [vmem:[%s6180_s1 + $0x1d0] sm:$0xf0]  ;;  %6230 = vst [vmem:[#allocation27_spill] sm:$0xff] %v4626_v52  ;;  %v3436_v52 = vor.u32 %v3673_v9, %v3435_v8 }
  0xff   :  { %v3416_v35 = vor.u32 %v3666_v63, %v3413_v37 }
 0x100   :  { %v1361_v61 = vsel %vm1330_vm1, %v4592_v18, 0.0  ;;  %v4633_v37 = vpop.permute.xlu1 %3013 }
 0x101   :  { %1362 = vadd.xlane.f32.xlu1 %v1361_v61  ;;  %6232 = vst [vmem:[#allocation29_spill] sm:$0xff] %v4633_v37 }
 0x103   :  { %v1098_v20 = vpop.f32.mrf.mxu2 }
 0x104   :  { %v1099_v46 = vadd.f32 %v1098_v20, %v965_v6  ;;  %v833_v49 = vpop.f32.mrf.mxu0  ;;  %v967_v61 = vpop.f32.mrf.mxu1  ;;  %v3672_v6 = vld [vmem:[%s6180_s1 + $0x1ec] sm:$0xf0] }
 0x105   :  { %v1237_v50 = vpop.f32.mrf.mxu3  ;;  %v968_v42 = vadd.f32 %v967_v61, %v833_v49 }
 0x106   :  { %v4624_v23 = vadd.f32 %v1232_v31, %v1099_v46  ;;  %v4665_v46 = vpop.permute.xlu2 %2993 }
 0x107   :  { %872 = vmatmul.bf16.gmra.mxu0 %v3412_v32  ;;  %1006 = vmatmul.bf16.gmra.mxu1 %v3416_v35  ;;  %v3675_v32 = vld [vmem:[%s6180_s1 + $0x20c] sm:$0xf]  ;;  %v3453_v35 = vld [vmem:[%s6180_s1 + $0x218] sm:$0xf0]  ;;  %6234 = vst [vmem:[#allocation31_spill] sm:$0xff] %v4665_v46 }
 0x108   :  { %1140 = vmatmul.bf16.gmra.mxu2 %v3420_v41  ;;  %v1364_v55 = vsel %vm1330_vm1, %v4624_v23, 0.0  ;;  %v3427_v41 = vld [vmem:[%s6180_s1 + $0x1e0] sm:$0xf]  ;;  %v3456_v11 = vor.u32 %v3675_v32, %v3453_v35  ;;  %v3451_v35 = vld [vmem:[%s6180_s1 + $0x208] sm:$0xf] }
 0x109   :  { %1365 = vadd.xlane.f32.xlu2 %v1364_v55  ;;  %3600 = vmatmul.msk.bf16.gmra.mxu3 %vm718_vm0, %v3440_v62  ;;  %v4651_v55 = vpop.permute.xlu0 %3048  ;;  %v3428_v61 = vor.u32 %v3672_v6, %v3427_v41 }
 0x10a   :  { %6233 = vst [vmem:[#allocation30_spill] sm:$0xff] %v4651_v55 }
 0x10b   :  { %v1101_v59 = vpop.f32.mrf.mxu2 }
 0x10c   :  { %v1102_v60 = vadd.f32 %v1101_v59, %v968_v42  ;;  %v835_v63 = vpop.f32.mrf.mxu0  ;;  %v969_v31 = vpop.f32.mrf.mxu1  ;;  %v3670_v42 = vld [vmem:[%s6180_s1 + $0x1e4] sm:$0xf] }
 0x10d   :  { %v1240_v2 = vpop.f32.mrf.mxu3  ;;  %v970_v20 = vadd.f32 %v969_v31, %v835_v63  ;;  %v4669_v31 = vpop.permute.xlu1 %3028 }
 0x10e   :  { %v4635_v0 = vadd.f32 %v1235_v53, %v1102_v60  ;;  %v3429_v53 = vld [vmem:[%s6180_s1 + $0x1f0] sm:$0xf0]  ;;  %6235 = vst [vmem:[#allocation32_spill] sm:$0xff] %v4669_v31  ;;  %v4676_v8 = vpop.permute.xlu2 %3008 }
 0x10f   :  { %v3432_v59 = vor.u32 %v3670_v42, %v3429_v53  ;;  %6237 = vst [vmem:[#allocation34_spill] sm:$0xff] %v4676_v8 }
 0x110   :  { %v1367_v62 = vsel %vm1330_vm1, %v4635_v0, 0.0 }
 0x111   :  { %1368 = vadd.xlane.f32.xlu0 %v1367_v62  ;;  %v4674_v41 = vpop.permute.xlu0 %3063 }
 0x112   :  { %6236 = vst [vmem:[#allocation33_spill] sm:$0xff] %v4674_v41 }
 0x113   :  { %v1103_v49 = vpop.f32.mrf.mxu2 }
 0x114   :  { %v1104_v60 = vadd.f32 %v1103_v49, %v970_v20  ;;  %v838_v62 = vpop.f32.mrf.mxu0  ;;  %v972_v55 = vpop.f32.mrf.mxu1 }
 0x115   :  { %v1242_v63 = vpop.f32.mrf.mxu3  ;;  %v973_v24 = vadd.f32 %v972_v55, %v838_v62  ;;  %v3445_v55 = vld [vmem:[%s6180_s1 + $0x210] sm:$0xf0]  ;;  %v4694_v32 = vpop.permute.xlu1 %3043 }
 0x116   :  { %v4667_v37 = vadd.f32 %v1237_v50, %v1104_v60  ;;  %6238 = vst [vmem:[#allocation35_spill] sm:$0xff] %v4694_v32  ;;  %v4704_v13 = vpop.permute.xlu2 %3023 }
 0x117   :  { %877 = vmatmul.bf16.gmra.mxu0 %v3428_v61  ;;  %1011 = vmatmul.bf16.gmra.mxu1 %v3432_v59  ;;  %6239 = vst [vmem:[#allocation36_spill] sm:$0xff] %v4704_v13 }
 0x118   :  { %1145 = vmatmul.bf16.gmra.mxu2 %v3436_v52  ;;  %v1370_v46 = vsel %vm1330_vm1, %v4667_v37, 0.0  ;;  %v3674_v52 = vld [vmem:[%s6180_s1 + $0x204] sm:$0xf] }
 0x119   :  { %1371 = vadd.xlane.f32.xlu1 %v1370_v46  ;;  %3601 = vmatmul.msk.bf16.gmra.mxu3 %vm718_vm0, %v3456_v11  ;;  %v3677_v46 = vld [vmem:[%s6180_s1 + $0x214] sm:$0xf0]  ;;  %v3448_v59 = vor.u32 %v3674_v52, %v3445_v55 }
 0x11a   :  { %v3452_v8 = vor.u32 %v3677_v46, %v3451_v35 }
 0x11b   :  { %v1106_v6 = vpop.f32.mrf.mxu2 }
 0x11c   :  { %v1107_v42 = vadd.f32 %v1106_v6, %v973_v24  ;;  %v840_v53 = vpop.f32.mrf.mxu0  ;;  %v974_v50 = vpop.f32.mrf.mxu1  ;;  %v3443_v24 = vld [vmem:[%s6180_s1 + $0x200] sm:$0xf] }
 0x11d   :  { %v1245_v20 = vpop.f32.mrf.mxu3  ;;  %v975_v49 = vadd.f32 %v974_v50, %v840_v53  ;;  %v4713_v55 = vpop.permute.xlu1 %3058 }
 0x11e   :  { %v4678_v9 = vadd.f32 %v1240_v2, %v1107_v42  ;;  %v3676_v2 = vld [vmem:[%s6180_s1 + $0x20c] sm:$0xf0]  ;;  %6240 = vst [vmem:[#allocation37_spill] sm:$0xff] %v4713_v55 }
 0x11f   :  { %v3444_v60 = vor.u32 %v3676_v2, %v3443_v24 }
 0x120   :  { %v1373_v11 = vsel %vm1330_vm1, %v4678_v9, 0.0 }
 0x121   :  { %1374 = vadd.xlane.f32.xlu2 %v1373_v11 }
 0x123   :  { %v1108_v61 = vpop.f32.mrf.mxu2 }
 0x124   :  { %v1109_v62 = vadd.f32 %v1108_v61, %v975_v49  ;;  %v1333_v6 = vpop.xlane.xlu0 %1332  ;;  %v843_v42 = vpop.f32.mrf.mxu0 }
 0x125   :  { %v1481_v41 = vmul.f32 0.020408163, %v1333_v6  ;;  %v977_v31 = vpop.f32.mrf.mxu1  ;;  %v1247_v11 = vpop.f32.mrf.mxu3 }
 0x126   :  { %v4702_v32 = vadd.f32 %v1242_v63, %v1109_v62  ;;  %v978_v53 = vadd.f32 %v977_v31, %v843_v42 }
 0x127   :  { %v4707_v28 = vsub.f32 %v4379_v45, %v1481_v41  ;;  %1016 = vmatmul.bf16.gmra.mxu1 %v3448_v59  ;;  %882 = vmatmul.bf16.gmra.mxu0 %v3444_v60  ;;  %v4723_v59 = vpop.permute.xlu2 %3038 }
 0x128   :  { %1150 = vmatmul.bf16.gmra.mxu2 %v3452_v8  ;;  %v1376_v50 = vsel %vm1330_vm1, %v4702_v32, 0.0  ;;  %6241 = vst [vmem:[#allocation38_spill] sm:$0xff] %v4723_v59 }
 0x129   :  { %1377 = vadd.xlane.f32.xlu0 %v1376_v50  ;;  %v1581_v52 = vmul.f32 %v4707_v28, %v4707_v28 }
 0x12b   :  { %v1111_v63 = vpop.f32.mrf.mxu2  ;;  %v1631_v24 = vsel %vm1330_vm1, %v1581_v52, 0.0 }
 0x12c   :  { %v1112_v2 = vadd.f32 %v1111_v63, %v978_v53  ;;  %v1336_v35 = vpop.xlane.xlu0 %1335  ;;  %1632 = vadd.xlane.f32.xlu2 %v1631_v24  ;;  %v845_v45 = vpop.f32.mrf.mxu0 }
 0x12d   :  { %v1482_v41 = vmul.f32 0.020408163, %v1336_v35  ;;  %v979_v46 = vpop.f32.mrf.mxu1  ;;  %v1250_v8 = vpop.f32.mrf.mxu3 }
 0x12e   :  { %v4716_v31 = vadd.f32 %v1245_v20, %v1112_v2  ;;  %v980_v62 = vadd.f32 %v979_v46, %v845_v45 }
 0x12f   :  { %v4719_v49 = vsub.f32 %v4411_v4, %v1482_v41  ;;  %v4737_v46 = vpop.permute.xlu2 %3053 }
 0x130   :  { %v1379_v61 = vsel %vm1330_vm1, %v4716_v31, 0.0  ;;  %6242 = vst [vmem:[#allocation39_spill] sm:$0xff] %v4737_v46 }
 0x131   :  { %1380 = vadd.xlane.f32.xlu1 %v1379_v61  ;;  %v1582_v60 = vmul.f32 %v4719_v49, %v4719_v49 }
 0x133   :  { %v1113_v6 = vpop.f32.mrf.mxu2  ;;  %v1634_v42 = vsel %vm1330_vm1, %v1582_v60, 0.0 }
 0x134   :  { %v1114_v53 = vadd.f32 %v1113_v6, %v980_v62  ;;  %v1339_v20 = vpop.xlane.xlu1 %1338  ;;  %1635 = vadd.xlane.f32.xlu0 %v1634_v42  ;;  %v848_v50 = vpop.f32.mrf.mxu0 }
 0x135   :  { %v1483_v52 = vmul.f32 0.020408163, %v1339_v20  ;;  %v982_v4 = vpop.f32.mrf.mxu1  ;;  %v1252_v24 = vpop.f32.mrf.mxu3 }
 0x136   :  { %v4728_v63 = vadd.f32 %v1247_v11, %v1114_v53  ;;  %v983_v35 = vadd.f32 %v982_v4, %v848_v50  ;;  %v3467_v50 = vld [vmem:[%s6180_s1 + $0x228] sm:$0xf] }
 0x137   :  { %v4731_v2 = vsub.f32 %v4422_v16, %v1483_v52  ;;  %v3681_v52 = vld [vmem:[%s6180_s1 + $0x234] sm:$0xf0] }
 0x138   :  { %v1382_v41 = vsel %vm1330_vm1, %v4728_v63, 0.0 }
 0x139   :  { %1383 = vadd.xlane.f32.xlu2 %v1382_v41  ;;  %v1583_v45 = vmul.f32 %v4731_v2, %v4731_v2 }
 0x13b   :  { %v1116_v61 = vpop.f32.mrf.mxu2  ;;  %v1637_v60 = vsel %vm1330_vm1, %v1583_v45, 0.0  ;;  %v3469_v45 = vld [vmem:[%s6180_s1 + $0x238] sm:$0xf0] }
 0x13c   :  { %v1117_v62 = vadd.f32 %v1116_v61, %v983_v35  ;;  %v1342_v11 = vpop.xlane.xlu1 %1341  ;;  %1638 = vadd.xlane.f32.xlu1 %v1637_v60  ;;  %v850_v6 = vpop.f32.mrf.mxu0  ;;  %v3468_v35 = vor.u32 %v3681_v52, %v3467_v50 }
 0x13d   :  { %v1484_v42 = vmul.f32 0.020408163, %v1342_v11  ;;  %v984_v16 = vpop.f32.mrf.mxu1  ;;  %v1255_v20 = vpop.f32.mrf.mxu3  ;;  %v3680_v11 = vld [vmem:[%s6180_s1 + $0x22c] sm:$0xf0] }
 0x13e   :  { %v4740_v53 = vadd.f32 %v1250_v8, %v1117_v62  ;;  %v3679_v8 = vld [vmem:[%s6180_s1 + $0x22c] sm:$0xf]  ;;  %1155 = vmatmul.bf16.gmra.mxu2 %v3468_v35  ;;  %v3459_v62 = vld [vmem:[%s6180_s1 + $0x220] sm:$0xf] }
 0x13f   :  { %v4749_v4 = vsub.f32 %v4454_v43, %v1484_v42  ;;  %v3472_v60 = vor.u32 %v3679_v8, %v3469_v45  ;;  %v985_v43 = vadd.f32 %v984_v16, %v850_v6  ;;  %v3678_v42 = vld [vmem:[%s6180_s1 + $0x224] sm:$0xf]  ;;  %v3460_v35 = vor.u32 %v3680_v11, %v3459_v62  ;;  %v3461_v6 = vld [vmem:[%s6180_s1 + $0x230] sm:$0xf0] }
 0x140   :  { %v1385_v41 = vsel %vm1330_vm1, %v4740_v53, 0.0  ;;  %v3464_v45 = vor.u32 %v3678_v42, %v3461_v6 }
 0x141   :  { %1386 = vadd.xlane.f32.xlu0 %v1385_v41  ;;  %v1584_v61 = vmul.f32 %v4749_v4, %v4749_v4  ;;  %3602 = vmatmul.msk.bf16.gmra.mxu3 %vm718_vm0, %v3472_v60 }
 0x142   :  { %887 = vmatmul.bf16.gmra.mxu0 %v3460_v35  ;;  %1021 = vmatmul.bf16.gmra.mxu1 %v3464_v45 }
 0x143   :  { %v1118_v50 = vpop.f32.mrf.mxu2  ;;  %v1640_v52 = vsel %vm1330_vm1, %v1584_v61, 0.0 }
 0x144   :  { %v1119_v16 = vadd.f32 %v1118_v50, %v985_v43  ;;  %v1345_v41 = vpop.xlane.xlu2 %1344  ;;  %1641 = vadd.xlane.f32.xlu2 %v1640_v52  ;;  %v853_v8 = vpop.f32.mrf.mxu0 }
 0x145   :  { %v1485_v46 = vmul.f32 0.020408163, %v1345_v41  ;;  %v987_v55 = vpop.f32.mrf.mxu1  ;;  %v1257_v13 = vpop.f32.mrf.mxu3 }
 0x146   :  { %v4775_v59 = vadd.f32 %v1252_v24, %v1119_v16  ;;  %v988_v60 = vadd.f32 %v987_v55, %v853_v8  ;;  %v3483_v55 = vld [vmem:[%s6180_s1 + $0x248] sm:$0xf] }
 0x147   :  { %v4778_v61 = vsub.f32 %v4465_v57, %v1485_v46  ;;  %v3685_v46 = vld [vmem:[%s6180_s1 + $0x254] sm:$0xf0] }
 0x148   :  { %v1388_v62 = vsel %vm1330_vm1, %v4775_v59, 0.0  ;;  %v3484_v8 = vor.u32 %v3685_v46, %v3483_v55 }
 0x149   :  { %1389 = vadd.xlane.f32.xlu1 %v1388_v62  ;;  %v1585_v43 = vmul.f32 %v4778_v61, %v4778_v61 }
 0x14b   :  { %v1121_v11 = vpop.f32.mrf.mxu2  ;;  %v1643_v42 = vsel %vm1330_vm1, %v1585_v43, 0.0 }
 0x14c   :  { %v1122_v50 = vadd.f32 %v1121_v11, %v988_v60  ;;  %v1348_v52 = vpop.xlane.xlu2 %1347  ;;  %1644 = vadd.xlane.f32.xlu0 %v1643_v42  ;;  %v855_v24 = vpop.f32.mrf.mxu0  ;;  %v3485_v60 = vld [vmem:[%s6180_s1 + $0x258] sm:$0xf0]  ;;  %v3475_v11 = vld [vmem:[%s6180_s1 + $0x240] sm:$0xf]  ;;  %v3684_v42 = vld [vmem:[%s6180_s1 + $0x24c] sm:$0xf0] }
 0x14d   :  { %v1486_v35 = vmul.f32 0.020408163, %v1348_v52  ;;  %v989_v6 = vpop.f32.mrf.mxu1  ;;  %v1260_v57 = vpop.f32.mrf.mxu3  ;;  %v3476_v55 = vor.u32 %v3684_v42, %v3475_v11 }
 0x14e   :  { %v4785_v16 = vadd.f32 %v1255_v20, %v1122_v50  ;;  %v3683_v20 = vld [vmem:[%s6180_s1 + $0x24c] sm:$0xf]  ;;  %1160 = vmatmul.bf16.gmra.mxu2 %v3484_v8  ;;  %v3682_v50 = vld [vmem:[%s6180_s1 + $0x244] sm:$0xf] }
 0x14f   :  { %v4794_v41 = vsub.f32 %v4497_v27, %v1486_v35  ;;  %v3488_v43 = vor.u32 %v3683_v20, %v3485_v60  ;;  %v990_v27 = vadd.f32 %v989_v6, %v855_v24  ;;  %v3477_v24 = vld [vmem:[%s6180_s1 + $0x250] sm:$0xf0] }
 0x150   :  { %v1391_v45 = vsel %vm1330_vm1, %v4785_v16, 0.0 }
 0x151   :  { %1392 = vadd.xlane.f32.xlu2 %v1391_v45  ;;  %v1586_v62 = vmul.f32 %v4794_v41, %v4794_v41  ;;  %3603 = vmatmul.msk.bf16.gmra.mxu3 %vm718_vm0, %v3488_v43  ;;  %v3480_v45 = vor.u32 %v3682_v50, %v3477_v24 }
 0x152   :  { %892 = vmatmul.bf16.gmra.mxu0 %v3476_v55 }
 0x153   :  { %v1123_v52 = vpop.f32.mrf.mxu2  ;;  %v1646_v35 = vsel %vm1330_vm1, %v1586_v62, 0.0  ;;  %1026 = vmatmul.bf16.gmra.mxu1 %v3480_v45 }
 0x154   :  { %v1124_v6 = vadd.f32 %v1123_v52, %v990_v27  ;;  %v1351_v46 = vpop.xlane.xlu0 %1350  ;;  %1647 = vadd.xlane.f32.xlu1 %v1646_v35  ;;  %v858_v8 = vpop.f32.mrf.mxu0 }
 0x155   :  { %v1487_v20 = vmul.f32 0.020408163, %v1351_v46  ;;  %v992_v60 = vpop.f32.mrf.mxu1  ;;  %v1262_v25 = vpop.f32.mrf.mxu3  ;;  %v3499_v46 = vld [vmem:[%s6180_s1 + $0x268] sm:$0xf] }
 0x156   :  { %v4820_v51 = vadd.f32 %v1257_v13, %v1124_v6  ;;  %v993_v43 = vadd.f32 %v992_v60, %v858_v8  ;;  %v3689_v8 = vld [vmem:[%s6180_s1 + $0x274] sm:$0xf0] }
 0x157   :  { %v4823_v62 = vsub.f32 %v4506_v40, %v1487_v20  ;;  %v3500_v20 = vor.u32 %v3689_v8, %v3499_v46 }
 0x158   :  { %v1394_v11 = vsel %vm1330_vm1, %v4820_v51, 0.0 }
 0x159   :  { %1395 = vadd.xlane.f32.xlu0 %v1394_v11  ;;  %v1587_v27 = vmul.f32 %v4823_v62, %v4823_v62 }
 0x15b   :  { %v1126_v42 = vpop.f32.mrf.mxu2  ;;  %v1649_v50 = vsel %vm1330_vm1, %v1587_v27, 0.0 }
 0x15c   :  { %v1127_v52 = vadd.f32 %v1126_v42, %v993_v43  ;;  %v1354_v35 = vpop.xlane.xlu1 %1353  ;;  %1650 = vadd.xlane.f32.xlu2 %v1649_v50  ;;  %v860_v13 = vpop.f32.mrf.mxu0  ;;  %v3501_v43 = vld [vmem:[%s6180_s1 + $0x278] sm:$0xf0]  ;;  %v3491_v42 = vld [vmem:[%s6180_s1 + $0x260] sm:$0xf]  ;;  %v3688_v50 = vld [vmem:[%s6180_s1 + $0x26c] sm:$0xf0] }
 0x15d   :  { %v1488_v55 = vmul.f32 0.020408163, %v1354_v35  ;;  %v994_v24 = vpop.f32.mrf.mxu1  ;;  %v1265_v40 = vpop.f32.mrf.mxu3  ;;  %v3492_v46 = vor.u32 %v3688_v50, %v3491_v42 }
 0x15e   :  { %v4830_v6 = vadd.f32 %v1260_v57, %v1127_v52  ;;  %v3687_v57 = vld [vmem:[%s6180_s1 + $0x26c] sm:$0xf]  ;;  %1165 = vmatmul.bf16.gmra.mxu2 %v3500_v20  ;;  %v3686_v52 = vld [vmem:[%s6180_s1 + $0x264] sm:$0xf] }
 0x15f   :  { %v4839_v45 = vsub.f32 %v4540_v14, %v1488_v55  ;;  %v3504_v27 = vor.u32 %v3687_v57, %v3501_v43  ;;  %v995_v14 = vadd.f32 %v994_v24, %v860_v13  ;;  %v3493_v13 = vld [vmem:[%s6180_s1 + $0x270] sm:$0xf0] }
 0x160   :  { %v1397_v60 = vsel %vm1330_vm1, %v4830_v6, 0.0 }
 0x161   :  { %1398 = vadd.xlane.f32.xlu1 %v1397_v60  ;;  %v1588_v11 = vmul.f32 %v4839_v45, %v4839_v45  ;;  %3604 = vmatmul.msk.bf16.gmra.mxu3 %vm718_vm0, %v3504_v27  ;;  %v3496_v60 = vor.u32 %v3686_v52, %v3493_v13 }
 0x162   :  { %897 = vmatmul.bf16.gmra.mxu0 %v3492_v46 }
 0x163   :  { %v1128_v35 = vpop.f32.mrf.mxu2  ;;  %v1652_v55 = vsel %vm1330_vm1, %v1588_v11, 0.0  ;;  %1031 = vmatmul.bf16.gmra.mxu1 %v3496_v60 }
 0x164   :  { %v1129_v24 = vadd.f32 %v1128_v35, %v995_v14  ;;  %v1357_v8 = vpop.xlane.xlu2 %1356  ;;  %1653 = vadd.xlane.f32.xlu0 %v1652_v55  ;;  %v863_v20 = vpop.f32.mrf.mxu0 }
 0x165   :  { %v1489_v57 = vmul.f32 0.020408163, %v1357_v8  ;;  %v997_v43 = vpop.f32.mrf.mxu1  ;;  %v1267_v26 = vpop.f32.mrf.mxu3 }
 0x166   :  { %v4865_v38 = vadd.f32 %v1262_v25, %v1129_v24  ;;  %v998_v27 = vadd.f32 %v997_v43, %v863_v20 }
 0x167   :  { %v4868_v11 = vsub.f32 %v4549_v36, %v1489_v57 }
 0x168   :  { %v1400_v42 = vsel %vm1330_vm1, %v4865_v38, 0.0 }
 0x169   :  { %6243 = vst [vmem:[#allocation40_spill] sm:$0xff] %v4868_v11  ;;  %1401 = vadd.xlane.f32.xlu2 %v1400_v42  ;;  %v1589_v14 = vmul.f32 %v4868_v11, %v4868_v11 }
 0x16b   :  { %v1131_v50 = vpop.f32.mrf.mxu2  ;;  %v1655_v52 = vsel %vm1330_vm1, %v1589_v14, 0.0 }
 0x16c   :  { %v1132_v35 = vadd.f32 %v1131_v50, %v998_v27  ;;  %v1360_v55 = vpop.xlane.xlu0 %1359  ;;  %1656 = vadd.xlane.f32.xlu1 %v1655_v52  ;;  %v865_v25 = vpop.f32.mrf.mxu0 }
 0x16d   :  { %v1490_v46 = vmul.f32 0.020408163, %v1360_v55  ;;  %v999_v13 = vpop.f32.mrf.mxu1  ;;  %v1270_v8 = vpop.f32.mrf.mxu3 }
 0x16e   :  { %v4875_v24 = vadd.f32 %v1265_v40, %v1132_v35  ;;  %v1000_v57 = vadd.f32 %v999_v13, %v865_v25 }
 0x16f   :  { %v4878_v36 = vsub.f32 %v4583_v22, %v1490_v46 }
 0x170   :  { %v1403_v20 = vsel %vm1330_vm1, %v4875_v24, 0.0 }
 0x171   :  { %1404 = vadd.xlane.f32.xlu0 %v1403_v20  ;;  %v1590_v60 = vmul.f32 %v4878_v36, %v4878_v36 }
 0x173   :  { %v1133_v43 = vpop.f32.mrf.mxu2  ;;  %v1658_v27 = vsel %vm1330_vm1, %v1590_v60, 0.0 }
 0x174   :  { %v1134_v42 = vadd.f32 %v1133_v43, %v1000_v57  ;;  %v1363_v14 = vpop.xlane.xlu1 %1362  ;;  %1659 = vadd.xlane.f32.xlu2 %v1658_v27  ;;  %v868_v40 = vpop.f32.mrf.mxu0 }
 0x175   :  { %v1491_v50 = vmul.f32 0.020408163, %v1363_v14  ;;  %v1002_v52 = vpop.f32.mrf.mxu1  ;;  %v1272_v13 = vpop.f32.mrf.mxu3 }
 0x176   :  { %v4885_v22 = vadd.f32 %v1267_v26, %v1134_v42  ;;  %v1003_v55 = vadd.f32 %v1002_v52, %v868_v40 }
 0x177   :  { %v4888_v35 = vsub.f32 %v4592_v18, %v1491_v50 }
 0x178   :  { %v1406_v46 = vsel %vm1330_vm1, %v4885_v22, 0.0 }
 0x179   :  { %6244 = vst [vmem:[#allocation41_spill] sm:$0xff] %v4888_v35  ;;  %1407 = vadd.xlane.f32.xlu1 %v1406_v46  ;;  %v1591_v25 = vmul.f32 %v4888_v35, %v4888_v35 }
 0x17b   :  { %v1136_v20 = vpop.f32.mrf.mxu2  ;;  %v1661_v60 = vsel %vm1330_vm1, %v1591_v25, 0.0 }
 0x17c   :  { %v1137_v57 = vadd.f32 %v1136_v20, %v1003_v55  ;;  %v1366_v43 = vpop.xlane.xlu2 %1365  ;;  %1662 = vadd.xlane.f32.xlu0 %v1661_v60  ;;  %v870_v26 = vpop.f32.mrf.mxu0 }
 0x17d   :  { %v1492_v27 = vmul.f32 0.020408163, %v1366_v43  ;;  %v1004_v42 = vpop.f32.mrf.mxu1  ;;  %v1275_v25 = vpop.f32.mrf.mxu3 }
 0x17e   :  { %v4895_v18 = vadd.f32 %v1270_v8, %v1137_v57  ;;  %v1005_v52 = vadd.f32 %v1004_v42, %v870_v26 }
 0x17f   :  { %v4898_v14 = vsub.f32 %v4624_v23, %v1492_v27 }
 0x180   :  { %v1409_v40 = vsel %vm1330_vm1, %v4895_v18, 0.0 }
 0x181   :  { %6245 = vst [vmem:[#allocation42_spill] sm:$0xff] %v4898_v14  ;;  %1410 = vadd.xlane.f32.xlu2 %v1409_v40  ;;  %v1592_v50 = vmul.f32 %v4898_v14, %v4898_v14 }
 0x183   :  { %v1138_v46 = vpop.f32.mrf.mxu2  ;;  %v1664_v55 = vsel %vm1330_vm1, %v1592_v50, 0.0 }
 0x184   :  { %v1139_v20 = vadd.f32 %v1138_v46, %v1005_v52  ;;  %v1369_v60 = vpop.xlane.xlu0 %1368  ;;  %1665 = vadd.xlane.f32.xlu1 %v1664_v55  ;;  %v873_v8 = vpop.f32.mrf.mxu0 }
 0x185   :  { %v1493_v57 = vmul.f32 0.020408163, %v1369_v60  ;;  %v1007_v43 = vpop.f32.mrf.mxu1  ;;  %v1277_v60 = vpop.f32.mrf.mxu3 }
 0x186   :  { %v4905_v23 = vadd.f32 %v1272_v13, %v1139_v20  ;;  %v1008_v40 = vadd.f32 %v1007_v43, %v873_v8 }
 0x187   :  { %v4908_v27 = vsub.f32 %v4635_v0, %v1493_v57 }
 0x188   :  { %v1412_v54 = vsel %vm1330_vm1, %v4905_v23, 0.0 }
 0x189   :  { %1413 = vadd.xlane.f32.xlu0 %v1412_v54  ;;  %v1593_v26 = vmul.f32 %v4908_v27, %v4908_v27 }
 0x18b   :  { %v1141_v42 = vpop.f32.mrf.mxu2  ;;  %v1667_v50 = vsel %vm1330_vm1, %v1593_v26, 0.0 }
 0x18c   :  { %v1142_v52 = vadd.f32 %v1141_v42, %v1008_v40  ;;  %v1372_v46 = vpop.xlane.xlu1 %1371  ;;  %1668 = vadd.xlane.f32.xlu2 %v1667_v50  ;;  %v875_v55 = vpop.f32.mrf.mxu0 }
 0x18d   :  { %v1494_v13 = vmul.f32 0.020408163, %v1372_v46  ;;  %v1009_v20 = vpop.f32.mrf.mxu1 }
 0x18e   :  { %v4915_v0 = vadd.f32 %v1275_v25, %v1142_v52  ;;  %v1010_v43 = vadd.f32 %v1009_v20, %v875_v55 }
 0x18f   :  { %v4918_v8 = vsub.f32 %v4667_v37, %v1494_v13  ;;  %v1280_v13 = vpop.f32.mrf.mxu3 }
 0x190   :  { %v1415_v54 = vsel %vm1330_vm1, %v4915_v0, 0.0 }
 0x191   :  { %6246 = vst [vmem:[#allocation43_spill] sm:$0xff] %v4918_v8  ;;  %1416 = vadd.xlane.f32.xlu1 %v1415_v54  ;;  %v1594_v57 = vmul.f32 %v4918_v8, %v4918_v8 }
 0x193   :  { %v1143_v40 = vpop.f32.mrf.mxu2  ;;  %v1670_v26 = vsel %vm1330_vm1, %v1594_v57, 0.0 }
 0x194   :  { %v1144_v42 = vadd.f32 %v1143_v40, %v1010_v43  ;;  %v1375_v50 = vpop.xlane.xlu2 %1374  ;;  %1671 = vadd.xlane.f32.xlu0 %v1670_v26  ;;  %v878_v46 = vpop.f32.mrf.mxu0  ;;  %v3693_v26 = vld [vmem:[%s6180_s1 + $0x294] sm:$0xf0] }
 0x195   :  { %v1495_v25 = vmul.f32 0.020408163, %v1375_v50  ;;  %v1012_v52 = vpop.f32.mrf.mxu1 }
 0x196   :  { %v4925_v12 = vadd.f32 %v1277_v60, %v1144_v42  ;;  %v1013_v54 = vadd.f32 %v1012_v52, %v878_v46  ;;  %v3517_v52 = vld [vmem:[%s6180_s1 + $0x298] sm:$0xf0] }
 0x197   :  { %v4928_v37 = vsub.f32 %v4678_v9, %v1495_v25  ;;  %v3515_v9 = vld [vmem:[%s6180_s1 + $0x288] sm:$0xf]  ;;  %v3691_v25 = vld [vmem:[%s6180_s1 + $0x28c] sm:$0xf] }
 0x198   :  { %6247 = vst [vmem:[#allocation44_spill] sm:$0xff] %v4925_v12  ;;  %v1418_v7 = vsel %vm1330_vm1, %v4925_v12, 0.0  ;;  %v3516_v50 = vor.u32 %v3693_v26, %v3515_v9  ;;  %v3690_v9 = vld [vmem:[%s6180_s1 + $0x284] sm:$0xf]  ;;  %v3509_v26 = vld [vmem:[%s6180_s1 + $0x290] sm:$0xf0] }
 0x199   :  { %6248 = vst [vmem:[#allocation45_spill] sm:$0xff] %v4928_v37  ;;  %1419 = vadd.xlane.f32.xlu2 %v1418_v7  ;;  %v1595_v55 = vmul.f32 %v4928_v37, %v4928_v37 }
 0x19a   :  { %1170 = vmatmul.bf16.gmra.mxu2 %v3516_v50 }
 0x19b   :  { %v1146_v20 = vpop.f32.mrf.mxu2  ;;  %v1673_v57 = vsel %vm1330_vm1, %v1595_v55, 0.0  ;;  %v3520_v55 = vor.u32 %v3691_v25, %v3517_v52  ;;  %v3512_v25 = vor.u32 %v3690_v9, %v3509_v26 }
 0x19c   :  { %v1147_v43 = vadd.f32 %v1146_v20, %v1013_v54  ;;  %v1378_v40 = vpop.xlane.xlu0 %1377  ;;  %1674 = vadd.xlane.f32.xlu1 %v1673_v57  ;;  %v880_v60 = vpop.f32.mrf.mxu0 }
 0x19d   :  { %v1496_v42 = vmul.f32 0.020408163, %v1378_v40  ;;  %v1014_v7 = vpop.f32.mrf.mxu1  ;;  %3605 = vmatmul.msk.bf16.gmra.mxu3 %vm718_vm0, %v3520_v55  ;;  %1036 = vmatmul.bf16.gmra.mxu1 %v3512_v25 }
 0x19e   :  { %v4941_v46 = vadd.f32 %v1280_v13, %v1147_v43  ;;  %v3507_v13 = vld [vmem:[%s6180_s1 + $0x280] sm:$0xf]  ;;  %v1282_v43 = vpop.f32.mrf.mxu3 }
 0x19f   :  { %v4950_v54 = vsub.f32 %v4702_v32, %v1496_v42  ;;  %v1633_v20 = vpop.xlane.xlu2 %1632  ;;  %v3692_v32 = vld [vmem:[%s6180_s1 + $0x28c] sm:$0xf0]  ;;  %v1015_v42 = vadd.f32 %v1014_v7, %v880_v60 }
 0x1a0   :  { %6249 = vst [vmem:[#allocation46_spill] sm:$0xff] %v4941_v46  ;;  %v1421_v57 = vsel %vm1330_vm1, %v4941_v46, 0.0  ;;  %v3508_v50 = vor.u32 %v3692_v32, %v3507_v13  ;;  %v1781_v52 = vmul.f32 0.020408163, %v1633_v20 }
 0x1a1   :  { %6250 = vst [vmem:[#allocation47_spill] sm:$0xff] %v4950_v54  ;;  %1422 = vadd.xlane.f32.xlu0 %v1421_v57  ;;  %v1596_v40 = vmul.f32 %v4950_v54, %v4950_v54 }
 0x1a2   :  { %902 = vmatmul.bf16.gmra.mxu0 %v3508_v50  ;;  %v4972_v56 = vadd.f32 1e-05, %v1781_v52 }
 0x1a3   :  { %v1148_v57 = vpop.f32.mrf.mxu2  ;;  %v1676_v34 = vsel %vm1330_vm1, %v1596_v40, 0.0 }
 0x1a4   :  { %v1149_v55 = vadd.f32 %v1148_v57, %v1015_v42  ;;  %v1381_v29 = vpop.xlane.xlu1 %1380  ;;  %1677 = vadd.xlane.f32.xlu2 %v1676_v34  ;;  %v883_v37 = vpop.f32.mrf.mxu0  ;;  %3714 = vrsqrt.f32 %v4972_v56  ;;  %v3695_v57 = vld [vmem:[%s6180_s1 + $0x2ac] sm:$0xf]  ;;  %vm1937_vm3 = vweird.f32 %v4972_v56 }
 0x1a5   :  { %v1497_v44 = vmul.f32 0.020408163, %v1381_v29  ;;  %v1017_v8 = vpop.f32.mrf.mxu1 }
 0x1a6   :  { %v4970_v1 = vadd.f32 %v1282_v43, %v1149_v55  ;;  %v1018_v13 = vadd.f32 %v1017_v8, %v883_v37  ;;  %v1285_v40 = vpop.f32.mrf.mxu3  ;;  %v3533_v55 = vld [vmem:[%s6180_s1 + $0x2b8] sm:$0xf0] }
 0x1a7   :  { %v4975_v60 = vsub.f32 %v4716_v31, %v1497_v44  ;;  %v1636_v7 = vpop.xlane.xlu0 %1635  ;;  %v3531_v44 = vld [vmem:[%s6180_s1 + $0x2a8] sm:$0xf]  ;;  %v3697_v31 = vld [vmem:[%s6180_s1 + $0x2b4] sm:$0xf0] }
 0x1a8   :  { %v1424_v20 = vsel %vm1330_vm1, %v4970_v1, 0.0  ;;  %v1782_v29 = vmul.f32 0.020408163, %v1636_v7  ;;  %v3532_v50 = vor.u32 %v3697_v31, %v3531_v44 }
 0x1a9   :  { %6251 = vst [vmem:[#allocation48_spill] sm:$0xff] %v4975_v60  ;;  %1425 = vadd.xlane.f32.xlu1 %v1424_v20  ;;  %v1597_v34 = vmul.f32 %v4975_v60, %v4975_v60 }
 0x1aa   :  { %v4989_v25 = vadd.f32 1e-05, %v1782_v29  ;;  %1175 = vmatmul.bf16.gmra.mxu2 %v3532_v50 }
 0x1ab   :  { %v1151_v43 = vpop.f32.mrf.mxu2  ;;  %v1679_v32 = vsel %vm1330_vm1, %v1597_v34, 0.0 }
 0x1ac   :  { %v1152_v9 = vadd.f32 %v1151_v43, %v1018_v13  ;;  %v1384_v26 = vpop.xlane.xlu2 %1383  ;;  %1680 = vadd.xlane.f32.xlu0 %v1679_v32  ;;  %v885_v42 = vpop.f32.mrf.mxu0  ;;  %v3536_v13 = vor.u32 %v3695_v57, %v3533_v55  ;;  %v3523_v43 = vld [vmem:[%s6180_s1 + $0x2a0] sm:$0xf]  ;;  %3716 = vrsqrt.f32 %v4989_v25  ;;  %vm1947_vm6 = vweird.f32 %v4989_v25 }
 0x1ad   :  { %v1498_v8 = vmul.f32 0.020408163, %v1384_v26  ;;  %v1019_v37 = vpop.f32.mrf.mxu1  ;;  %v3715_v32 = vpop.eup %3714  ;;  %v3694_v26 = vld [vmem:[%s6180_s1 + $0x2a4] sm:$0xf] }
 0x1ae   :  { %v4991_v52 = vadd.f32 %v1285_v40, %v1152_v9  ;;  %v1020_v40 = vadd.f32 %v1019_v37, %v885_v42  ;;  %3606 = vmatmul.msk.bf16.gmra.mxu3 %vm718_vm0, %v3536_v13  ;;  %v1287_v50 = vpop.f32.mrf.mxu3  ;;  %v1932_v57 = vmul.f32 %v3715_v32, %v4972_v56  ;;  %vm1938_vm2 = vweird.f32 %v3715_v32  ;;  %v1832_v56 = vld [vmem:[%s6181_s2 + $0x8] sm:$0xff] }
 0x1af   :  { %v5000_v7 = vsub.f32 %v4728_v63, %v1498_v8  ;;  %v1639_v20 = vpop.xlane.xlu1 %1638  ;;  %v3696_v63 = vld [vmem:[%s6180_s1 + $0x2ac] sm:$0xf0]  ;;  %v3525_v8 = vld [vmem:[%s6180_s1 + $0x2b0] sm:$0xf0]  ;;  %vm1939_vm4 = vmor %vm1937_vm3, %vm1938_vm2 }
 0x1b0   :  { %6252 = vst [vmem:[#allocation49_spill] sm:$0xff] %v4991_v52  ;;  %v1783_v34 = vmul.f32 0.020408163, %v1639_v20  ;;  %v1427_v29 = vsel %vm1330_vm1, %v4991_v52, 0.0  ;;  %v3524_v31 = vor.u32 %v3696_v63, %v3523_v43  ;;  %v3528_v13 = vor.u32 %v3694_v26, %v3525_v8 }
 0x1b1   :  { %6253 = vst [vmem:[#allocation50_spill] sm:$0xff] %v5000_v7  ;;  %1428 = vadd.xlane.f32.xlu2 %v1427_v29  ;;  %v1598_v9 = vmul.f32 %v5000_v7, %v5000_v7  ;;  %v1933_v7 = vmul.f32 %v3715_v32, %v1932_v57 }
 0x1b2   :  { %v5017_v44 = vadd.f32 1e-05, %v1783_v34  ;;  %907 = vmatmul.bf16.gmra.mxu0 %v3524_v31  ;;  %1041 = vmatmul.bf16.gmra.mxu1 %v3528_v13  ;;  %v3717_v63 = vpop.eup %3716 }
 0x1b3   :  { %v1153_v37 = vpop.f32.mrf.mxu2  ;;  %v1682_v42 = vsel %vm1330_vm1, %v1598_v9, 0.0  ;;  %v1942_v26 = vmul.f32 %v3717_v63, %v4989_v25  ;;  %vm1948_vm5 = vweird.f32 %v3717_v63 }
 0x1b4   :  { %v1154_v55 = vadd.f32 %v1153_v37, %v1020_v40  ;;  %v1387_v20 = vpop.xlane.xlu0 %1386  ;;  %1683 = vadd.xlane.f32.xlu1 %v1682_v42  ;;  %3718 = vrsqrt.f32 %v5017_v44  ;;  %v1934_v37 = vmul.f32 0.5, %v1933_v7  ;;  %vm1949_vm7 = vmor %vm1947_vm6, %vm1948_vm5  ;;  %vm1957_vm9 = vweird.f32 %v5017_v44 }
 0x1b5   :  { %v1499_v29 = vmul.f32 0.020408163, %v1387_v20 }
 0x1b6   :  { %v5025_v34 = vadd.f32 %v1287_v50, %v1154_v55  ;;  %v1935_v20 = vsub.f32 1.5, %v1934_v37 }
 0x1b7   :  { %v5028_v43 = vsub.f32 %v4740_v53, %v1499_v29  ;;  %v1943_v53 = vmul.f32 %v3717_v63, %v1942_v26 }
 0x1b8   :  { %6254 = vst [vmem:[#allocation51_spill] sm:$0xff] %v5025_v34  ;;  %v1430_v9 = vsel %vm1330_vm1, %v5025_v34, 0.0  ;;  %v1936_v7 = vmul.f32 %v3715_v32, %v1935_v20 }
 0x1b9   :  { %6255 = vst [vmem:[#allocation52_spill] sm:$0xff] %v5028_v43  ;;  %1431 = vadd.xlane.f32.xlu0 %v1430_v9  ;;  %v1599_v40 = vmul.f32 %v5028_v43, %v5028_v43  ;;  %v1944_v29 = vmul.f32 0.5, %v1943_v53 }
 0x1ba   :  { %v3719_v8 = vpop.eup %3718 }
 0x1bb   :  { %v1685_v31 = vsel %vm1330_vm1, %v1599_v40, 0.0  ;;  %v1952_v55 = vmul.f32 %v3719_v8, %v5017_v44  ;;  %v1945_v40 = vsub.f32 1.5, %v1944_v29  ;;  %vm1958_vm8 = vweird.f32 %v3719_v8 }
 0x1bc   :  { %v1390_v42 = vpop.xlane.xlu1 %1389  ;;  %1686 = vadd.xlane.f32.xlu2 %v1685_v31  ;;  %v1940_v31 = vsel %vm1939_vm4, %v3715_v32, %v1936_v7  ;;  %vm1959_vm10 = vmor %vm1957_vm9, %vm1958_vm8  ;;  %v1833_v7 = vld [vmem:[%s6181_s2 + $0x10] sm:$0xff] }
 0x1bd   :  { %v1500_v50 = vmul.f32 0.020408163, %v1390_v42  ;;  %v1953_v9 = vmul.f32 %v3719_v8, %v1952_v55 }
 0x1bf   :  { %v5038_v57 = vsub.f32 %v4775_v59, %v1500_v50  ;;  %v1954_v26 = vmul.f32 0.5, %v1953_v9  ;;  %v1831_v59 = vld [vmem:[%s6181_s2] sm:$0xff]  ;;  %v888_v37 = vpop.f32.mrf.mxu0  ;;  %v1022_v42 = vpop.f32.mrf.mxu1 }
 0x1c0   :  { %v2431_v55 = vmul.f32 %v1940_v31, %v1831_v59  ;;  %v1645_v34 = vpop.xlane.xlu0 %1644 }
 0x1c1   :  { %6256 = vst [vmem:[#allocation53_spill] sm:$0xff] %v5038_v57  ;;  %v1600_v13 = vmul.f32 %v5038_v57, %v5038_v57  ;;  %v1156_v50 = vpop.f32.mrf.mxu2  ;;  %v1955_v53 = vsub.f32 1.5, %v1954_v26 }
 0x1c3   :  { %v1688_v60 = vsel %vm1330_vm1, %v1600_v13, 0.0  ;;  %v1946_v13 = vmul.f32 %v3717_v63, %v1945_v40  ;;  %v1956_v20 = vmul.f32 %v3719_v8, %v1955_v53  ;;  %v1642_v53 = vpop.xlane.xlu2 %1641 }
 0x1c4   :  { %1689 = vadd.xlane.f32.xlu0 %v1688_v60  ;;  %v1290_v57 = vpop.f32.mrf.mxu3 }
 0x1c5   :  { %v1950_v60 = vsel %vm1949_vm7, %v3717_v63, %v1946_v13  ;;  %v1960_v25 = vsel %vm1959_vm10, %v3719_v8, %v1956_v20  ;;  %v3547_v8 = vld [vmem:[%s6180_s1 + $0x2c8] sm:$0xf]  ;;  %v3701_v20 = vld [vmem:[%s6180_s1 + $0x2d4] sm:$0xf0] }
 0x1c6   :  { %v2432_v32 = vmul.f32 %v1950_v60, %v1832_v56  ;;  %v2433_v26 = vmul.f32 %v1960_v25, %v1833_v7  ;;  %v1023_v60 = vadd.f32 %v1022_v42, %v888_v37  ;;  %v3548_v25 = vor.u32 %v3701_v20, %v3547_v8  ;;  %v3699_v37 = vld [vmem:[%s6180_s1 + $0x2cc] sm:$0xf] }
 0x1c7   :  { %v890_v29 = vpop.f32.mrf.mxu0  ;;  %v1024_v9 = vpop.f32.mrf.mxu1  ;;  %v1785_v42 = vmul.f32 0.020408163, %v1645_v34  ;;  %v3541_v34 = vld [vmem:[%s6180_s1 + $0x2d0] sm:$0xf0] }
 0x1c8   :  { %1180 = vmatmul.bf16.gmra.mxu2 %v3548_v25  ;;  %v1025_v20 = vadd.f32 %v1024_v9, %v890_v29  ;;  %v5090_v54 = vpop.xlane.xlu1 %1647 }
 0x1c9   :  { %v1158_v40 = vpop.f32.mrf.mxu2  ;;  %v5088_v48 = vadd.f32 1e-05, %v1785_v42 }
 0x1cb   :  { %v1393_v56 = vpop.xlane.xlu2 %1392  ;;  %vm1977_vm15 = vweird.f32 %v5088_v48 }
 0x1cc   :  { %v1292_v59 = vpop.f32.mrf.mxu3 }
 0x1cd   :  { %2483 = vperm.xlu1 %3711, %v2431_v55  }
 0x1cf   :  { %v893_v31 = vpop.f32.mrf.mxu0 }
 0x1d0   :  { %v1027_v55 = vpop.f32.mrf.mxu1 }
 0x1d1   :  { %v1161_v63 = vpop.f32.mrf.mxu2 }
 0x1d4   :  { %2488 = vperm.xlu2 %3713, %v2432_v32   ;;  %v1295_v13 = vpop.f32.mrf.mxu3  ;;  %v1784_v32 = vmul.f32 0.020408163, %v1642_v53  ;;  %v3539_v53 = vld [vmem:[%s6180_s1 + $0x2c0] sm:$0xf] }
 0x1d7   :  { %v895_v44 = vpop.f32.mrf.mxu0 }
 0x1d8   :  { %2493 = vperm.xlu0 %3712, %v2433_v26   ;;  %v1029_v43 = vpop.f32.mrf.mxu1  ;;  %v1157_v26 = vadd.f32 %v1156_v50, %v1023_v60  ;;  %v5078_v50 = vadd.f32 1e-05, %v1784_v32  ;;  %v5080_v60 = vpop.xlane.xlu2 %1650  ;;  %v1501_v32 = vmul.f32 0.020408163, %v1393_v56 }
 0x1d9   :  { %v1163_v14 = vpop.f32.mrf.mxu2  ;;  %v1030_v52 = vadd.f32 %v1029_v43, %v895_v44  ;;  %v3549_v43 = vld [vmem:[%s6180_s1 + $0x2d8] sm:$0xf0] }
 0x1da   :  { %v3552_v35 = vor.u32 %v3699_v37, %v3549_v43  ;;  %v5086_v8 = vadd.f32 %v1290_v57, %v1157_v26  ;;  %3720 = vrsqrt.f32 %v5078_v50  ;;  %v5099_v26 = vsub.f32 %v4785_v16, %v1501_v32 }
 0x1db   :  { %v1164_v7 = vadd.f32 %v1163_v14, %v1030_v52  ;;  %v3700_v14 = vld [vmem:[%s6180_s1 + $0x2cc] sm:$0xf0]  ;;  %v3698_v52 = vld [vmem:[%s6180_s1 + $0x2c4] sm:$0xf]  ;;  %3722 = vrsqrt.f32 %v5088_v48  ;;  %vm1967_vm12 = vweird.f32 %v5078_v50 }
 0x1dc   :  { %v1297_v30 = vpop.f32.mrf.mxu3  ;;  %3607 = vmatmul.msk.bf16.gmra.mxu3 %vm718_vm0, %v3552_v35  ;;  %v3544_v37 = vor.u32 %v3698_v52, %v3541_v34  ;;  %v1028_v35 = vadd.f32 %v1027_v55, %v893_v31  ;;  %v1433_v57 = vsel %vm1330_vm1, %v5086_v8, 0.0  ;;  %6257 = vst [vmem:[#allocation54_spill] sm:$0xff] %v5099_v26  ;;  %v1601_v55 = vmul.f32 %v5099_v26, %v5099_v26 }
 0x1dd   :  { %v5067_v44 = vadd.f32 %v1297_v30, %v1164_v7  ;;  %v3540_v30 = vor.u32 %v3700_v14, %v3539_v53  ;;  %v1159_v14 = vadd.f32 %v1158_v40, %v1025_v20  ;;  %v1399_v40 = vpop.xlane.xlu1 %1398 }
 0x1de   :  { %1046 = vmatmul.bf16.gmra.mxu1 %v3544_v37  ;;  %v1162_v42 = vadd.f32 %v1161_v63, %v1028_v35 }
 0x1df   :  { %v898_v25 = vpop.f32.mrf.mxu0  ;;  %912 = vmatmul.bf16.gmra.mxu0 %v3540_v30  ;;  %v5103_v52 = vadd.f32 %v1292_v59, %v1159_v14  ;;  %v1691_v59 = vsel %vm1330_vm1, %v1601_v55, 0.0 }
 0x1e0   :  { %v1032_v7 = vpop.f32.mrf.mxu1  ;;  %v5101_v56 = vpop.xlane.xlu2 %1401  ;;  %v5109_v30 = vadd.f32 %v1295_v13, %v1162_v42 }
 0x1e1   :  { %v1033_v43 = vadd.f32 %v1032_v7, %v898_v25  ;;  %v1166_v33 = vpop.f32.mrf.mxu2  ;;  %6258 = vst [vmem:[#allocation55_spill] sm:$0xff] %v5103_v52  ;;  %v3721_v31 = vpop.eup %3720  ;;  %v1436_v16 = vsel %vm1330_vm1, %v5103_v52, 0.0  ;;  %v1503_v7 = vmul.f32 0.020408163, %v1399_v40 }
 0x1e2   :  { %6259 = vst [vmem:[#allocation56_spill] sm:$0xff] %v5109_v30  ;;  %v3723_v34 = vpop.eup %3722  ;;  %v1962_v20 = vmul.f32 %v3721_v31, %v5078_v50  ;;  %v1439_v37 = vsel %vm1330_vm1, %v5109_v30, 0.0  ;;  %vm1968_vm11 = vweird.f32 %v3721_v31 }
 0x1e3   :  { %v1167_v53 = vadd.f32 %v1166_v33, %v1033_v43  ;;  %v5105_v33 = vpop.xlane.xlu0 %1395  ;;  %v1972_v63 = vmul.f32 %v3723_v34, %v5088_v48  ;;  %v5119_v35 = vsub.f32 %v4830_v6, %v1503_v7  ;;  %vm1969_vm13 = vmor %vm1967_vm12, %vm1968_vm11  ;;  %vm1978_vm14 = vweird.f32 %v3723_v34 }
 0x1e4   :  { %v1300_v29 = vpop.f32.mrf.mxu3  ;;  %v1963_v43 = vmul.f32 %v3721_v31, %v1962_v20  ;;  %vm1979_vm2 = vmor %vm1977_vm15, %vm1978_vm14 }
 0x1e5   :  { %v5095_v9 = vadd.f32 %v1300_v29, %v1167_v53  ;;  %6260 = vst [vmem:[#allocation57_spill] sm:$0xff] %v5119_v35  ;;  %v5123_v14 = vpop.xlane.xlu1 %1656 }
 0x1e6   :  { %v1964_v42 = vmul.f32 0.5, %v1963_v43 }
 0x1e7   :  { %v900_v32 = vpop.f32.mrf.mxu0 }
 0x1e8   :  { %v1660_v25 = vpop.xlane.xlu2 %1659  ;;  %v1034_v13 = vpop.f32.mrf.mxu1  ;;  %v1965_v52 = vsub.f32 1.5, %v1964_v42 }
 0x1e9   :  { %v1035_v29 = vadd.f32 %v1034_v13, %v900_v32  ;;  %v1790_v40 = vmul.f32 0.020408163, %v1660_v25  ;;  %v1168_v55 = vpop.f32.mrf.mxu2 }
 0x1ea   :  { %v1966_v25 = vmul.f32 %v3721_v31, %v1965_v52 }
 0x1eb   :  { %v5121_v53 = vpop.xlane.xlu0 %1653  ;;  %v1169_v26 = vadd.f32 %v1168_v55, %v1035_v29  ;;  %v1890_v6 = vadd.f32 1e-05, %v1790_v40  ;;  %v1835_v55 = vld [vmem:[%s6181_s2 + $0x20] sm:$0xff] }
 0x1ec   :  { %v1302_v7 = vpop.f32.mrf.mxu3 }
 0x1ed   :  { %v5132_v43 = vadd.f32 %v1302_v7, %v1169_v26  ;;  %3724 = vrsqrt.f32 %v1890_v6  ;;  %v1970_v26 = vsel %vm1969_vm13, %v3721_v31, %v1966_v25  ;;  %vm2027_vm4 = vweird.f32 %v1890_v6 }
 0x1ef   :  { %6261 = vst [vmem:[#allocation58_spill] sm:$0xff] %v5132_v43 }
 0x1f3   :  { %v5129_v30 = vpop.xlane.xlu0 %1404  ;;  %v3725_v50 = vpop.eup %3724 }
 0x1f4   :  { %v5127_v20 = vpop.xlane.xlu2 %1410  ;;  %vm2028_vm3 = vweird.f32 %v3725_v50 }
 0x1f5   :  { %vm2029_vm5 = vmor %vm2027_vm4, %vm2028_vm3 }
 0x1f7   :  { %1434 = vadd.xlane.f32.xlu1 %v1433_v57  ;;  %v1973_v57 = vmul.f32 %v3723_v34, %v1972_v63 }
 0x1fb   :  { %v5146_v42 = vpop.xlane.xlu0 %1662 }
 0x1fd   :  { %1437 = vadd.xlane.f32.xlu2 %v1436_v16  ;;  %v1603_v16 = vmul.f32 %v5119_v35, %v5119_v35 }
 0x1ff   :  { %1692 = vadd.xlane.f32.xlu1 %v1691_v59  ;;  %v1974_v59 = vmul.f32 0.5, %v1973_v57  ;;  %v1697_v11 = vsel %vm1330_vm1, %v1603_v16, 0.0  ;;  %v5135_v32 = vpop.xlane.xlu2 %1668  ;;  %v1448_v57 = vsel %vm1330_vm1, %v5132_v43, 0.0 }
 0x201   :  { %v1975_v63 = vsub.f32 1.5, %v1974_v59  ;;  %v2022_v59 = vmul.f32 %v3725_v50, %v1890_v6 }
 0x202   :  { %1440 = vadd.xlane.f32.xlu0 %v1439_v37  ;;  %v1408_v37 = vpop.xlane.xlu1 %1407 }
 0x203   :  { %v1506_v13 = vmul.f32 0.020408163, %v1408_v37  ;;  %v1976_v29 = vmul.f32 %v3723_v34, %v1975_v63  ;;  %v2023_v37 = vmul.f32 %v3725_v50, %v2022_v59  ;;  %v5157_v63 = vpop.xlane.xlu0 %1413 }
 0x205   :  { %v5144_v52 = vsub.f32 %v4885_v22, %v1506_v13  ;;  %v1980_v16 = vsel %vm1979_vm2, %v3723_v34, %v1976_v29  ;;  %v2024_v13 = vmul.f32 0.5, %v2023_v37  ;;  %v3705_v37 = vld [vmem:[%s6180_s1 + $0x2f4] sm:$0xf0] }
 0x206   :  { %v2435_v48 = vmul.f32 %v1980_v16, %v1835_v55 }
 0x207   :  { %6262 = vst [vmem:[#allocation59_spill] sm:$0xff] %v5144_v52  ;;  %v1606_v31 = vmul.f32 %v5144_v52, %v5144_v52  ;;  %v2025_v29 = vsub.f32 1.5, %v2024_v13  ;;  %v1840_v13 = vld [vmem:[%s6181_s2 + $0x48] sm:$0xff] }
 0x209   :  { %v1706_v25 = vsel %vm1330_vm1, %v1606_v31, 0.0  ;;  %v3563_v31 = vld [vmem:[%s6180_s1 + $0x2e8] sm:$0xf] }
 0x20a   :  { %1698 = vadd.xlane.f32.xlu0 %v1697_v11  ;;  %v1834_v11 = vld [vmem:[%s6181_s2 + $0x18] sm:$0xff]  ;;  %v5153_v7 = vpop.xlane.xlu1 %1665 }
 0x20b   :  { %v2434_v40 = vmul.f32 %v1970_v26, %v1834_v11  ;;  %v5164_v11 = vpop.xlane.xlu0 %1671 }
 0x20c   :  { %v5155_v22 = vpop.xlane.xlu2 %1419  ;;  %6264 = vst [vmem:[#allocation61_spill] sm:$0xff] %v5164_v11 }
 0x20d   :  { %6263 = vst [vmem:[#allocation60_spill] sm:$0xff] %v5155_v22  ;;  %v1786_v22 = vmul.f32 0.020408163, %v5090_v54  ;;  %v3557_v54 = vld [vmem:[%s6180_s1 + $0x2f0] sm:$0xf0] }
 0x212   :  { %1449 = vadd.xlane.f32.xlu0 %v1448_v57  ;;  %v5160_v57 = vpop.xlane.xlu1 %1416 }
 0x215   :  { %2498 = vperm.xlu2 %3713, %v2434_v40  }
 0x217   :  { %v5162_v34 = vpop.xlane.xlu2 %1677 }
 0x218   :  { %2503 = vperm.xlu1 %3711, %v2435_v48   ;;  %v2026_v48 = vmul.f32 %v3725_v50, %v2025_v29  ;;  %v3564_v29 = vor.u32 %v3705_v37, %v3563_v31 }
 0x21a   :  { %1707 = vadd.xlane.f32.xlu0 %v1706_v25  ;;  %v1037_v40 = vpop.f32.mrf.mxu1  ;;  %v5166_v59 = vpop.xlane.xlu1 %1674  ;;  %v2030_v6 = vsel %vm2029_vm5, %v3725_v50, %v2026_v48  ;;  %1185 = vmatmul.bf16.gmra.mxu2 %v3564_v29  ;;  %v3555_v50 = vld [vmem:[%s6180_s1 + $0x2e0] sm:$0xf]  ;;  %v3704_v48 = vld [vmem:[%s6180_s1 + $0x2ec] sm:$0xf0]  ;;  %v1787_v29 = vmul.f32 0.020408163, %v5080_v60 }
 0x21b   :  { %6265 = vst [vmem:[#allocation62_spill] sm:$0xff] %v5166_v59  ;;  %v5176_v25 = vpop.xlane.xlu0 %1422  ;;  %v3565_v59 = vld [vmem:[%s6180_s1 + $0x2f8] sm:$0xf0]  ;;  %v3571_v60 = vld [vmem:[%s6180_s1 + $0x300] sm:$0xf] }
 0x21c   :  { %6267 = vst [vmem:[#allocation64_spill] sm:$0xff] %v5176_v25  ;;  %v2440_v25 = vmul.f32 %v2030_v6, %v1840_v13 }
 0x21d   :  { %v1171_v55 = vpop.f32.mrf.mxu2 }
 0x21f   :  { %v903_v26 = vpop.f32.mrf.mxu0 }
 0x220   :  { %v1305_v16 = vpop.f32.mrf.mxu3  ;;  %v1038_v12 = vadd.f32 %v1037_v40, %v903_v26 }
 0x222   :  { %v1039_v43 = vpop.f32.mrf.mxu1  ;;  %v1172_v31 = vadd.f32 %v1171_v55, %v1038_v12  ;;  %v5201_v40 = vpop.xlane.xlu1 %1425  ;;  %v1502_v55 = vmul.f32 0.020408163, %v5105_v33  ;;  %v3709_v33 = vld [vmem:[%s6180_s1 + $0x314] sm:$0xf0] }
 0x224   :  { %v5168_v52 = vpop.xlane.xlu2 %1428  ;;  %v5205_v12 = vadd.f32 %v1305_v16, %v1172_v31 }
 0x225   :  { %6266 = vst [vmem:[#allocation63_spill] sm:$0xff] %v5168_v52  ;;  %v3703_v52 = vld [vmem:[%s6180_s1 + $0x2ec] sm:$0xf]  ;;  %v1173_v11 = vpop.f32.mrf.mxu2 }
 0x226   :  { %v3568_v19 = vor.u32 %v3703_v52, %v3565_v59  ;;  %v3556_v52 = vor.u32 %v3704_v48, %v3555_v50  ;;  %v3707_v48 = vld [vmem:[%s6180_s1 + $0x30c] sm:$0xf] }
 0x227   :  { %v905_v35 = vpop.f32.mrf.mxu0 }
 0x228   :  { %v1040_v46 = vadd.f32 %v1039_v43, %v905_v35  ;;  %v3702_v35 = vld [vmem:[%s6180_s1 + $0x2e4] sm:$0xf]  ;;  %v1307_v43 = vpop.f32.mrf.mxu3  ;;  %3608 = vmatmul.msk.bf16.gmra.mxu3 %vm718_vm0, %v3568_v19  ;;  %917 = vmatmul.bf16.gmra.mxu0 %v3556_v52  ;;  %v5216_v19 = vsub.f32 %v4820_v51, %v1502_v55 }
 0x229   :  { %v3560_v26 = vor.u32 %v3702_v35, %v3557_v54  ;;  %v3706_v52 = vld [vmem:[%s6180_s1 + $0x304] sm:$0xf] }
 0x22a   :  { %v1174_v37 = vadd.f32 %v1173_v11, %v1040_v46  ;;  %v5209_v11 = vadd.f32 1e-05, %v1786_v22  ;;  %v5218_v13 = vpop.xlane.xlu1 %1683  ;;  %v3579_v22 = vld [vmem:[%s6180_s1 + $0x308] sm:$0xf]  ;;  %v1602_v50 = vmul.f32 %v5216_v19, %v5216_v19 }
 0x22b   :  { %1051 = vmatmul.bf16.gmra.mxu1 %v3560_v26  ;;  %v3580_v51 = vor.u32 %v3709_v33, %v3579_v22  ;;  %v3573_v26 = vld [vmem:[%s6180_s1 + $0x310] sm:$0xf0]  ;;  %v1504_v22 = vmul.f32 0.020408163, %v5101_v56 }
 0x22c   :  { %v5207_v46 = vadd.f32 %v1307_v43, %v1174_v37  ;;  %3726 = vrsqrt.f32 %v5209_v11  ;;  %v3708_v43 = vld [vmem:[%s6180_s1 + $0x30c] sm:$0xf0]  ;;  %v3576_v55 = vor.u32 %v3706_v52, %v3573_v26  ;;  %v1694_v33 = vsel %vm1330_vm1, %v1602_v50, 0.0 }
 0x22d   :  { %1190 = vmatmul.bf16.gmra.mxu2 %v3580_v51  ;;  %vm1987_vm6 = vweird.f32 %v5209_v11 }
 0x22e   :  { %2528 = vperm.xlu0 %3712, %v2440_v25   ;;  %v5212_v25 = vpop.xlane.xlu0 %1680 }
 0x22f   :  { %v5203_v59 = vpop.xlane.xlu2 %1686 }
 0x232   :  { %v3727_v31 = vpop.eup %3726 }
 0x236   :  { %v5236_v37 = vpop.xlane.xlu0 %1431 }
 0x237   :  { %v2489_v6 = vpop.permute.xlu2 %2488 }
 0x238   :  { %v2732_v16 = vmul.f32 %v2489_v6, %v4719_v49  ;;  %v3581_v49 = vld [vmem:[%s6180_s1 + $0x318] sm:$0xf0]  ;;  %v1982_v6 = vmul.f32 %v3727_v31, %v5209_v11 }
 0x239   :  { %v3584_v54 = vor.u32 %v3707_v48, %v3581_v49 }
 0x23a   :  { %v3082_v35 = vadd.f32 %v4312_v3, %v2732_v16  ;;  %v3572_v3 = vor.u32 %v3708_v43, %v3571_v60  ;;  %v1887_v16 = vadd.f32 1e-05, %v1787_v29  ;;  %v1983_v49 = vmul.f32 %v3727_v31, %v1982_v6 }
 0x23b   :  { %3609 = vmatmul.msk.bf16.gmra.mxu3 %vm718_vm0, %v3584_v54  ;;  %1056 = vmatmul.bf16.gmra.mxu1 %v3576_v55  ;;  %v1442_v29 = vsel %vm1330_vm1, %v5067_v44, 0.0  ;;  %v908_v54 = vpop.f32.mrf.mxu0  ;;  %vm1988_vm0 = vweird.f32 %v3727_v31 }
 0x23c   :  { %3132 = vst.msk [vmem:[%s6182_s4 + $0x8] sm:$0xff] %vm1330_vm1, %v3082_v35  ;;  %922 = vmatmul.bf16.gmra.mxu0 %v3572_v3  ;;  %3728 = vrsqrt.f32 %v1887_v16  ;;  %v5261_v35 = vsub.f32 %v4865_v38, %v1504_v22  ;;  %v1042_v38 = vpop.f32.mrf.mxu1  ;;  %v1176_v22 = vpop.f32.mrf.mxu2  ;;  %vm1989_vm7 = vmor %vm1987_vm6, %vm1988_vm0  ;;  %vm1997_vm9 = vweird.f32 %v1887_v16 }
 0x23d   :  { %v1043_v3 = vadd.f32 %v1042_v38, %v908_v54 }
 0x23e   :  { %1695 = vadd.xlane.f32.xlu2 %v1694_v33  ;;  %6268 = vst [vmem:[#allocation65_spill] sm:$0xff] %v5261_v35  ;;  %v5265_v60 = vpop.xlane.xlu0 %1689  ;;  %v1604_v50 = vmul.f32 %v5261_v35, %v5261_v35  ;;  %v1310_v35 = vpop.f32.mrf.mxu3 }
 0x23f   :  { %v2484_v51 = vpop.permute.xlu1 %2483 }
 0x240   :  { %v2731_v48 = vmul.f32 %v2484_v51, %v4707_v28  ;;  %v1984_v28 = vmul.f32 0.5, %v1983_v49  ;;  %v1700_v26 = vsel %vm1330_vm1, %v1604_v50, 0.0  ;;  %v1509_v50 = vmul.f32 0.020408163, %v5160_v57  ;;  %v1837_v57 = vld [vmem:[%s6181_s2 + $0x30] sm:$0xff] }
 0x242   :  { %v3081_v56 = vadd.f32 %v4341_v17, %v2731_v48  ;;  %1443 = vadd.xlane.f32.xlu1 %v1442_v29  ;;  %v3729_v43 = vpop.eup %3728  ;;  %v1985_v52 = vsub.f32 1.5, %v1984_v28  ;;  %v1793_v17 = vmul.f32 0.020408163, %v5135_v32  ;;  %v1177_v48 = vadd.f32 %v1176_v22, %v1043_v3 }
 0x243   :  { %v1992_v55 = vmul.f32 %v3729_v43, %v1887_v16  ;;  %vm1998_vm8 = vweird.f32 %v3729_v43  ;;  %v1843_v16 = vld [vmem:[%s6181_s2 + $0x60] sm:$0xff] }
 0x244   :  { %3131 = vst.msk [vmem:[%s6182_s4] sm:$0xff] %vm1330_vm1, %v3081_v56  ;;  %v1986_v49 = vmul.f32 %v3727_v31, %v1985_v52  ;;  %v1893_v56 = vadd.f32 1e-05, %v1793_v17  ;;  %v5283_v32 = vadd.f32 %v1310_v35, %v1177_v48  ;;  %v5292_v52 = vsub.f32 %v4915_v0, %v1509_v50  ;;  %vm1999_vm10 = vmor %vm1997_vm9, %vm1998_vm8 }
 0x245   :  { %v1993_v29 = vmul.f32 %v3729_v43, %v1992_v55 }
 0x246   :  { %3730 = vrsqrt.f32 %v1893_v56  ;;  %v1457_v11 = vsel %vm1330_vm1, %v5283_v32, 0.0  ;;  %vm2057_vm12 = vweird.f32 %v1893_v56 }
 0x247   :  { %v1994_v28 = vmul.f32 0.5, %v1993_v29 }
 0x249   :  { %v1995_v38 = vsub.f32 1.5, %v1994_v28  ;;  %v1178_v28 = vpop.f32.mrf.mxu2 }
 0x24a   :  { %v2494_v6 = vpop.permute.xlu0 %2493  ;;  %1701 = vadd.xlane.f32.xlu1 %v1700_v26 }
 0x24b   :  { %v2733_v33 = vmul.f32 %v2494_v6, %v4731_v2  ;;  %v1836_v2 = vld [vmem:[%s6181_s2 + $0x28] sm:$0xff]  ;;  %v1996_v26 = vmul.f32 %v3729_v43, %v1995_v38 }
 0x24c   :  { %v3731_v35 = vpop.eup %3730 }
 0x24d   :  { %v3083_v51 = vadd.f32 %v4381_v47, %v2733_v33  ;;  %v1990_v47 = vsel %vm1989_vm7, %v3727_v31, %v1986_v49  ;;  %v2052_v3 = vmul.f32 %v3731_v35, %v1893_v56  ;;  %v1609_v31 = vmul.f32 %v5292_v52, %v5292_v52  ;;  %v910_v49 = vpop.f32.mrf.mxu0 }
 0x24e   :  { %v2436_v54 = vmul.f32 %v1990_v47, %v1836_v2  ;;  %v2000_v55 = vsel %vm1999_vm10, %v3729_v43, %v1996_v26  ;;  %vm2058_vm11 = vweird.f32 %v3731_v35  ;;  %v1044_v43 = vpop.f32.mrf.mxu1 }
 0x24f   :  { %3133 = vst.msk [vmem:[%s6182_s4 + $0x10] sm:$0xff] %vm1330_vm1, %v3083_v51  ;;  %v2053_v17 = vmul.f32 %v3731_v35, %v2052_v3  ;;  %v1715_v6 = vsel %vm1330_vm1, %v1609_v31, 0.0  ;;  %v2437_v0 = vmul.f32 %v2000_v55, %v1837_v57  ;;  %vm2059_vm13 = vmor %vm2057_vm12, %vm2058_vm11  ;;  %v1045_v2 = vadd.f32 %v1044_v43, %v910_v49 }
 0x250   :  { %v1505_v31 = vmul.f32 0.020408163, %v5129_v30 }
 0x251   :  { %v2054_v22 = vmul.f32 0.5, %v2053_v17  ;;  %v1179_v50 = vadd.f32 %v1178_v28, %v1045_v2  ;;  %v1789_v17 = vmul.f32 0.020408163, %v5123_v14 }
 0x253   :  { %v2055_v33 = vsub.f32 1.5, %v2054_v22  ;;  %v1889_v30 = vadd.f32 1e-05, %v1789_v17 }
 0x255   :  { %v2056_v51 = vmul.f32 %v3731_v35, %v2055_v33  ;;  %v1181_v33 = vpop.f32.mrf.mxu2  ;;  %vm2017_vm4 = vweird.f32 %v1889_v30 }
 0x256   :  { %2508 = vperm.xlu2 %3713, %v2436_v54   ;;  %v1312_v54 = vpop.f32.mrf.mxu3 }
 0x257   :  { %v2060_v48 = vsel %vm2059_vm13, %v3731_v35, %v2056_v51  ;;  %v5306_v38 = vadd.f32 %v1312_v54, %v1179_v50  ;;  %v1451_v54 = vsel %vm1330_vm1, %v5205_v12, 0.0 }
 0x258   :  { %1458 = vadd.xlane.f32.xlu0 %v1457_v11  ;;  %v2443_v47 = vmul.f32 %v2060_v48, %v1843_v16  ;;  %v1788_v11 = vmul.f32 0.020408163, %v5121_v53  ;;  %v5321_v53 = vsub.f32 %v4875_v24, %v1505_v31 }
 0x25a   :  { %v1888_v3 = vadd.f32 1e-05, %v1788_v11  ;;  %v1605_v14 = vmul.f32 %v5321_v53, %v5321_v53 }
 0x25c   :  { %3732 = vrsqrt.f32 %v1888_v3  ;;  %v1703_v2 = vsel %vm1330_vm1, %v1605_v14, 0.0  ;;  %vm2007_vm15 = vweird.f32 %v1888_v3 }
 0x25d   :  { %3734 = vrsqrt.f32 %v1889_v30 }
 0x25f   :  { %v1315_v24 = vpop.f32.mrf.mxu3 }
 0x260   :  { %1716 = vadd.xlane.f32.xlu0 %v1715_v6  ;;  %v913_v6 = vpop.f32.mrf.mxu0 }
 0x262   :  { %v3733_v51 = vpop.eup %3732 }
 0x263   :  { %2513 = vperm.xlu1 %3711, %v2437_v0   ;;  %v1047_v0 = vpop.f32.mrf.mxu1  ;;  %v2002_v43 = vmul.f32 %v3733_v51, %v1888_v3  ;;  %vm2008_vm14 = vweird.f32 %v3733_v51 }
 0x264   :  { %v1048_v22 = vadd.f32 %v1047_v0, %v913_v6  ;;  %v1796_v0 = vmul.f32 0.020408163, %v5162_v34  ;;  %vm2009_vm2 = vmor %vm2007_vm15, %vm2008_vm14  ;;  %v1838_v34 = vld [vmem:[%s6181_s2 + $0x38] sm:$0xff] }
 0x265   :  { %v2003_v28 = vmul.f32 %v3733_v51, %v2002_v43 }
 0x266   :  { %v1182_v16 = vadd.f32 %v1181_v33, %v1048_v22  ;;  %v1183_v22 = vpop.f32.mrf.mxu2 }
 0x267   :  { %v2004_v17 = vmul.f32 0.5, %v2003_v28 }
 0x268   :  { %v5331_v49 = vadd.f32 %v1315_v24, %v1182_v16  ;;  %v1896_v16 = vadd.f32 1e-05, %v1796_v0  ;;  %v1317_v24 = vpop.f32.mrf.mxu3 }
 0x26a   :  { %v5308_v56 = vpop.xlane.xlu1 %1434  ;;  %3736 = vrsqrt.f32 %v1896_v16  ;;  %vm2087_vm6 = vweird.f32 %v1896_v16 }
 0x270   :  { %v5303_v29 = vpop.xlane.xlu2 %1437 }
 0x274   :  { %2543 = vperm.xlu0 %3712, %v2443_v47   ;;  %v3735_v47 = vpop.eup %3734 }
 0x275   :  { %v5312_v57 = vpop.xlane.xlu0 %1440  ;;  %v2012_v31 = vmul.f32 %v3735_v47, %v1889_v30  ;;  %vm2018_vm3 = vweird.f32 %v3735_v47 }
 0x276   :  { %vm2019_vm5 = vmor %vm2017_vm4, %vm2018_vm3 }
 0x277   :  { %v2013_v14 = vmul.f32 %v3735_v47, %v2012_v31 }
 0x278   :  { %v2499_v26 = vpop.permute.xlu2 %2498 }
 0x279   :  { %v2734_v35 = vmul.f32 %v2499_v26, %v4749_v4  ;;  %v1445_v4 = vsel %vm1330_vm1, %v5095_v9, 0.0  ;;  %v915_v26 = vpop.f32.mrf.mxu0  ;;  %v2014_v43 = vmul.f32 0.5, %v2013_v14 }
 0x27b   :  { %v3084_v55 = vadd.f32 %v4346_v21, %v2734_v35  ;;  %v5325_v21 = vpop.xlane.xlu1 %1692  ;;  %v1049_v35 = vpop.f32.mrf.mxu1 }
 0x27c   :  { %v1050_v6 = vadd.f32 %v1049_v35, %v915_v26 }
 0x27d   :  { %3134 = vst.msk [vmem:[%s6182_s4 + $0x18] sm:$0xff] %vm1330_vm1, %v3084_v55  ;;  %v5329_v48 = vpop.xlane.xlu0 %1698 }
 0x27e   :  { %v1184_v33 = vadd.f32 %v1183_v22, %v1050_v6 }
 0x27f   :  { %1446 = vadd.xlane.f32.xlu2 %v1445_v4 }
 0x285   :  { %v5338_v4 = vpop.xlane.xlu0 %1449 }
 0x287   :  { %1704 = vadd.xlane.f32.xlu2 %v1703_v2  ;;  %v5345_v2 = vadd.f32 %v1317_v24, %v1184_v33 }
 0x289   :  { %v1466_v26 = vsel %vm1330_vm1, %v5345_v2, 0.0 }
 0x28a   :  { %v2504_v50 = vpop.permute.xlu1 %2503 }
 0x28b   :  { %v2735_v11 = vmul.f32 %v2504_v50, %v4778_v61  ;;  %v2005_v61 = vsub.f32 1.5, %v2004_v17  ;;  %v2015_v50 = vsub.f32 1.5, %v2014_v43 }
 0x28d   :  { %v3085_v55 = vadd.f32 %v4315_v5, %v2735_v11  ;;  %1452 = vadd.xlane.f32.xlu1 %v1451_v54  ;;  %v2006_v5 = vmul.f32 %v3733_v51, %v2005_v61  ;;  %v5347_v28 = vpop.xlane.xlu0 %1707  ;;  %v1512_v54 = vmul.f32 0.020408163, %v5201_v40  ;;  %v2016_v31 = vmul.f32 %v3735_v47, %v2015_v50 }
 0x28f   :  { %3135 = vst.msk [vmem:[%s6182_s4 + $0x20] sm:$0xff] %vm1330_vm1, %v3085_v55  ;;  %v2010_v11 = vsel %vm2009_vm2, %v3733_v51, %v2006_v5  ;;  %v5356_v35 = vsub.f32 %v4970_v1, %v1512_v54  ;;  %v3737_v55 = vpop.eup %3736  ;;  %v1839_v51 = vld [vmem:[%s6181_s2 + $0x40] sm:$0xff]  ;;  %v2020_v0 = vsel %vm2019_vm5, %v3735_v47, %v2016_v31 }
 0x290   :  { %v2438_v3 = vmul.f32 %v2010_v11, %v1838_v34  ;;  %v2082_v17 = vmul.f32 %v3737_v55, %v1896_v16  ;;  %v2439_v14 = vmul.f32 %v2020_v0, %v1839_v51  ;;  %vm2088_vm0 = vweird.f32 %v3737_v55  ;;  %v1846_v11 = vld [vmem:[%s6181_s2 + $0x78] sm:$0xff] }
 0x291   :  { %v1612_v1 = vmul.f32 %v5356_v35, %v5356_v35  ;;  %vm2089_vm7 = vmor %vm2087_vm6, %vm2088_vm0  ;;  %v1791_v51 = vmul.f32 0.020408163, %v5146_v42  ;;  %v1507_v0 = vmul.f32 0.020408163, %v5127_v20  ;;  %v1792_v42 = vmul.f32 0.020408163, %v5153_v7 }
 0x292   :  { %v2083_v61 = vmul.f32 %v3737_v55, %v2082_v17 }
 0x293   :  { %v1724_v30 = vsel %vm1330_vm1, %v1612_v1, 0.0  ;;  %v1891_v16 = vadd.f32 1e-05, %v1791_v51 }
 0x295   :  { %3738 = vrsqrt.f32 %v1891_v16  ;;  %vm2037_vm9 = vweird.f32 %v1891_v16 }
 0x29b   :  { %v3739_v7 = vpop.eup %3738 }
 0x29c   :  { %vm2038_vm8 = vweird.f32 %v3739_v7 }
 0x29d   :  { %v1186_v50 = vpop.f32.mrf.mxu2  ;;  %vm2039_vm10 = vmor %vm2037_vm9, %vm2038_vm8 }
 0x29e   :  { %1467 = vadd.xlane.f32.xlu0 %v1466_v26 }
 0x29f   :  { %2518 = vperm.xlu2 %3713, %v2438_v3  }
 0x2a0   :  { %v2529_v40 = vpop.permute.xlu0 %2528 }
 0x2a1   :  { %v2740_v6 = vmul.f32 %v2529_v40, %v4878_v36  ;;  %v2084_v36 = vmul.f32 0.5, %v2083_v61  ;;  %v1454_v61 = vsel %vm1330_vm1, %v5207_v46, 0.0 }
 0x2a3   :  { %v3090_v22 = vadd.f32 %v4409_v58, %v2740_v6  ;;  %v2085_v33 = vsub.f32 1.5, %v2084_v36 }
 0x2a5   :  { %3140 = vst.msk [vmem:[%s6182_s4 + $0x48] sm:$0xff] %vm1330_vm1, %v3090_v22  ;;  %v918_v24 = vpop.f32.mrf.mxu0  ;;  %v2086_v5 = vmul.f32 %v3737_v55, %v2085_v33  ;;  %v1188_v20 = vpop.f32.mrf.mxu2  ;;  %v1892_v33 = vadd.f32 1e-05, %v1792_v42 }
 0x2a6   :  { %2523 = vperm.xlu1 %3711, %v2439_v14   ;;  %1725 = vadd.xlane.f32.xlu0 %v1724_v30 }
 0x2a7   :  { %v2090_v26 = vsel %vm2089_vm7, %v3737_v55, %v2086_v5  ;;  %v1508_v55 = vmul.f32 0.020408163, %v5157_v63  ;;  %v2032_v5 = vmul.f32 %v3739_v7, %v1891_v16  ;;  %3740 = vrsqrt.f32 %v1892_v33 }
 0x2a8   :  { %v1052_v47 = vpop.f32.mrf.mxu1  ;;  %v2446_v31 = vmul.f32 %v2090_v26, %v1846_v11  ;;  %vm2047_vm12 = vweird.f32 %v1892_v33 }
 0x2a9   :  { %v1053_v58 = vadd.f32 %v1052_v47, %v918_v24  ;;  %v5393_v14 = vsub.f32 %v4905_v23, %v1508_v55  ;;  %v2033_v11 = vmul.f32 %v3739_v7, %v2032_v5 }
 0x2ab   :  { %v1187_v54 = vadd.f32 %v1186_v50, %v1053_v58  ;;  %v1320_v34 = vpop.f32.mrf.mxu3  ;;  %v1608_v24 = vmul.f32 %v5393_v14, %v5393_v14  ;;  %v2034_v55 = vmul.f32 0.5, %v2033_v11 }
 0x2ad   :  { %v5375_v3 = vadd.f32 %v1320_v34, %v1187_v54  ;;  %v920_v22 = vpop.f32.mrf.mxu0  ;;  %v1712_v50 = vsel %vm1330_vm1, %v1608_v24, 0.0 }
 0x2b1   :  { %v5370_v43 = vpop.xlane.xlu2 %1695 }
 0x2b3   :  { %v1322_v36 = vpop.f32.mrf.mxu3 }
 0x2b5   :  { %v5386_v1 = vpop.xlane.xlu1 %1443 }
 0x2b9   :  { %v2509_v40 = vpop.permute.xlu2 %2508  ;;  %v923_v54 = vpop.f32.mrf.mxu0 }
 0x2ba   :  { %v2736_v17 = vmul.f32 %v2509_v40, %v4794_v41  ;;  %2558 = vperm.xlu0 %3712, %v2446_v31   ;;  %v5389_v41 = vsub.f32 %v4895_v18, %v1507_v0  ;;  %v3741_v31 = vpop.eup %3740  ;;  %v1191_v0 = vpop.f32.mrf.mxu2 }
 0x2bb   :  { %vm2048_vm11 = vweird.f32 %v3741_v31 }
 0x2bc   :  { %v3086_v6 = vadd.f32 %v4417_v10, %v2736_v17  ;;  %v1054_v10 = vpop.f32.mrf.mxu1  ;;  %v1607_v18 = vmul.f32 %v5389_v41, %v5389_v41  ;;  %vm2049_vm13 = vmor %vm2047_vm12, %vm2048_vm11 }
 0x2bd   :  { %v1055_v30 = vadd.f32 %v1054_v10, %v920_v22  ;;  %v5403_v23 = vpop.xlane.xlu1 %1701  ;;  %v1460_v22 = vsel %vm1330_vm1, %v5306_v38, 0.0  ;;  %v2042_v10 = vmul.f32 %v3741_v31, %v1892_v33 }
 0x2be   :  { %3136 = vst.msk [vmem:[%s6182_s4 + $0x28] sm:$0xff] %vm1330_vm1, %v3086_v6  ;;  %v1709_v58 = vsel %vm1330_vm1, %v1607_v18, 0.0  ;;  %v1799_v6 = vmul.f32 0.020408163, %v5203_v59  ;;  %v2035_v59 = vsub.f32 1.5, %v2034_v55 }
 0x2bf   :  { %v1189_v63 = vadd.f32 %v1188_v20, %v1055_v30  ;;  %v1325_v20 = vpop.f32.mrf.mxu3  ;;  %v1515_v18 = vmul.f32 0.020408163, %v5308_v56 }
 0x2c0   :  { %v1899_v30 = vadd.f32 1e-05, %v1799_v6 }
 0x2c1   :  { %v5401_v47 = vadd.f32 %v1322_v36, %v1189_v63  ;;  %v2043_v63 = vmul.f32 %v3741_v31, %v2042_v10 }
 0x2c2   :  { %3742 = vrsqrt.f32 %v1899_v30  ;;  %vm2117_vm15 = vweird.f32 %v1899_v30 }
 0x2c3   :  { %v2044_v24 = vmul.f32 0.5, %v2043_v63 }
 0x2c4   :  { %v1057_v34 = vpop.f32.mrf.mxu1 }
 0x2c5   :  { %v1058_v17 = vadd.f32 %v1057_v34, %v923_v54  ;;  %v2045_v11 = vsub.f32 1.5, %v2044_v24 }
 0x2c8   :  { %1455 = vadd.xlane.f32.xlu2 %v1454_v61  ;;  %v1192_v61 = vadd.f32 %v1191_v0, %v1058_v17  ;;  %v3743_v34 = vpop.eup %3742 }
 0x2c9   :  { %v2112_v17 = vmul.f32 %v3743_v34, %v1899_v30  ;;  %vm2118_vm14 = vweird.f32 %v3743_v34 }
 0x2ca   :  { %vm2119_vm2 = vmor %vm2117_vm15, %vm2118_vm14 }
 0x2cb   :  { %v5407_v26 = vpop.xlane.xlu0 %1458  ;;  %v2113_v0 = vmul.f32 %v3743_v34, %v2112_v17  ;;  %v6273_v17 = vld [vmem:[#allocation46_spill] sm:$0xff] }
 0x2d0   :  { %1710 = vadd.xlane.f32.xlu1 %v1709_v58  ;;  %1713 = vadd.xlane.f32.xlu2 %v1712_v50  ;;  %v5426_v58 = vsub.f32 %v5086_v8, %v1515_v18  ;;  %v1841_v50 = vld [vmem:[%s6181_s2 + $0x50] sm:$0xff]  ;;  %v2046_v8 = vmul.f32 %v3741_v31, %v2045_v11 }
 0x2d2   :  { %v1615_v6 = vmul.f32 %v5426_v58, %v5426_v58  ;;  %v2050_v55 = vsel %vm2049_vm13, %v3741_v31, %v2046_v8 }
 0x2d3   :  { %v5420_v36 = vpop.xlane.xlu0 %1716 }
 0x2d5   :  { %v2514_v40 = vpop.permute.xlu1 %2513 }
 0x2d6   :  { %v2737_v51 = vmul.f32 %v2514_v40, %v4823_v62  ;;  %v5418_v62 = vadd.f32 %v1325_v20, %v1192_v61  ;;  %v1849_v20 = vld [vmem:[%s6181_s2 + $0x90] sm:$0xff] }
 0x2d8   :  { %v3087_v42 = vadd.f32 %v4374_v39, %v2737_v51  ;;  %1461 = vadd.xlane.f32.xlu1 %v1460_v22  ;;  %v2036_v39 = vmul.f32 %v3739_v7, %v2035_v59  ;;  %v1475_v5 = vsel %vm1330_vm1, %v5418_v62, 0.0  ;;  %v2114_v22 = vmul.f32 0.5, %v2113_v0 }
 0x2da   :  { %3137 = vst.msk [vmem:[%s6182_s4 + $0x30] sm:$0xff] %vm1330_vm1, %v3087_v42  ;;  %v2040_v54 = vsel %vm2039_vm10, %v3739_v7, %v2036_v39  ;;  %v1733_v7 = vsel %vm1330_vm1, %v1615_v6, 0.0  ;;  %v2115_v33 = vsub.f32 1.5, %v2114_v22  ;;  %v6269_v39 = vld [vmem:[#allocation2_spill] sm:$0xff]  ;;  %v6274_v6 = vld [vmem:[#allocation44_spill] sm:$0xff] }
 0x2db   :  { %v2441_v56 = vmul.f32 %v2040_v54, %v1841_v50  ;;  %v6271_v54 = vld [vmem:[#allocation64_spill] sm:$0xff] }
 0x2dc   :  { %v2116_v42 = vmul.f32 %v3743_v34, %v2115_v33  ;;  %v1511_v11 = vmul.f32 0.020408163, %v6271_v54 }
 0x2de   :  { %v2120_v59 = vsel %vm2119_vm2, %v3743_v34, %v2116_v42  ;;  %v1463_v34 = vsel %vm1330_vm1, %v5331_v49, 0.0 }
 0x2df   :  { %v2449_v63 = vmul.f32 %v2120_v59, %v1849_v20 }
 0x2e4   :  { %1476 = vadd.xlane.f32.xlu0 %v1475_v5  ;;  %v6270_v5 = vld [vmem:[#allocation61_spill] sm:$0xff] }
 0x2e5   :  { %v1794_v50 = vmul.f32 0.020408163, %v6270_v5 }
 0x2e6   :  { %v2544_v40 = vpop.permute.xlu0 %2543 }
 0x2e7   :  { %v2743_v16 = vmul.f32 %v2544_v40, %v4908_v27  ;;  %v1842_v27 = vld [vmem:[%s6181_s2 + $0x58] sm:$0xff]  ;;  %v1894_v30 = vadd.f32 1e-05, %v1794_v50  ;;  %v6272_v40 = vld [vmem:[#allocation60_spill] sm:$0xff]  ;;  %v1518_v50 = vmul.f32 0.020408163, %v5386_v1 }
 0x2e8   :  { %2533 = vperm.xlu2 %3713, %v2441_v56   ;;  %v2442_v10 = vmul.f32 %v2050_v55, %v1842_v27  ;;  %v1510_v56 = vmul.f32 0.020408163, %v6272_v40  ;;  %v1469_v40 = vsel %vm1330_vm1, %v5375_v3, 0.0 }
 0x2e9   :  { %v3093_v51 = vadd.f32 %v4420_v15, %v2743_v16  ;;  %3744 = vrsqrt.f32 %v1894_v30  ;;  %vm2067_vm4 = vweird.f32 %v1894_v30 }
 0x2ea   :  { %v5467_v8 = vsub.f32 %v6274_v6, %v1510_v56  ;;  %v5489_v56 = vsub.f32 %v5067_v44, %v1518_v50 }
 0x2eb   :  { %3143 = vst.msk [vmem:[%s6182_s4 + $0x60] sm:$0xff] %vm1330_vm1, %v3093_v51  ;;  %v6275_v51 = vld [vmem:[#allocation62_spill] sm:$0xff] }
 0x2ec   :  { %1734 = vadd.xlane.f32.xlu0 %v1733_v7  ;;  %v1795_v0 = vmul.f32 0.020408163, %v6275_v51  ;;  %v1802_v7 = vmul.f32 0.020408163, %v5370_v43 }
 0x2ee   :  { %v1895_v22 = vadd.f32 1e-05, %v1795_v0  ;;  %v1902_v42 = vadd.f32 1e-05, %v1802_v7  ;;  %v1618_v0 = vmul.f32 %v5489_v56, %v5489_v56 }
 0x2ef   :  { %v3745_v55 = vpop.eup %3744 }
 0x2f0   :  { %v2062_v33 = vmul.f32 %v3745_v55, %v1894_v30  ;;  %3746 = vrsqrt.f32 %v1895_v22  ;;  %vm2068_vm3 = vweird.f32 %v3745_v55  ;;  %vm2077_vm6 = vweird.f32 %v1895_v22 }
 0x2f1   :  { %2538 = vperm.xlu1 %3711, %v2442_v10   ;;  %v1610_v10 = vmul.f32 %v5467_v8, %v5467_v8  ;;  %3748 = vrsqrt.f32 %v1902_v42  ;;  %vm2069_vm5 = vmor %vm2067_vm4, %vm2068_vm3  ;;  %vm2147_vm9 = vweird.f32 %v1902_v42 }
 0x2f2   :  { %v5443_v15 = vpop.xlane.xlu2 %1446  ;;  %v2063_v5 = vmul.f32 %v3745_v55, %v2062_v33  ;;  %v1742_v33 = vsel %vm1330_vm1, %v1618_v0, 0.0 }
 0x2f3   :  { %v1718_v43 = vsel %vm1330_vm1, %v1610_v10, 0.0 }
 0x2f6   :  { %v3747_v54 = vpop.eup %3746 }
 0x2f7   :  { %vm2078_vm0 = vweird.f32 %v3747_v54 }
 0x2f8   :  { %vm2079_vm8 = vmor %vm2077_vm6, %vm2078_vm0 }
 0x2fa   :  { %v5445_v61 = vpop.xlane.xlu2 %1704 }
 0x300   :  { %2573 = vperm.xlu0 %3712, %v2449_v63   ;;  %v5464_v16 = vpop.xlane.xlu1 %1452  ;;  %v6276_v63 = vld [vmem:[#allocation40_spill] sm:$0xff] }
 0x302   :  { %v2519_v31 = vpop.permute.xlu2 %2518 }
 0x303   :  { %v2738_v18 = vmul.f32 %v2519_v31, %v4839_v45  ;;  %v5462_v45 = vsub.f32 %v6273_v17, %v1511_v11  ;;  %v2064_v11 = vmul.f32 0.5, %v2063_v5  ;;  %v2072_v17 = vmul.f32 %v3747_v54, %v1895_v22  ;;  %v6279_v5 = vld [vmem:[#allocation8_spill] sm:$0xff] }
 0x305   :  { %v3088_v24 = vadd.f32 %v6269_v39, %v2738_v18  ;;  %v1611_v27 = vmul.f32 %v5462_v45, %v5462_v45  ;;  %v6277_v39 = vld [vmem:[#allocation7_spill] sm:$0xff]  ;;  %v2065_v6 = vsub.f32 1.5, %v2064_v11  ;;  %v2073_v7 = vmul.f32 %v3747_v54, %v2072_v17 }
 0x307   :  { %3138 = vst.msk [vmem:[%s6182_s4 + $0x38] sm:$0xff] %vm1330_vm1, %v3088_v24  ;;  %v1721_v59 = vsel %vm1330_vm1, %v1611_v27, 0.0  ;;  %v2066_v27 = vmul.f32 %v3745_v55, %v2065_v6  ;;  %v2074_v44 = vmul.f32 0.5, %v2073_v7 }
 0x311   :  { %1464 = vadd.xlane.f32.xlu2 %v1463_v34  ;;  %v5477_v18 = vpop.xlane.xlu0 %1467  ;;  %v3749_v34 = vpop.eup %3748 }
 0x312   :  { %v2142_v1 = vmul.f32 %v3749_v34, %v1902_v42  ;;  %vm2148_vm7 = vweird.f32 %v3749_v34 }
 0x313   :  { %vm2149_vm10 = vmor %vm2147_vm9, %vm2148_vm7 }
 0x314   :  { %v2143_v10 = vmul.f32 %v3749_v34, %v2142_v1  ;;  %v1852_v1 = vld [vmem:[%s6181_s2 + $0xa8] sm:$0xff] }
 0x318   :  { %v2524_v20 = vpop.permute.xlu1 %2523 }
 0x319   :  { %v2739_v31 = vmul.f32 %v2524_v20, %v6276_v63  ;;  %1722 = vadd.xlane.f32.xlu2 %v1721_v59  ;;  %v5491_v51 = vpop.xlane.xlu0 %1725  ;;  %v1844_v59 = vld [vmem:[%s6181_s2 + $0x68] sm:$0xff]  ;;  %v2070_v63 = vsel %vm2069_vm5, %v3745_v55, %v2066_v27  ;;  %v1845_v55 = vld [vmem:[%s6181_s2 + $0x70] sm:$0xff] }
 0x31a   :  { %v2444_v11 = vmul.f32 %v2070_v63, %v1844_v59  ;;  %v1805_v63 = vmul.f32 0.020408163, %v5445_v61 }
 0x31b   :  { %v3089_v24 = vadd.f32 %v6277_v39, %v2739_v31  ;;  %1719 = vadd.xlane.f32.xlu1 %v1718_v43  ;;  %v2144_v31 = vmul.f32 0.5, %v2143_v10  ;;  %v6278_v43 = vld [vmem:[#allocation47_spill] sm:$0xff] }
 0x31d   :  { %3139 = vst.msk [vmem:[%s6182_s4 + $0x40] sm:$0xff] %vm1330_vm1, %v3089_v24  ;;  %v2075_v24 = vsub.f32 1.5, %v2074_v44 }
 0x31f   :  { %v2076_v30 = vmul.f32 %v3747_v54, %v2075_v24  ;;  %v6282_v24 = vld [vmem:[#allocation63_spill] sm:$0xff] }
 0x321   :  { %v2080_v6 = vsel %vm2079_vm8, %v3747_v54, %v2076_v30  ;;  %v1797_v54 = vmul.f32 0.020408163, %v5212_v25  ;;  %v1472_v25 = vsel %vm1330_vm1, %v5401_v47, 0.0  ;;  %v6284_v30 = vld [vmem:[#allocation49_spill] sm:$0xff] }
 0x322   :  { %v2445_v7 = vmul.f32 %v2080_v6, %v1845_v55 }
 0x323   :  { %1470 = vadd.xlane.f32.xlu1 %v1469_v40  ;;  %v2145_v40 = vsub.f32 1.5, %v2144_v31  ;;  %v1897_v31 = vadd.f32 1e-05, %v1797_v54 }
 0x325   :  { %v2146_v17 = vmul.f32 %v3749_v34, %v2145_v40  ;;  %3750 = vrsqrt.f32 %v1897_v31  ;;  %v1521_v40 = vmul.f32 0.020408163, %v5464_v16  ;;  %vm2097_vm12 = vweird.f32 %v1897_v31 }
 0x327   :  { %v2150_v0 = vsel %vm2149_vm10, %v3749_v34, %v2146_v17  ;;  %v1798_v17 = vmul.f32 0.020408163, %v5218_v13 }
 0x328   :  { %v2452_v22 = vmul.f32 %v2150_v0, %v1852_v1  ;;  %v925_v1 = vpop.f32.mrf.mxu0  ;;  %v1059_v0 = vpop.f32.mrf.mxu1 }
 0x32a   :  { %1743 = vadd.xlane.f32.xlu0 %v1742_v33  ;;  %v6280_v33 = vld [vmem:[#allocation41_spill] sm:$0xff] }
 0x32b   :  { %v3751_v6 = vpop.eup %3750 }
 0x32c   :  { %v2559_v20 = vpop.permute.xlu0 %2558  ;;  %vm2098_vm11 = vweird.f32 %v3751_v6 }
 0x32d   :  { %v2746_v39 = vmul.f32 %v2559_v20, %v6278_v43  ;;  %v6281_v20 = vld [vmem:[#allocation3_spill] sm:$0xff]  ;;  %v1514_v43 = vmul.f32 0.020408163, %v5236_v37  ;;  %vm2099_vm14 = vmor %vm2097_vm12, %vm2098_vm11 }
 0x32f   :  { %v3096_v50 = vadd.f32 %v6279_v5, %v2746_v39  ;;  %v5526_v39 = vadd.f32 1e-05, %v1805_v63  ;;  %v1513_v5 = vmul.f32 0.020408163, %v6282_v24 }
 0x331   :  { %3146 = vst.msk [vmem:[%s6182_s4 + $0x78] sm:$0xff] %vm1330_vm1, %v3096_v50  ;;  %2548 = vperm.xlu2 %3713, %v2444_v11   ;;  %v6283_v50 = vld [vmem:[#allocation51_spill] sm:$0xff]  ;;  %3752 = vrsqrt.f32 %v5526_v39  ;;  %v5539_v37 = vsub.f32 %v6284_v30, %v1513_v5  ;;  %v6287_v30 = vld [vmem:[#allocation10_spill] sm:$0xff]  ;;  %vm2177_vm15 = vweird.f32 %v5526_v39 }
 0x332   :  { %v5530_v11 = vsub.f32 %v6283_v50, %v1514_v43  ;;  %v6286_v43 = vld [vmem:[#allocation42_spill] sm:$0xff] }
 0x333   :  { %6285 = vst [vmem:[#allocation2_spill] sm:$0xff] %v5539_v37  ;;  %v1613_v16 = vmul.f32 %v5539_v37, %v5539_v37 }
 0x334   :  { %v1614_v55 = vmul.f32 %v5530_v11, %v5530_v11 }
 0x336   :  { %v1730_v13 = vsel %vm1330_vm1, %v1614_v55, 0.0 }
 0x33b   :  { %v5511_v27 = vpop.xlane.xlu2 %1455 }
 0x33c   :  { %2553 = vperm.xlu1 %3711, %v2445_v7   ;;  %v5545_v7 = vsub.f32 %v5205_v12, %v1521_v40  ;;  %v1327_v40 = vpop.f32.mrf.mxu3 }
 0x33e   :  { %2588 = vperm.xlu0 %3712, %v2452_v22   ;;  %v3753_v22 = vpop.eup %3752  ;;  %v1621_v12 = vmul.f32 %v5545_v7, %v5545_v7 }
 0x33f   :  { %v2172_v54 = vmul.f32 %v3753_v22, %v5526_v39  ;;  %vm2178_vm13 = vweird.f32 %v3753_v22 }
 0x340   :  { %vm2179_vm2 = vmor %vm2177_vm15, %vm2178_vm13 }
 0x341   :  { %v2173_v55 = vmul.f32 %v3753_v22, %v2172_v54 }
 0x343   :  { %v5513_v10 = vpop.xlane.xlu2 %1713  ;;  %v5522_v34 = vpop.xlane.xlu1 %1710 }
 0x34b   :  { %v2534_v42 = vpop.permute.xlu2 %2533  ;;  %v5536_v61 = vpop.xlane.xlu1 %1461 }
 0x34c   :  { %v2741_v44 = vmul.f32 %v2534_v42, %v6280_v33  ;;  %v2092_v33 = vmul.f32 %v3751_v6, %v1897_v31  ;;  %v1855_v31 = vld [vmem:[%s6181_s2 + $0xc0] sm:$0xff] }
 0x34e   :  { %v3091_v59 = vadd.f32 %v6281_v20, %v2741_v44  ;;  %v1898_v44 = vadd.f32 1e-05, %v1798_v17  ;;  %v1060_v20 = vadd.f32 %v1059_v0, %v925_v1  ;;  %v2093_v5 = vmul.f32 %v3751_v6, %v2092_v33 }
 0x34f   :  { %v1751_v1 = vsel %vm1330_vm1, %v1621_v12, 0.0 }
 0x350   :  { %3141 = vst.msk [vmem:[%s6182_s4 + $0x50] sm:$0xff] %vm1330_vm1, %v3091_v59  ;;  %v1193_v59 = vpop.f32.mrf.mxu2  ;;  %3754 = vrsqrt.f32 %v1898_v44  ;;  %v2094_v0 = vmul.f32 0.5, %v2093_v5  ;;  %v6288_v5 = vld [vmem:[#allocation52_spill] sm:$0xff]  ;;  %vm2107_vm4 = vweird.f32 %v1898_v44 }
 0x351   :  { %v1194_v50 = vadd.f32 %v1193_v59, %v1060_v20 }
 0x352   :  { %v2095_v59 = vsub.f32 1.5, %v2094_v0 }
 0x356   :  { %v3755_v20 = vpop.eup %3754 }
 0x357   :  { %v5547_v42 = vpop.xlane.xlu0 %1476  ;;  %v2102_v54 = vmul.f32 %v3755_v20, %v1898_v44  ;;  %vm2108_vm3 = vweird.f32 %v3755_v20  ;;  %v6290_v44 = vld [vmem:[#allocation43_spill] sm:$0xff] }
 0x358   :  { %vm2109_vm5 = vmor %vm2107_vm4, %vm2108_vm3 }
 0x35a   :  { %1473 = vadd.xlane.f32.xlu2 %v1472_v25  ;;  %v1727_v25 = vsel %vm1330_vm1, %v1613_v16, 0.0  ;;  %v2174_v16 = vmul.f32 0.5, %v2173_v55  ;;  %v1847_v55 = vld [vmem:[%s6181_s2 + $0x80] sm:$0xff] }
 0x35c   :  { %v2175_v12 = vsub.f32 1.5, %v2174_v16 }
 0x35f   :  { %v5565_v33 = vpop.xlane.xlu0 %1734 }
 0x362   :  { %1731 = vadd.xlane.f32.xlu2 %v1730_v13  ;;  %v5563_v13 = vadd.f32 %v1327_v40, %v1194_v50  ;;  %v6289_v40 = vld [vmem:[#allocation11_spill] sm:$0xff] }
 0x363   :  { %v2539_v63 = vpop.permute.xlu1 %2538 }
 0x364   :  { %v2742_v24 = vmul.f32 %v2539_v63, %v6286_v43  ;;  %v1478_v63 = vsel %vm1330_vm1, %v5563_v13, 0.0  ;;  %v2096_v43 = vmul.f32 %v3751_v6, %v2095_v59 }
 0x366   :  { %v3092_v17 = vadd.f32 %v6287_v30, %v2742_v24  ;;  %1728 = vadd.xlane.f32.xlu1 %v1727_v25  ;;  %v2103_v24 = vmul.f32 %v3755_v20, %v2102_v54  ;;  %v2176_v30 = vmul.f32 %v3753_v22, %v2175_v12 }
 0x368   :  { %3142 = vst.msk [vmem:[%s6182_s4 + $0x58] sm:$0xff] %vm1330_vm1, %v3092_v17  ;;  %1752 = vadd.xlane.f32.xlu0 %v1751_v1  ;;  %v2100_v1 = vsel %vm2099_vm14, %v3751_v6, %v2096_v43  ;;  %v2104_v0 = vmul.f32 0.5, %v2103_v24  ;;  %v2180_v16 = vsel %vm2179_vm2, %v3753_v22, %v2176_v30  ;;  %v1848_v6 = vld [vmem:[%s6181_s2 + $0x88] sm:$0xff]  ;;  %v1808_v22 = vmul.f32 0.020408163, %v5513_v10  ;;  %v6292_v10 = vld [vmem:[#allocation56_spill] sm:$0xff] }
 0x369   :  { %v2447_v39 = vmul.f32 %v2100_v1, %v1847_v55  ;;  %v1800_v30 = vmul.f32 0.020408163, %v5265_v60  ;;  %v1517_v55 = vmul.f32 0.020408163, %v5312_v57  ;;  %v6291_v1 = vld [vmem:[#allocation4_spill] sm:$0xff] }
 0x36a   :  { %v2105_v59 = vsub.f32 1.5, %v2104_v0 }
 0x36b   :  { %v5600_v60 = vsub.f32 %v6292_v10, %v1517_v55 }
 0x36c   :  { %v2106_v54 = vmul.f32 %v3755_v20, %v2105_v59 }
 0x36e   :  { %1479 = vadd.xlane.f32.xlu1 %v1478_v63  ;;  %v2455_v63 = vmul.f32 %v2180_v16, %v1855_v31  ;;  %v2110_v12 = vsel %vm2109_vm5, %v3755_v20, %v2106_v54  ;;  %v1524_v20 = vmul.f32 0.020408163, %v5536_v61  ;;  %v1801_v61 = vmul.f32 0.020408163, %v5325_v21 }
 0x36f   :  { %v2448_v24 = vmul.f32 %v2110_v12, %v1848_v6 }
 0x370   :  { %v5605_v16 = vsub.f32 %v5306_v38, %v1524_v20 }
 0x372   :  { %v2574_v25 = vpop.permute.xlu0 %2573  ;;  %v1624_v54 = vmul.f32 %v5605_v16, %v5605_v16 }
 0x373   :  { %v2749_v50 = vmul.f32 %v2574_v25, %v6288_v5  ;;  %v1908_v5 = vadd.f32 1e-05, %v1808_v22  ;;  %v1516_v22 = vmul.f32 0.020408163, %v5303_v29 }
 0x375   :  { %v3099_v17 = vadd.f32 %v6289_v40, %v2749_v50  ;;  %v1900_v40 = vadd.f32 1e-05, %v1800_v30  ;;  %3756 = vrsqrt.f32 %v1908_v5  ;;  %v1760_v30 = vsel %vm1330_vm1, %v1624_v54, 0.0 }
 0x376   :  { %vm2207_vm7 = vweird.f32 %v1908_v5 }
 0x377   :  { %3149 = vst.msk [vmem:[%s6182_s4 + $0x90] sm:$0xff] %vm1330_vm1, %v3099_v17  ;;  %3758 = vrsqrt.f32 %v1900_v40  ;;  %vm2127_vm8 = vweird.f32 %v1900_v40 }
 0x37a   :  { %2563 = vperm.xlu2 %3713, %v2447_v39   ;;  %v1617_v39 = vmul.f32 %v5600_v60, %v5600_v60 }
 0x37b   :  { %v3757_v57 = vpop.eup %3756 }
 0x37c   :  { %2603 = vperm.xlu0 %3712, %v2455_v63   ;;  %v2202_v63 = vmul.f32 %v3757_v57, %v1908_v5  ;;  %v1739_v12 = vsel %vm1330_vm1, %v1617_v39, 0.0  ;;  %vm2208_vm0 = vweird.f32 %v3757_v57 }
 0x37d   :  { %v3759_v59 = vpop.eup %3758  ;;  %vm2209_vm9 = vmor %vm2207_vm7, %vm2208_vm0 }
 0x37e   :  { %v2122_v6 = vmul.f32 %v3759_v59, %v1900_v40  ;;  %v2203_v38 = vmul.f32 %v3757_v57, %v2202_v63  ;;  %v6294_v63 = vld [vmem:[#allocation45_spill] sm:$0xff]  ;;  %vm2128_vm6 = vweird.f32 %v3759_v59 }
 0x37f   :  { %vm2129_vm10 = vmor %vm2127_vm8, %vm2128_vm6 }
 0x384   :  { %v5585_v43 = vpop.xlane.xlu2 %1464 }
 0x387   :  { %2568 = vperm.xlu1 %3711, %v2448_v24   ;;  %v1901_v24 = vadd.f32 1e-05, %v1801_v61 }
 0x389   :  { %3760 = vrsqrt.f32 %v1901_v24  ;;  %vm2137_vm12 = vweird.f32 %v1901_v24 }
 0x38c   :  { %v5587_v25 = vpop.xlane.xlu2 %1722 }
 0x38e   :  { %v5602_v31 = vpop.xlane.xlu1 %1719 }
 0x38f   :  { %v3761_v10 = vpop.eup %3760 }
 0x390   :  { %vm2138_vm11 = vweird.f32 %v3761_v10 }
 0x391   :  { %vm2139_vm13 = vmor %vm2137_vm12, %vm2138_vm11 }
 0x394   :  { %v2549_v50 = vpop.permute.xlu2 %2548 }
 0x395   :  { %v2744_v17 = vmul.f32 %v2549_v50, %v6290_v44  ;;  %v2123_v50 = vmul.f32 %v3759_v59, %v2122_v6  ;;  %v2132_v6 = vmul.f32 %v3761_v10, %v1901_v24  ;;  %v1520_v24 = vmul.f32 0.020408163, %v5338_v4 }
 0x396   :  { %v1471_v44 = vpop.xlane.xlu1 %1470 }
 0x397   :  { %v3094_v0 = vadd.f32 %v6291_v1, %v2744_v17  ;;  %v6293_v17 = vld [vmem:[#allocation55_spill] sm:$0xff]  ;;  %v2204_v1 = vmul.f32 0.5, %v2203_v38 }
 0x398   :  { %v5616_v21 = vsub.f32 %v6293_v17, %v1516_v22  ;;  %v6295_v22 = vld [vmem:[#allocation13_spill] sm:$0xff] }
 0x399   :  { %3144 = vst.msk [vmem:[%s6182_s4 + $0x68] sm:$0xff] %vm1330_vm1, %v3094_v0  ;;  %v2124_v0 = vmul.f32 0.5, %v2123_v50  ;;  %v2205_v39 = vsub.f32 1.5, %v2204_v1  ;;  %v6296_v1 = vld [vmem:[#allocation14_spill] sm:$0xff] }
 0x39a   :  { %v1616_v20 = vmul.f32 %v5616_v21, %v5616_v21 }
 0x39b   :  { %v2125_v29 = vsub.f32 1.5, %v2124_v0  ;;  %v2206_v37 = vmul.f32 %v3757_v57, %v2205_v39  ;;  %v1850_v39 = vld [vmem:[%s6181_s2 + $0x98] sm:$0xff] }
 0x39d   :  { %v5618_v55 = vpop.xlane.xlu0 %1743  ;;  %v2126_v50 = vmul.f32 %v3759_v59, %v2125_v29  ;;  %v2210_v5 = vsel %vm2209_vm9, %v3757_v57, %v2206_v37 }
 0x39f   :  { %v2130_v29 = vsel %vm2129_vm10, %v3759_v59, %v2126_v50  ;;  %v1811_v59 = vmul.f32 0.020408163, %v5587_v25  ;;  %v6298_v25 = vld [vmem:[#allocation48_spill] sm:$0xff] }
 0x3a3   :  { %1740 = vadd.xlane.f32.xlu2 %v1739_v12 }
 0x3a6   :  { %1761 = vadd.xlane.f32.xlu0 %v1760_v30  ;;  %v1736_v30 = vsel %vm1330_vm1, %v1616_v20, 0.0  ;;  %v2133_v20 = vmul.f32 %v3761_v10, %v2132_v6 }
 0x3a8   :  { %v2134_v40 = vmul.f32 0.5, %v2133_v20 }
 0x3ae   :  { %v2554_v61 = vpop.permute.xlu1 %2553 }
 0x3af   :  { %v2745_v54 = vmul.f32 %v2554_v61, %v6294_v63  ;;  %v2450_v63 = vmul.f32 %v2130_v29, %v1850_v39 }
 0x3b0   :  { %v2589_v12 = vpop.permute.xlu0 %2588 }
 0x3b1   :  { %v3095_v17 = vadd.f32 %v6295_v22, %v2745_v54  ;;  %v2752_v38 = vmul.f32 %v2589_v12, %v5216_v19  ;;  %1737 = vadd.xlane.f32.xlu1 %v1736_v30  ;;  %v1858_v19 = vld [vmem:[%s6181_s2 + $0xd8] sm:$0xff]  ;;  %v2135_v54 = vsub.f32 1.5, %v2134_v40  ;;  %v1851_v12 = vld [vmem:[%s6181_s2 + $0xa0] sm:$0xff]  ;;  %v1803_v22 = vmul.f32 0.020408163, %v5329_v48 }
 0x3b2   :  { %v2458_v61 = vmul.f32 %v2210_v5, %v1858_v19 }
 0x3b3   :  { %3145 = vst.msk [vmem:[%s6182_s4 + $0x70] sm:$0xff] %vm1330_vm1, %v3095_v17  ;;  %v3102_v0 = vadd.f32 %v6296_v1, %v2752_v38  ;;  %v2136_v6 = vmul.f32 %v3761_v10, %v2135_v54  ;;  %v1911_v17 = vadd.f32 1e-05, %v1811_v59  ;;  %v1903_v38 = vadd.f32 1e-05, %v1803_v22 }
 0x3b4   :  { %v1527_v1 = vmul.f32 0.020408163, %v1471_v44  ;;  %v6299_v44 = vld [vmem:[#allocation5_spill] sm:$0xff]  ;;  %v1519_v22 = vmul.f32 0.020408163, %v5443_v15 }
 0x3b5   :  { %3152 = vst.msk [vmem:[%s6182_s4 + $0xa8] sm:$0xff] %vm1330_vm1, %v3102_v0  ;;  %v2140_v37 = vsel %vm2139_vm13, %v3761_v10, %v2136_v6  ;;  %3762 = vrsqrt.f32 %v1911_v17  ;;  %v6297_v0 = vld [vmem:[#allocation58_spill] sm:$0xff]  ;;  %vm2237_vm15 = vweird.f32 %v1911_v17  ;;  %vm2157_vm4 = vweird.f32 %v1903_v38 }
 0x3b6   :  { %v2451_v57 = vmul.f32 %v2140_v37, %v1851_v12  ;;  %3764 = vrsqrt.f32 %v1903_v38  ;;  %v5652_v20 = vsub.f32 %v6297_v0, %v1520_v24  ;;  %v5655_v10 = vsub.f32 %v5375_v3, %v1527_v1 }
 0x3b7   :  { %v1804_v3 = vmul.f32 0.020408163, %v5403_v23  ;;  %v5676_v23 = vsub.f32 %v5095_v9, %v1519_v22 }
 0x3b8   :  { %v1627_v4 = vmul.f32 %v5655_v10, %v5655_v10 }
 0x3b9   :  { %v1904_v59 = vadd.f32 1e-05, %v1804_v3 }
 0x3ba   :  { %2618 = vperm.xlu0 %3712, %v2458_v61   ;;  %v1620_v61 = vmul.f32 %v5652_v20, %v5652_v20  ;;  %v1769_v12 = vsel %vm1330_vm1, %v1627_v4, 0.0  ;;  %v1619_v4 = vmul.f32 %v5676_v23, %v5676_v23 }
 0x3bb   :  { %2578 = vperm.xlu2 %3713, %v2450_v63   ;;  %v3763_v19 = vpop.eup %3762  ;;  %3766 = vrsqrt.f32 %v1904_v59  ;;  %vm2167_vm6 = vweird.f32 %v1904_v59 }
 0x3bc   :  { %v3765_v48 = vpop.eup %3764  ;;  %v2232_v29 = vmul.f32 %v3763_v19, %v1911_v17  ;;  %v1748_v6 = vsel %vm1330_vm1, %v1620_v61, 0.0  ;;  %vm2238_vm14 = vweird.f32 %v3763_v19  ;;  %v1745_v9 = vsel %vm1330_vm1, %v1619_v4, 0.0 }
 0x3bd   :  { %v2152_v63 = vmul.f32 %v3765_v48, %v1903_v38  ;;  %vm2239_vm2 = vmor %vm2237_vm15, %vm2238_vm14  ;;  %vm2158_vm3 = vweird.f32 %v3765_v48 }
 0x3be   :  { %v2233_v54 = vmul.f32 %v3763_v19, %v2232_v29  ;;  %vm2159_vm5 = vmor %vm2157_vm4, %vm2158_vm3 }
 0x3bf   :  { %v2153_v37 = vmul.f32 %v3765_v48, %v2152_v63 }
 0x3c0   :  { %v2234_v24 = vmul.f32 0.5, %v2233_v54 }
 0x3c1   :  { %v2154_v0 = vmul.f32 0.5, %v2153_v37 }
 0x3ca   :  { %2583 = vperm.xlu1 %3711, %v2451_v57  }
 0x3cd   :  { %v5644_v30 = vpop.xlane.xlu2 %1473 }
 0x3d5   :  { %v5648_v50 = vpop.xlane.xlu2 %1731 }
 0x3d9   :  { %v5673_v1 = vpop.xlane.xlu1 %1728 }
 0x3db   :  { %v5670_v57 = vpop.xlane.xlu0 %1752 }
 0x3dd   :  { %v2564_v5 = vpop.permute.xlu2 %2563 }
 0x3de   :  { %v2747_v39 = vmul.f32 %v2564_v5, %v6298_v25  ;;  %v2235_v5 = vsub.f32 1.5, %v2234_v24  ;;  %v2155_v25 = vsub.f32 1.5, %v2154_v0  ;;  %v6301_v0 = vld [vmem:[#allocation50_spill] sm:$0xff] }
 0x3e0   :  { %v3097_v40 = vadd.f32 %v6299_v44, %v2747_v39  ;;  %v2236_v29 = vmul.f32 %v3763_v19, %v2235_v5  ;;  %v3767_v44 = vpop.eup %3766  ;;  %v2156_v3 = vmul.f32 %v3765_v48, %v2155_v25 }
 0x3e1   :  { %v1480_v15 = vpop.xlane.xlu1 %1479  ;;  %vm2168_vm0 = vweird.f32 %v3767_v44 }
 0x3e2   :  { %3147 = vst.msk [vmem:[%s6182_s4 + $0x80] sm:$0xff] %vm1330_vm1, %v3097_v40  ;;  %v6300_v40 = vld [vmem:[#allocation17_spill] sm:$0xff]  ;;  %v2240_v54 = vsel %vm2239_vm2, %v3763_v19, %v2236_v29  ;;  %v2160_v37 = vsel %vm2159_vm5, %v3765_v48, %v2156_v3  ;;  %vm2169_vm7 = vmor %vm2167_vm6, %vm2168_vm0 }
 0x3e3   :  { %v1854_v48 = vld [vmem:[%s6181_s2 + $0xb8] sm:$0xff] }
 0x3e4   :  { %1749 = vadd.xlane.f32.xlu2 %v1748_v6  ;;  %1770 = vadd.xlane.f32.xlu0 %v1769_v12  ;;  %v2162_v6 = vmul.f32 %v3767_v44, %v1904_v59  ;;  %v1853_v12 = vld [vmem:[%s6181_s2 + $0xb0] sm:$0xff]  ;;  %v1523_v59 = vmul.f32 0.020408163, %v5407_v26 }
 0x3e5   :  { %v2453_v25 = vmul.f32 %v2160_v37, %v1853_v12 }
 0x3e6   :  { %v2163_v22 = vmul.f32 %v3767_v44, %v2162_v6 }
 0x3ee   :  { %v2604_v39 = vpop.permute.xlu0 %2603 }
 0x3ef   :  { %v2755_v61 = vmul.f32 %v2604_v39, %v5321_v53  ;;  %v1861_v53 = vld [vmem:[%s6181_s2 + $0xf0] sm:$0xff]  ;;  %v2164_v39 = vmul.f32 0.5, %v2163_v22 }
 0x3f0   :  { %v2461_v17 = vmul.f32 %v2240_v54, %v1861_v53  ;;  %v1530_v53 = vmul.f32 0.020408163, %v1480_v15 }
 0x3f1   :  { %v3105_v63 = vadd.f32 %v6300_v40, %v2755_v61  ;;  %v6302_v61 = vld [vmem:[#allocation16_spill] sm:$0xff]  ;;  %v2165_v38 = vsub.f32 1.5, %v2164_v39 }
 0x3f2   :  { %v5706_v12 = vsub.f32 %v5563_v13, %v1530_v53 }
 0x3f3   :  { %3155 = vst.msk [vmem:[%s6182_s4 + $0xc0] sm:$0xff] %vm1330_vm1, %v3105_v63  ;;  %v2166_v19 = vmul.f32 %v3767_v44, %v2165_v38  ;;  %v1814_v63 = vmul.f32 0.020408163, %v5648_v50 }
 0x3f4   :  { %1746 = vadd.xlane.f32.xlu1 %v1745_v9  ;;  %v1806_v9 = vmul.f32 0.020408163, %v5347_v28  ;;  %v1630_v28 = vmul.f32 %v5706_v12, %v5706_v12 }
 0x3f5   :  { %v2170_v29 = vsel %vm2169_vm7, %v3767_v44, %v2166_v19  ;;  %v1914_v3 = vadd.f32 1e-05, %v1814_v63  ;;  %v5709_v44 = vsub.f32 %v5283_v32, %v1523_v59 }
 0x3f6   :  { %v2454_v40 = vmul.f32 %v2170_v29, %v1854_v48  ;;  %v1906_v6 = vadd.f32 1e-05, %v1806_v9 }
 0x3f7   :  { %3768 = vrsqrt.f32 %v1914_v3  ;;  %v1623_v26 = vmul.f32 %v5709_v44, %v5709_v44  ;;  %vm2267_vm9 = vweird.f32 %v1914_v3 }
 0x3f8   :  { %2633 = vperm.xlu0 %3712, %v2461_v17   ;;  %3770 = vrsqrt.f32 %v1906_v6  ;;  %vm2187_vm13 = vweird.f32 %v1906_v6 }
 0x3f9   :  { %v2569_v24 = vpop.permute.xlu1 %2568  ;;  %v1757_v19 = vsel %vm1330_vm1, %v1623_v26, 0.0  ;;  %v6305_v26 = vld [vmem:[#allocation20_spill] sm:$0xff] }
 0x3fa   :  { %v2748_v5 = vmul.f32 %v2569_v24, %v6301_v0  ;;  %v6303_v24 = vld [vmem:[#allocation53_spill] sm:$0xff] }
 0x3fc   :  { %v3098_v4 = vadd.f32 %v6302_v61, %v2748_v5  ;;  %2593 = vperm.xlu2 %3713, %v2453_v25   ;;  %v6304_v25 = vld [vmem:[#allocation6_spill] sm:$0xff]  ;;  %v1778_v61 = vsel %vm1330_vm1, %v1630_v28, 0.0 }
 0x3fd   :  { %v3769_v22 = vpop.eup %3768 }
 0x3fe   :  { %3148 = vst.msk [vmem:[%s6182_s4 + $0x88] sm:$0xff] %vm1330_vm1, %v3098_v4  ;;  %v2262_v50 = vmul.f32 %v3769_v22, %v1914_v3  ;;  %v3771_v5 = vpop.eup %3770  ;;  %vm2268_vm8 = vweird.f32 %v3769_v22 }
 0x3ff   :  { %v2182_v32 = vmul.f32 %v3771_v5, %v1906_v6  ;;  %vm2269_vm10 = vmor %vm2267_vm9, %vm2268_vm8  ;;  %vm2188_vm11 = vweird.f32 %v3771_v5 }
 0x400   :  { %v2263_v13 = vmul.f32 %v3769_v22, %v2262_v50  ;;  %vm2189_vm14 = vmor %vm2187_vm13, %vm2188_vm11 }
 0x401   :  { %v2183_v63 = vmul.f32 %v3771_v5, %v2182_v32 }
 0x402   :  { %v2264_v48 = vmul.f32 0.5, %v2263_v13 }
 0x403   :  { %v2184_v59 = vmul.f32 0.5, %v2183_v63  ;;  %v1867_v63 = vld [vmem:[%s6181_s2 + $0x120] sm:$0xff] }
 0x404   :  { %v2265_v9 = vsub.f32 1.5, %v2264_v48 }
 0x405   :  { %v2185_v13 = vsub.f32 1.5, %v2184_v59 }
 0x406   :  { %v2266_v28 = vmul.f32 %v3769_v22, %v2265_v9 }
 0x407   :  { %v2186_v3 = vmul.f32 %v3771_v5, %v2185_v13 }
 0x40d   :  { %2598 = vperm.xlu1 %3711, %v2454_v40   ;;  %v1807_v40 = vmul.f32 0.020408163, %v5522_v34 }
 0x416   :  { %v1741_v54 = vpop.xlane.xlu2 %1740 }
 0x417   :  { %v1817_v17 = vmul.f32 0.020408163, %v1741_v54  ;;  %v1522_v54 = vmul.f32 0.020408163, %v5511_v27  ;;  %v1864_v27 = vld [vmem:[%s6181_s2 + $0x108] sm:$0xff] }
 0x419   :  { %v1917_v37 = vadd.f32 1e-05, %v1817_v17  ;;  %v5722_v38 = vpop.xlane.xlu0 %1761  ;;  %v1907_v17 = vadd.f32 1e-05, %v1807_v40  ;;  %v2190_v40 = vsel %vm2189_vm14, %v3771_v5, %v2186_v3  ;;  %v1526_v3 = vmul.f32 0.020408163, %v5477_v18 }
 0x41b   :  { %3772 = vrsqrt.f32 %v1917_v37  ;;  %vm2297_vm15 = vweird.f32 %v1917_v37  ;;  %vm2197_vm4 = vweird.f32 %v1907_v17 }
 0x41c   :  { %3774 = vrsqrt.f32 %v1907_v17 }
 0x41e   :  { %v2579_v15 = vpop.permute.xlu2 %2578 }
 0x41f   :  { %v2750_v0 = vmul.f32 %v2579_v15, %v6303_v24 }
 0x421   :  { %v3100_v39 = vadd.f32 %v6304_v25, %v2750_v0  ;;  %v3773_v4 = vpop.eup %3772  ;;  %v5729_v0 = vsub.f32 %v5207_v46, %v1522_v54 }
 0x422   :  { %1779 = vadd.xlane.f32.xlu0 %v1778_v61  ;;  %v2292_v29 = vmul.f32 %v3773_v4, %v1917_v37  ;;  %vm2298_vm12 = vweird.f32 %v3773_v4 }
 0x423   :  { %3150 = vst.msk [vmem:[%s6182_s4 + $0x98] sm:$0xff] %vm1330_vm1, %v3100_v39  ;;  %v1622_v46 = vmul.f32 %v5729_v0, %v5729_v0  ;;  %v3775_v39 = vpop.eup %3774  ;;  %vm2299_vm2 = vmor %vm2297_vm15, %vm2298_vm12 }
 0x424   :  { %v2293_v53 = vmul.f32 %v3773_v4, %v2292_v29  ;;  %v5741_v61 = vpop.xlane.xlu1 %1737  ;;  %v2192_v29 = vmul.f32 %v3775_v39, %v1907_v17  ;;  %vm2198_vm3 = vweird.f32 %v3775_v39  ;;  %v5762_v17 = vsub.f32 %v5345_v2, %v1526_v3 }
 0x425   :  { %1758 = vadd.xlane.f32.xlu2 %v1757_v19  ;;  %v1754_v48 = vsel %vm1330_vm1, %v1622_v46, 0.0  ;;  %vm2199_vm5 = vmor %vm2197_vm4, %vm2198_vm3 }
 0x426   :  { %v2294_v15 = vmul.f32 0.5, %v2293_v53  ;;  %v2193_v53 = vmul.f32 %v3775_v39, %v2192_v29 }
 0x428   :  { %v2295_v25 = vsub.f32 1.5, %v2294_v15  ;;  %v2194_v37 = vmul.f32 0.5, %v2193_v53  ;;  %v6307_v15 = vld [vmem:[#allocation19_spill] sm:$0xff] }
 0x42a   :  { %v2296_v19 = vmul.f32 %v3773_v4, %v2295_v25  ;;  %v2195_v5 = vsub.f32 1.5, %v2194_v37  ;;  %v1809_v25 = vmul.f32 0.020408163, %v5420_v36 }
 0x42c   :  { %v2619_v50 = vpop.permute.xlu0 %2618  ;;  %v2300_v9 = vsel %vm2299_vm2, %v3773_v4, %v2296_v19  ;;  %v1857_v4 = vld [vmem:[%s6181_s2 + $0xd0] sm:$0xff] }
 0x42d   :  { %v2758_v24 = vmul.f32 %v2619_v50, %v5393_v14  ;;  %v2270_v14 = vsel %vm2269_vm10, %v3769_v22, %v2266_v28  ;;  %v1856_v22 = vld [vmem:[%s6181_s2 + $0xc8] sm:$0xff]  ;;  %v2467_v59 = vmul.f32 %v2300_v9, %v1867_v63  ;;  %v6306_v50 = vld [vmem:[#allocation54_spill] sm:$0xff]  ;;  %v6309_v63 = vld [vmem:[#allocation9_spill] sm:$0xff] }
 0x42e   :  { %v2464_v32 = vmul.f32 %v2270_v14, %v1864_v27  ;;  %v2456_v6 = vmul.f32 %v2190_v40, %v1856_v22  ;;  %v1909_v27 = vadd.f32 1e-05, %v1809_v25 }
 0x42f   :  { %v3108_v34 = vadd.f32 %v6305_v26, %v2758_v24  ;;  %v2196_v26 = vmul.f32 %v3775_v39, %v2195_v5  ;;  %v1870_v5 = vld [vmem:[%s6181_s2 + $0x138] sm:$0xff] }
 0x430   :  { %3776 = vrsqrt.f32 %v1909_v27  ;;  %vm2217_vm9 = vweird.f32 %v1909_v27 }
 0x431   :  { %3158 = vst.msk [vmem:[%s6182_s4 + $0xd8] sm:$0xff] %vm1330_vm1, %v3108_v34  ;;  %v2200_v34 = vsel %vm2199_vm5, %v3775_v39, %v2196_v26  ;;  %v1626_v39 = vmul.f32 %v5762_v17, %v5762_v17 }
 0x432   :  { %v2457_v13 = vmul.f32 %v2200_v34, %v1857_v4  ;;  %v1525_v4 = vmul.f32 0.020408163, %v5585_v43 }
 0x436   :  { %2648 = vperm.xlu0 %3712, %v2464_v32   ;;  %v3777_v22 = vpop.eup %3776 }
 0x437   :  { %1755 = vadd.xlane.f32.xlu1 %v1754_v48  ;;  %v6308_v48 = vld [vmem:[#allocation57_spill] sm:$0xff]  ;;  %v2212_v18 = vmul.f32 %v3777_v22, %v1909_v27  ;;  %vm2218_vm8 = vweird.f32 %v3777_v22  ;;  %v6312_v27 = vld [vmem:[#allocation22_spill] sm:$0xff] }
 0x438   :  { %vm2219_vm10 = vmor %vm2217_vm9, %vm2218_vm8 }
 0x43c   :  { %v2584_v54 = vpop.permute.xlu1 %2583 }
 0x43d   :  { %v2751_v28 = vmul.f32 %v2584_v54, %v6306_v50  ;;  %2608 = vperm.xlu2 %3713, %v2456_v6   ;;  %v1766_v6 = vsel %vm1330_vm1, %v1626_v39, 0.0  ;;  %v1810_v50 = vmul.f32 0.020408163, %v5602_v31 }
 0x43e   :  { %2663 = vperm.xlu0 %3712, %v2467_v59   ;;  %v2213_v59 = vmul.f32 %v3777_v22, %v2212_v18 }
 0x43f   :  { %v3101_v24 = vadd.f32 %v6307_v15, %v2751_v28  ;;  %v1910_v34 = vadd.f32 1e-05, %v1810_v50 }
 0x440   :  { %v2214_v26 = vmul.f32 0.5, %v2213_v59 }
 0x441   :  { %3151 = vst.msk [vmem:[%s6182_s4 + $0xa0] sm:$0xff] %vm1330_vm1, %v3101_v24  ;;  %vm2227_vm12 = vweird.f32 %v1910_v34 }
 0x450   :  { %2613 = vperm.xlu1 %3711, %v2457_v13   ;;  %v6310_v13 = vld [vmem:[#allocation23_spill] sm:$0xff] }
 0x457   :  { %v1750_v14 = vpop.xlane.xlu2 %1749  ;;  %v5767_v36 = vpop.xlane.xlu0 %1770 }
 0x458   :  { %v1820_v46 = vmul.f32 0.020408163, %v1750_v14 }
 0x45a   :  { %v1920_v32 = vadd.f32 1e-05, %v1820_v46  ;;  %v5787_v46 = vsub.f32 %v5331_v49, %v1525_v4  ;;  %v1529_v4 = vmul.f32 0.020408163, %v5547_v42  ;;  %v1818_v42 = vmul.f32 0.020408163, %v5618_v55 }
 0x45c   :  { %3778 = vrsqrt.f32 %v1920_v32  ;;  %vm2327_vm6 = vweird.f32 %v1920_v32  ;;  %v1625_v43 = vmul.f32 %v5787_v46, %v5787_v46 }
 0x45d   :  { %3780 = vrsqrt.f32 %v1910_v34 }
 0x45f   :  { %v2594_v19 = vpop.permute.xlu2 %2593 }
 0x460   :  { %v2753_v29 = vmul.f32 %v2594_v19, %v6308_v48  ;;  %v1763_v48 = vsel %vm1330_vm1, %v1625_v43, 0.0 }
 0x462   :  { %v3779_v40 = vpop.eup %3778  ;;  %v3103_v9 = vadd.f32 %v6309_v63, %v2753_v29  ;;  %v1859_v29 = vld [vmem:[%s6181_s2 + $0xe0] sm:$0xff] }
 0x463   :  { %v2322_v53 = vmul.f32 %v3779_v40, %v1920_v32  ;;  %vm2328_vm0 = vweird.f32 %v3779_v40  ;;  %v3781_v32 = vpop.eup %3780 }
 0x464   :  { %3153 = vst.msk [vmem:[%s6182_s4 + $0xb0] sm:$0xff] %vm1330_vm1, %v3103_v9  ;;  %vm2329_vm7 = vmor %vm2327_vm6, %vm2328_vm0  ;;  %v2222_v49 = vmul.f32 %v3781_v32, %v1910_v34  ;;  %vm2228_vm11 = vweird.f32 %v3781_v32 }
 0x465   :  { %v2323_v2 = vmul.f32 %v3779_v40, %v2322_v53  ;;  %v6311_v53 = vld [vmem:[#allocation65_spill] sm:$0xff]  ;;  %vm2229_vm13 = vmor %vm2227_vm12, %vm2228_vm11 }
 0x466   :  { %1767 = vadd.xlane.f32.xlu2 %v1766_v6  ;;  %v2223_v63 = vmul.f32 %v3781_v32, %v2222_v49  ;;  %v5835_v49 = vadd.f32 1e-05, %v1818_v42 }
 0x467   :  { %v2324_v54 = vmul.f32 0.5, %v2323_v2  ;;  %v5791_v19 = vpop.xlane.xlu1 %1746 }
 0x468   :  { %v2224_v2 = vmul.f32 0.5, %v2223_v63  ;;  %vm2307_vm9 = vweird.f32 %v5835_v49 }
 0x469   :  { %v2325_v28 = vsub.f32 1.5, %v2324_v54 }
 0x46a   :  { %v2634_v37 = vpop.permute.xlu0 %2633  ;;  %v2225_v54 = vsub.f32 1.5, %v2224_v2 }
 0x46b   :  { %v2326_v15 = vmul.f32 %v3779_v40, %v2325_v28  ;;  %v2761_v24 = vmul.f32 %v2634_v37, %v5462_v45  ;;  %v2215_v45 = vsub.f32 1.5, %v2214_v26  ;;  %v1812_v37 = vmul.f32 0.020408163, %v5491_v51 }
 0x46c   :  { %v2226_v59 = vmul.f32 %v3781_v32, %v2225_v54  ;;  %v1821_v54 = vmul.f32 0.020408163, %v5670_v57 }
 0x46d   :  { %v3111_v25 = vadd.f32 %v6310_v13, %v2761_v24  ;;  %v2330_v14 = vsel %vm2329_vm7, %v3779_v40, %v2326_v15  ;;  %v2216_v3 = vmul.f32 %v3777_v22, %v2215_v45  ;;  %v5807_v15 = vadd.f32 1e-05, %v1812_v37 }
 0x46e   :  { %v2470_v31 = vmul.f32 %v2330_v14, %v1870_v5  ;;  %v2230_v50 = vsel %vm2229_vm13, %v3781_v32, %v2226_v59  ;;  %v1815_v24 = vmul.f32 0.020408163, %v5565_v33  ;;  %v6314_v32 = vld [vmem:[#allocation12_spill] sm:$0xff]  ;;  %v6315_v59 = vld [vmem:[#allocation26_spill] sm:$0xff] }
 0x46f   :  { %3161 = vst.msk [vmem:[%s6182_s4 + $0xf0] sm:$0xff] %vm1330_vm1, %v3111_v25  ;;  %v2220_v39 = vsel %vm2219_vm10, %v3777_v22, %v2216_v3  ;;  %v1860_v22 = vld [vmem:[%s6181_s2 + $0xe8] sm:$0xff]  ;;  %3782 = vrsqrt.f32 %v5807_v15  ;;  %v5815_v25 = vsub.f32 %v5418_v62, %v1529_v4  ;;  %v1528_v4 = vmul.f32 0.020408163, %v5644_v30 }
 0x470   :  { %2678 = vperm.xlu0 %3712, %v2470_v31   ;;  %v2459_v40 = vmul.f32 %v2220_v39, %v1859_v29  ;;  %v2460_v28 = vmul.f32 %v2230_v50, %v1860_v22  ;;  %v5812_v34 = vadd.f32 1e-05, %v1815_v24  ;;  %v6313_v31 = vld [vmem:[#allocation59_spill] sm:$0xff]  ;;  %v5856_v24 = vadd.f32 1e-05, %v1821_v54 }
 0x471   :  { %v1629_v3 = vmul.f32 %v5815_v25, %v5815_v25  ;;  %v1816_v30 = vmul.f32 0.020408163, %v5741_v61  ;;  %vm2247_vm4 = vweird.f32 %v5807_v15 }
 0x472   :  { %vm2277_vm6 = vweird.f32 %v5812_v34 }
 0x475   :  { %v5821_v45 = vpop.eup %3782 }
 0x476   :  { %v2242_v62 = vmul.f32 %v5821_v45, %v5807_v15  ;;  %vm2248_vm3 = vweird.f32 %v5821_v45  ;;  %v1862_v15 = vld [vmem:[%s6181_s2 + $0xf8] sm:$0xff] }
 0x477   :  { %vm5890_vm5 = vmor %vm2247_vm4, %vm2248_vm3 }
 0x47a   :  { %1764 = vadd.xlane.f32.xlu1 %v1763_v48 }
 0x47e   :  { %2623 = vperm.xlu2 %3713, %v2459_v40   ;;  %v1775_v40 = vsel %vm1330_vm1, %v1629_v3, 0.0  ;;  %v1824_v3 = vmul.f32 0.020408163, %v5722_v38 }
 0x47f   :  { %v2599_v9 = vpop.permute.xlu1 %2598 }
 0x480   :  { %v2754_v18 = vmul.f32 %v2599_v9, %v6311_v53  ;;  %v2243_v53 = vmul.f32 %v5821_v45, %v2242_v62  ;;  %v5879_v38 = vadd.f32 1e-05, %v1824_v3 }
 0x482   :  { %v3104_v6 = vadd.f32 %v6312_v27, %v2754_v18  ;;  %v1813_v27 = vmul.f32 0.020408163, %v5673_v1 }
 0x484   :  { %3154 = vst.msk [vmem:[%s6182_s4 + $0xb8] sm:$0xff] %vm1330_vm1, %v3104_v6  ;;  %v5854_v37 = vadd.f32 1e-05, %v1813_v27 }
 0x486   :  { %vm2257_vm13 = vweird.f32 %v5854_v37 }
 0x493   :  { %2628 = vperm.xlu1 %3711, %v2460_v28   ;;  %v1873_v28 = vld [vmem:[%s6181_s2 + $0x150] sm:$0xff] }
 0x495   :  { %v5818_v51 = vpop.xlane.xlu0 %1779 }
 0x498   :  { %v1759_v5 = vpop.xlane.xlu2 %1758 }
 0x499   :  { %v1823_v26 = vmul.f32 0.020408163, %v1759_v5 }
 0x49b   :  { %v1923_v13 = vadd.f32 1e-05, %v1823_v26 }
 0x49d   :  { %3784 = vrsqrt.f32 %v1923_v13  ;;  %vm2357_vm15 = vweird.f32 %v1923_v13 }
 0x49e   :  { %3786 = vrsqrt.f32 %v5812_v34 }
 0x49f   :  { %3788 = vrsqrt.f32 %v5835_v49 }
 0x4a0   :  { %v2609_v14 = vpop.permute.xlu2 %2608  ;;  %3790 = vrsqrt.f32 %v5854_v37 }
 0x4a1   :  { %v2756_v33 = vmul.f32 %v2609_v14, %v6313_v31  ;;  %3792 = vrsqrt.f32 %v5856_v24 }
 0x4a2   :  { %3794 = vrsqrt.f32 %v5879_v38 }
 0x4a3   :  { %v3785_v43 = vpop.eup %3784  ;;  %v3106_v48 = vadd.f32 %v6314_v32, %v2756_v33 }
 0x4a4   :  { %v2352_v29 = vmul.f32 %v3785_v43, %v1923_v13  ;;  %v5833_v39 = vpop.eup %3786  ;;  %vm2358_vm14 = vweird.f32 %v3785_v43 }
 0x4a5   :  { %3156 = vst.msk [vmem:[%s6182_s4 + $0xc8] sm:$0xff] %vm1330_vm1, %v3106_v48  ;;  %v2272_v18 = vmul.f32 %v5833_v39, %v5812_v34  ;;  %vm2359_vm2 = vmor %vm2357_vm15, %vm2358_vm14  ;;  %v5858_v26 = vpop.eup %3788  ;;  %v5869_v48 = vsub.f32 %v5401_v47, %v1528_v4  ;;  %v5884_v47 = vadd.f32 1e-05, %v1816_v30  ;;  %vm2278_vm0 = vweird.f32 %v5833_v39  ;;  %v6319_v30 = vld [vmem:[#allocation25_spill] sm:$0xff] }
 0x4a6   :  { %v2353_v55 = vmul.f32 %v3785_v43, %v2352_v29  ;;  %v2302_v42 = vmul.f32 %v5858_v26, %v5835_v49  ;;  %vm2279_vm7 = vmor %vm2277_vm6, %vm2278_vm0  ;;  %vm2308_vm8 = vweird.f32 %v5858_v26  ;;  %vm2337_vm15 = vweird.f32 %v5856_v24 }
 0x4a7   :  { %1776 = vadd.xlane.f32.xlu2 %v1775_v40  ;;  %v2273_v1 = vmul.f32 %v5833_v39, %v2272_v18  ;;  %v1628_v61 = vmul.f32 %v5869_v48, %v5869_v48  ;;  %3796 = vrsqrt.f32 %v5884_v47  ;;  %vm2309_vm10 = vmor %vm2307_vm9, %vm2308_vm8  ;;  %vm2287_vm6 = vweird.f32 %v5884_v47 }
 0x4a8   :  { %v2354_v63 = vmul.f32 0.5, %v2353_v55  ;;  %v2649_v9 = vpop.permute.xlu0 %2648  ;;  %v2303_v62 = vmul.f32 %v5858_v26, %v2302_v42  ;;  %v5881_v55 = vpop.eup %3790 }
 0x4a9   :  { %v2764_v2 = vmul.f32 %v2649_v9, %v5530_v11  ;;  %v2244_v11 = vmul.f32 0.5, %v2243_v53  ;;  %v2274_v33 = vmul.f32 0.5, %v2273_v1  ;;  %v5888_v40 = vpop.eup %3792  ;;  %v2252_v27 = vmul.f32 %v5881_v55, %v5854_v37  ;;  %v1871_v37 = vld [vmem:[%s6181_s2 + $0x140] sm:$0xff] }
 0x4aa   :  { %v2355_v6 = vsub.f32 1.5, %v2354_v63  ;;  %v1756_v53 = vpop.xlane.xlu1 %1755  ;;  %v2332_v54 = vmul.f32 %v5888_v40, %v5856_v24  ;;  %vm2258_vm11 = vweird.f32 %v5881_v55  ;;  %vm2338_vm12 = vweird.f32 %v5888_v40 }
 0x4ab   :  { %v3114_v22 = vadd.f32 %v6315_v59, %v2764_v2  ;;  %v2245_v31 = vsub.f32 1.5, %v2244_v11  ;;  %v2275_v29 = vsub.f32 1.5, %v2274_v33  ;;  %v2304_v2 = vmul.f32 0.5, %v2303_v62  ;;  %v1865_v11 = vld [vmem:[%s6181_s2 + $0x110] sm:$0xff]  ;;  %vm2259_vm14 = vmor %vm2257_vm13, %vm2258_vm11 }
 0x4ac   :  { %v2356_v50 = vmul.f32 %v3785_v43, %v2355_v6  ;;  %v1827_v6 = vmul.f32 0.020408163, %v5767_v36  ;;  %v1819_v59 = vmul.f32 0.020408163, %v5791_v19  ;;  %v2333_v1 = vmul.f32 %v5888_v40, %v2332_v54 }
 0x4ad   :  { %3164 = vst.msk [vmem:[%s6182_s4 + $0x108] sm:$0xff] %vm1330_vm1, %v3114_v22  ;;  %v2276_v9 = vmul.f32 %v5833_v39, %v2275_v29  ;;  %v1772_v22 = vsel %vm1330_vm1, %v1628_v61, 0.0  ;;  %v1822_v3 = vmul.f32 0.020408163, %v1756_v53 }
 0x4ae   :  { %v2360_v57 = vsel %vm2359_vm2, %v3785_v43, %v2356_v50  ;;  %v6316_v43 = vld [vmem:[#allocation29_spill] sm:$0xff]  ;;  %v2305_v50 = vsub.f32 1.5, %v2304_v2  ;;  %v5915_v36 = vadd.f32 1e-05, %v1827_v6  ;;  %v5922_v34 = vadd.f32 1e-05, %v1819_v59  ;;  %vm2339_vm2 = vmor %vm2337_vm15, %vm2338_vm12 }
 0x4af   :  { %v2473_v5 = vmul.f32 %v2360_v57, %v1873_v28  ;;  %v2253_v28 = vmul.f32 %v5881_v55, %v2252_v27  ;;  %v2280_v19 = vsel %vm2279_vm7, %v5833_v39, %v2276_v9  ;;  %v5924_v57 = vpop.eup %3794  ;;  %v2334_v39 = vmul.f32 0.5, %v2333_v1 }
 0x4b0   :  { %v2664_v13 = vpop.permute.xlu0 %2663  ;;  %3798 = vrsqrt.f32 %v5915_v36  ;;  %v2362_v42 = vmul.f32 %v5924_v57, %v5879_v38  ;;  %v5948_v61 = vadd.f32 1e-05, %v1822_v3  ;;  %vm2368_vm3 = vweird.f32 %v5924_v57 }
 0x4b1   :  { %v2767_v14 = vmul.f32 %v2664_v13, %v5600_v60  ;;  %2693 = vperm.xlu0 %3712, %v2473_v5   ;;  %v2246_v60 = vmul.f32 %v5821_v45, %v2245_v31  ;;  %v5926_v5 = vpop.eup %3796  ;;  %v2465_v13 = vmul.f32 %v2280_v19, %v1865_v11  ;;  %v2254_v31 = vmul.f32 0.5, %v2253_v28 }
 0x4b2   :  { %3800 = vrsqrt.f32 %v5922_v34  ;;  %v2335_v49 = vsub.f32 1.5, %v2334_v39  ;;  %v2363_v62 = vmul.f32 %v5924_v57, %v2362_v42  ;;  %vm2288_vm4 = vweird.f32 %v5926_v5 }
 0x4b3   :  { %v3117_v32 = vadd.f32 %v6316_v43, %v2767_v14  ;;  %v2250_v18 = vsel %vm5890_vm5, %v5821_v45, %v2246_v60  ;;  %v2306_v14 = vmul.f32 %v5858_v26, %v2305_v50  ;;  %v2282_v43 = vmul.f32 %v5926_v5, %v5884_v47  ;;  %vm2289_vm7 = vmor %vm2287_vm6, %vm2288_vm4  ;;  %v1874_v47 = vld [vmem:[%s6181_s2 + $0x158] sm:$0xff] }
 0x4b4   :  { %v2462_v45 = vmul.f32 %v2250_v18, %v1862_v15  ;;  %v2255_v29 = vsub.f32 1.5, %v2254_v31  ;;  %v2336_v2 = vmul.f32 %v5888_v40, %v2335_v49  ;;  %v2364_v27 = vmul.f32 0.5, %v2363_v62 }
 0x4b5   :  { %3167 = vst.msk [vmem:[%s6182_s4 + $0x120] sm:$0xff] %vm1330_vm1, %v3117_v32  ;;  %v1830_v32 = vmul.f32 0.020408163, %v5818_v51  ;;  %v1868_v51 = vld [vmem:[%s6181_s2 + $0x128] sm:$0xff]  ;;  %v2283_v9 = vmul.f32 %v5926_v5, %v2282_v43  ;;  %3802 = vrsqrt.f32 %v5948_v61  ;;  %vm2367_vm5 = vweird.f32 %v5879_v38 }
 0x4b6   :  { %v5953_v63 = vpop.eup %3798  ;;  %v2256_v18 = vmul.f32 %v5881_v55, %v2255_v29  ;;  %v2340_v24 = vsel %vm2339_vm2, %v5888_v40, %v2336_v2  ;;  %vm5995_vm0 = vmor %vm2367_vm5, %vm2368_vm3  ;;  %vm2317_vm12 = vweird.f32 %v5922_v34  ;;  %vm2347_vm2 = vweird.f32 %v5948_v61 }
 0x4b7   :  { %v5956_v53 = vadd.f32 1e-05, %v1830_v32  ;;  %v2284_v6 = vmul.f32 0.5, %v2283_v9  ;;  %v2392_v54 = vmul.f32 %v5953_v63, %v5915_v36  ;;  %vm2398_vm8 = vweird.f32 %v5953_v63 }
 0x4b8   :  { %v5958_v15 = vpop.eup %3800  ;;  %v2260_v50 = vsel %vm2259_vm14, %v5881_v55, %v2256_v18  ;;  %v2471_v55 = vmul.f32 %v2340_v24, %v1871_v37  ;;  %v6324_v37 = vld [vmem:[#allocation15_spill] sm:$0xff] }
 0x4b9   :  { %v2312_v59 = vmul.f32 %v5958_v15, %v5922_v34  ;;  %3804 = vrsqrt.f32 %v5956_v53  ;;  %v2285_v28 = vsub.f32 1.5, %v2284_v6  ;;  %v2393_v11 = vmul.f32 %v5953_v63, %v2392_v54 }
 0x4ba   :  { %vm2318_vm9 = vweird.f32 %v5958_v15  ;;  %vm2427_vm3 = vweird.f32 %v5956_v53 }
 0x4bb   :  { %v2313_v19 = vmul.f32 %v5958_v15, %v2312_v59  ;;  %v5982_v1 = vpop.eup %3802  ;;  %v2286_v31 = vmul.f32 %v5926_v5, %v2285_v28  ;;  %vm2319_vm13 = vmor %vm2317_vm12, %vm2318_vm9  ;;  %v1869_v59 = vld [vmem:[%s6181_s2 + $0x130] sm:$0xff] }
 0x4bc   :  { %v2342_v42 = vmul.f32 %v5982_v1, %v5948_v61  ;;  %vm2348_vm14 = vweird.f32 %v5982_v1  ;;  %v1880_v61 = vld [vmem:[%s6181_s2 + $0x188] sm:$0xff] }
 0x4bd   :  { %1773 = vadd.xlane.f32.xlu1 %v1772_v22  ;;  %v2365_v22 = vsub.f32 1.5, %v2364_v27  ;;  %v2314_v39 = vmul.f32 0.5, %v2313_v19  ;;  %v2290_v29 = vsel %vm2289_vm7, %v5926_v5, %v2286_v31  ;;  %v6325_v31 = vld [vmem:[#allocation32_spill] sm:$0xff]  ;;  %vm2349_vm4 = vmor %vm2347_vm2, %vm2348_vm14 }
 0x4be   :  { %v2343_v38 = vmul.f32 %v5982_v1, %v2342_v42 }
 0x4bf   :  { %2638 = vperm.xlu2 %3713, %v2462_v45   ;;  %v1863_v45 = vld [vmem:[%s6181_s2 + $0x100] sm:$0xff] }
 0x4c0   :  { %v2344_v2 = vmul.f32 0.5, %v2343_v38  ;;  %v1876_v38 = vld [vmem:[%s6181_s2 + $0x168] sm:$0xff] }
 0x4c2   :  { %v2614_v4 = vpop.permute.xlu1 %2613  ;;  %v2345_v6 = vsub.f32 1.5, %v2344_v2 }
 0x4c3   :  { %v2757_v33 = vmul.f32 %v2614_v4, %v5389_v41  ;;  %v2310_v41 = vsel %vm2309_vm10, %v5858_v26, %v2306_v14  ;;  %v5984_v4 = vpop.eup %3804  ;;  %v2366_v14 = vmul.f32 %v5924_v57, %v2365_v22  ;;  %vm2397_vm10 = vweird.f32 %v5915_v36  ;;  %v1877_v36 = vld [vmem:[%s6181_s2 + $0x170] sm:$0xff] }
 0x4c4   :  { %v2468_v26 = vmul.f32 %v2310_v41, %v1868_v51  ;;  %v2422_v40 = vmul.f32 %v5984_v4, %v5956_v53  ;;  %v1866_v41 = vld [vmem:[%s6181_s2 + $0x118] sm:$0xff]  ;;  %vm6017_vm11 = vmor %vm2397_vm10, %vm2398_vm8  ;;  %vm2428_vm15 = vweird.f32 %v5984_v4 }
 0x4c5   :  { %v3107_v60 = vadd.f32 %v6319_v30, %v2757_v33  ;;  %v2394_v33 = vmul.f32 0.5, %v2393_v11  ;;  %v2370_v43 = vsel %vm5995_vm0, %v5924_v57, %v2366_v14  ;;  %v2315_v30 = vsub.f32 1.5, %v2314_v39  ;;  %vm2429_vm5 = vmor %vm2427_vm3, %vm2428_vm15  ;;  %v1872_v39 = vld [vmem:[%s6181_s2 + $0x148] sm:$0xff] }
 0x4c6   :  { %v2423_v49 = vmul.f32 %v5984_v4, %v2422_v40  ;;  %v2466_v51 = vmul.f32 %v2290_v29, %v1866_v41  ;;  %v2474_v9 = vmul.f32 %v2370_v43, %v1874_v47 }
 0x4c7   :  { %3157 = vst.msk [vmem:[%s6182_s4 + $0xd0] sm:$0xff] %vm1330_vm1, %v3107_v60  ;;  %2653 = vperm.xlu2 %3713, %v2465_v13   ;;  %v2463_v13 = vmul.f32 %v2260_v50, %v1863_v45  ;;  %v2395_v32 = vsub.f32 1.5, %v2394_v33  ;;  %v2316_v18 = vmul.f32 %v5958_v15, %v2315_v30 }
 0x4c8   :  { %v2424_v5 = vmul.f32 0.5, %v2423_v49 }
 0x4c9   :  { %v2320_v22 = vsel %vm2319_vm13, %v5958_v15, %v2316_v18  ;;  %v2346_v15 = vmul.f32 %v5982_v1, %v2345_v6  ;;  %v6326_v6 = vld [vmem:[#allocation28_spill] sm:$0xff] }
 0x4ca   :  { %v2425_v50 = vsub.f32 1.5, %v2424_v5 }
 0x4cb   :  { %v2350_v42 = vsel %vm2349_vm4, %v5982_v1, %v2346_v15 }
 0x4cc   :  { %v2472_v43 = vmul.f32 %v2350_v42, %v1872_v39 }
 0x4cf   :  { %2668 = vperm.xlu2 %3713, %v2468_v26   ;;  %v2396_v26 = vmul.f32 %v5953_v63, %v2395_v32 }
 0x4d1   :  { %v2400_v45 = vsel %vm6017_vm11, %v5953_v63, %v2396_v26  ;;  %v2426_v63 = vmul.f32 %v5984_v4, %v2425_v50  ;;  %v1875_v26 = vld [vmem:[%s6181_s2 + $0x160] sm:$0xff] }
 0x4d2   :  { %v2477_v14 = vmul.f32 %v2400_v45, %v1877_v36 }
 0x4d3   :  { %v2430_v40 = vsel %vm2429_vm5, %v5984_v4, %v2426_v63  ;;  %v2828_v4 = vld [vmem:[%s6178_s3 + $0x178] sm:$0xff] }
 0x4d4   :  { %v2480_v30 = vmul.f32 %v2430_v40, %v1880_v61 }
 0x4d6   :  { %2643 = vperm.xlu1 %3711, %v2463_v13   ;;  %v2469_v13 = vmul.f32 %v2320_v22, %v1869_v59 }
 0x4d7   :  { %2683 = vperm.xlu2 %3713, %v2471_v55  }
 0x4d9   :  { %v1768_v60 = vpop.xlane.xlu2 %1767 }
 0x4da   :  { %v1826_v62 = vmul.f32 0.020408163, %v1768_v60 }
 0x4dc   :  { %v1926_v57 = vadd.f32 1e-05, %v1826_v62 }
 0x4de   :  { %3806 = vrsqrt.f32 %v1926_v57  ;;  %2658 = vperm.xlu1 %3711, %v2466_v51   ;;  %vm2387_vm6 = vweird.f32 %v1926_v57 }
 0x4df   :  { %2698 = vperm.xlu2 %3713, %v2474_v9  }
 0x4e1   :  { %v2624_v54 = vpop.permute.xlu2 %2623 }
 0x4e2   :  { %v2759_v34 = vmul.f32 %v2624_v54, %v5292_v52  ;;  %v2679_v28 = vpop.permute.xlu0 %2678 }
 0x4e3   :  { %v2770_v11 = vmul.f32 %v2679_v28, %v5652_v20 }
 0x4e4   :  { %v3807_v19 = vpop.eup %3806  ;;  %v3109_v24 = vadd.f32 %v6324_v37, %v2759_v34 }
 0x4e5   :  { %v2382_v55 = vmul.f32 %v3807_v19, %v1926_v57  ;;  %v3120_v33 = vadd.f32 %v6325_v31, %v2770_v11  ;;  %vm2388_vm0 = vweird.f32 %v3807_v19  ;;  %v6329_v31 = vld [vmem:[#allocation21_spill] sm:$0xff] }
 0x4e6   :  { %3159 = vst.msk [vmem:[%s6182_s4 + $0xe0] sm:$0xff] %vm1330_vm1, %v3109_v24  ;;  %2673 = vperm.xlu1 %3711, %v2469_v13   ;;  %vm2389_vm7 = vmor %vm2387_vm6, %vm2388_vm0  ;;  %v6328_v24 = vld [vmem:[#allocation35_spill] sm:$0xff] }
 0x4e7   :  { %v2383_v52 = vmul.f32 %v3807_v19, %v2382_v55  ;;  %3170 = vst.msk [vmem:[%s6182_s4 + $0x138] sm:$0xff] %vm1330_vm1, %v3120_v33  ;;  %2713 = vperm.xlu2 %3713, %v2477_v14  }
 0x4e9   :  { %v2384_v20 = vmul.f32 0.5, %v2383_v52  ;;  %v1879_v52 = vld [vmem:[%s6181_s2 + $0x180] sm:$0xff] }
 0x4eb   :  { %v2385_v3 = vsub.f32 1.5, %v2384_v20 }
 0x4ed   :  { %v2386_v32 = vmul.f32 %v3807_v19, %v2385_v3  ;;  %v1765_v53 = vpop.xlane.xlu1 %1764 }
 0x4ee   :  { %v1825_v60 = vmul.f32 0.020408163, %v1765_v53  ;;  %2688 = vperm.xlu1 %3711, %v2472_v43   ;;  %v6330_v43 = vld [vmem:[#allocation24_spill] sm:$0xff]  ;;  %v2830_v53 = vld [vmem:[%s6178_s3 + $0x188] sm:$0xff] }
 0x4ef   :  { %2728 = vperm.xlu2 %3713, %v2480_v30   ;;  %v2390_v1 = vsel %vm2389_vm7, %v3807_v19, %v2386_v32 }
 0x4f0   :  { %v1925_v41 = vadd.f32 1e-05, %v1825_v60  ;;  %v2476_v29 = vmul.f32 %v2390_v1, %v1876_v38 }
 0x4f2   :  { %3808 = vrsqrt.f32 %v1925_v41  ;;  %2708 = vperm.xlu0 %3712, %v2476_v29   ;;  %vm2377_vm9 = vweird.f32 %v1925_v41 }
 0x4f7   :  { %3068 = vperm.xlu2 %3713, %v2828_v4  }
 0x4f8   :  { %v3809_v47 = vpop.eup %3808 }
 0x4f9   :  { %v2372_v49 = vmul.f32 %v3809_v47, %v1925_v41  ;;  %vm2378_vm8 = vweird.f32 %v3809_v47 }
 0x4fa   :  { %vm2379_vm10 = vmor %vm2377_vm9, %vm2378_vm8 }
 0x4fb   :  { %v2373_v62 = vmul.f32 %v3809_v47, %v2372_v49 }
 0x4fd   :  { %v2374_v57 = vmul.f32 0.5, %v2373_v62 }
 0x4ff   :  { %v2375_v51 = vsub.f32 1.5, %v2374_v57 }
 0x501   :  { %v2376_v9 = vmul.f32 %v3809_v47, %v2375_v51  ;;  %v6332_v51 = vld [vmem:[#allocation30_spill] sm:$0xff] }
 0x503   :  { %v2380_v18 = vsel %vm2379_vm10, %v3809_v47, %v2376_v9 }
 0x504   :  { %v2475_v2 = vmul.f32 %v2380_v18, %v1875_v26 }
 0x505   :  { %v2629_v5 = vpop.permute.xlu1 %2628 }
 0x506   :  { %v2760_v27 = vmul.f32 %v2629_v5, %v5467_v8  ;;  %2703 = vperm.xlu1 %3711, %v2475_v2   ;;  %v6327_v8 = vld [vmem:[#allocation18_spill] sm:$0xff] }
 0x507   :  { %v6333_v5 = vld [vmem:[#allocation2_spill] sm:$0xff] }
 0x508   :  { %v3110_v54 = vadd.f32 %v6326_v6, %v2760_v27  ;;  %v6334_v6 = vld [vmem:[#allocation31_spill] sm:$0xff] }
 0x50a   :  { %3160 = vst.msk [vmem:[%s6182_s4 + $0xe8] sm:$0xff] %vm1330_vm1, %v3110_v54 }
 0x51a   :  { %v1777_v59 = vpop.xlane.xlu2 %1776 }
 0x51b   :  { %v1829_v22 = vmul.f32 0.020408163, %v1777_v59 }
 0x51d   :  { %v1929_v36 = vadd.f32 1e-05, %v1829_v22  ;;  %v6335_v22 = vld [vmem:[#allocation33_spill] sm:$0xff] }
 0x51f   :  { %3810 = vrsqrt.f32 %v1929_v36  ;;  %vm2417_vm12 = vweird.f32 %v1929_v36 }
 0x522   :  { %v2639_v45 = vpop.permute.xlu2 %2638 }
 0x523   :  { %v2762_v50 = vmul.f32 %v2639_v45, %v5356_v35  ;;  %v2694_v34 = vpop.permute.xlu0 %2693  ;;  %v2829_v45 = vld [vmem:[%s6178_s3 + $0x180] sm:$0xff] }
 0x524   :  { %v2773_v28 = vmul.f32 %v2694_v34, %v5709_v44 }
 0x525   :  { %v3811_v11 = vpop.eup %3810  ;;  %v3112_v19 = vadd.f32 %v6327_v8, %v2762_v50 }
 0x526   :  { %v2412_v37 = vmul.f32 %v3811_v11, %v1929_v36  ;;  %v3123_v13 = vadd.f32 %v6328_v24, %v2773_v28  ;;  %vm2418_vm11 = vweird.f32 %v3811_v11 }
 0x527   :  { %3162 = vst.msk [vmem:[%s6182_s4 + $0xf8] sm:$0xff] %vm1330_vm1, %v3112_v19  ;;  %vm2419_vm13 = vmor %vm2417_vm12, %vm2418_vm11  ;;  %v6337_v19 = vld [vmem:[#allocation36_spill] sm:$0xff] }
 0x528   :  { %v2413_v14 = vmul.f32 %v3811_v11, %v2412_v37  ;;  %3173 = vst.msk [vmem:[%s6182_s4 + $0x150] sm:$0xff] %vm1330_vm1, %v3123_v13  ;;  %v6338_v13 = vld [vmem:[#allocation38_spill] sm:$0xff] }
 0x52a   :  { %v2414_v35 = vmul.f32 0.5, %v2413_v14  ;;  %v2654_v15 = vpop.permute.xlu2 %2653 }
 0x52b   :  { %v2765_v44 = vmul.f32 %v2654_v15, %v5426_v58  ;;  %v6339_v15 = vld [vmem:[#allocation37_spill] sm:$0xff] }
 0x52c   :  { %v2415_v55 = vsub.f32 1.5, %v2414_v35 }
 0x52d   :  { %v3115_v33 = vadd.f32 %v6329_v31, %v2765_v44  ;;  %v6340_v31 = vld [vmem:[#allocation39_spill] sm:$0xff] }
 0x52e   :  { %v2416_v63 = vmul.f32 %v3811_v11, %v2415_v55 }
 0x52f   :  { %3165 = vst.msk [vmem:[%s6182_s4 + $0x110] sm:$0xff] %vm1330_vm1, %v3115_v33 }
 0x530   :  { %v1774_v20 = vpop.xlane.xlu1 %1773  ;;  %v2420_v39 = vsel %vm2419_vm13, %v3811_v11, %v2416_v63 }
 0x531   :  { %v1828_v42 = vmul.f32 0.020408163, %v1774_v20  ;;  %v2479_v58 = vmul.f32 %v2420_v39, %v1879_v52 }
 0x532   :  { %v2669_v61 = vpop.permute.xlu2 %2668 }
 0x533   :  { %v1928_v40 = vadd.f32 1e-05, %v1828_v42  ;;  %v2768_v3 = vmul.f32 %v2669_v61, %v5489_v56  ;;  %2723 = vperm.xlu0 %3712, %v2479_v58   ;;  %v6331_v56 = vld [vmem:[#allocation27_spill] sm:$0xff] }
 0x535   :  { %3812 = vrsqrt.f32 %v1928_v40  ;;  %v3118_v32 = vadd.f32 %v6330_v43, %v2768_v3  ;;  %vm2407_vm15 = vweird.f32 %v1928_v40 }
 0x537   :  { %3168 = vst.msk [vmem:[%s6182_s4 + $0x128] sm:$0xff] %vm1330_vm1, %v3118_v32 }
 0x53a   :  { %v2684_v30 = vpop.permute.xlu2 %2683 }
 0x53b   :  { %v3813_v38 = vpop.eup %3812  ;;  %v2771_v60 = vmul.f32 %v2684_v30, %v5545_v7  ;;  %3078 = vperm.xlu0 %3712, %v2830_v53   ;;  %v1878_v7 = vld [vmem:[%s6181_s2 + $0x178] sm:$0xff] }
 0x53c   :  { %v2402_v1 = vmul.f32 %v3813_v38, %v1928_v40  ;;  %vm2408_vm14 = vweird.f32 %v3813_v38 }
 0x53d   :  { %v3121_v41 = vadd.f32 %v6331_v56, %v2771_v60  ;;  %vm2409_vm2 = vmor %vm2407_vm15, %vm2408_vm14 }
 0x53e   :  { %v2403_v29 = vmul.f32 %v3813_v38, %v2402_v1 }
 0x53f   :  { %3171 = vst.msk [vmem:[%s6182_s4 + $0x140] sm:$0xff] %vm1330_vm1, %v3121_v41 }
 0x540   :  { %v2404_v4 = vmul.f32 0.5, %v2403_v29 }
 0x542   :  { %v2405_v47 = vsub.f32 1.5, %v2404_v4  ;;  %v2699_v49 = vpop.permute.xlu2 %2698 }
 0x543   :  { %v2774_v62 = vmul.f32 %v2699_v49, %v5605_v16 }
 0x544   :  { %v2406_v57 = vmul.f32 %v3813_v38, %v2405_v47 }
 0x545   :  { %v3124_v9 = vadd.f32 %v6332_v51, %v2774_v62 }
 0x546   :  { %v2410_v26 = vsel %vm2409_vm2, %v3813_v38, %v2406_v57 }
 0x547   :  { %3174 = vst.msk [vmem:[%s6182_s4 + $0x158] sm:$0xff] %vm1330_vm1, %v3124_v9  ;;  %v2478_v18 = vmul.f32 %v2410_v26, %v1878_v7 }
 0x548   :  { %v2644_v2 = vpop.permute.xlu1 %2643 }
 0x549   :  { %v2763_v27 = vmul.f32 %v2644_v2, %v6333_v5  ;;  %2718 = vperm.xlu1 %3711, %v2478_v18  }
 0x54a   :  { %v2714_v16 = vpop.permute.xlu2 %2713 }
 0x54b   :  { %v3113_v54 = vadd.f32 %v6334_v6, %v2763_v27  ;;  %v2777_v59 = vmul.f32 %v2714_v16, %v5655_v10  ;;  %v6336_v10 = vld [vmem:[#allocation34_spill] sm:$0xff] }
 0x54d   :  { %3163 = vst.msk [vmem:[%s6182_s4 + $0x100] sm:$0xff] %vm1330_vm1, %v3113_v54  ;;  %v3127_v36 = vadd.f32 %v6335_v22, %v2777_v59 }
 0x54f   :  { %3177 = vst.msk [vmem:[%s6182_s4 + $0x170] sm:$0xff] %vm1330_vm1, %v3127_v36 }
 0x550   :  { %v2659_v50 = vpop.permute.xlu1 %2658 }
 0x551   :  { %v2766_v34 = vmul.f32 %v2659_v50, %v5616_v21  ;;  %3073 = vperm.xlu1 %3711, %v2829_v45  }
 0x552   :  { %v2729_v52 = vpop.permute.xlu2 %2728 }
 0x553   :  { %v3116_v28 = vadd.f32 %v6336_v10, %v2766_v34 }
 0x555   :  { %3166 = vst.msk [vmem:[%s6182_s4 + $0x118] sm:$0xff] %vm1330_vm1, %v3116_v28 }
 0x558   :  { %v2674_v11 = vpop.permute.xlu1 %2673 }
 0x559   :  { %v2769_v8 = vmul.f32 %v2674_v11, %v5676_v23 }
 0x55a   :  { %v3069_v58 = vpop.permute.xlu2 %3068 }
 0x55b   :  { %v3119_v37 = vadd.f32 %v6337_v19, %v2769_v8 }
 0x55d   :  { %3169 = vst.msk [vmem:[%s6182_s4 + $0x130] sm:$0xff] %vm1330_vm1, %v3119_v37 }
 0x560   :  { %v2689_v24 = vpop.permute.xlu1 %2688 }
 0x561   :  { %v2772_v21 = vmul.f32 %v2689_v24, %v5729_v0 }
 0x563   :  { %v3122_v14 = vadd.f32 %v6338_v13, %v2772_v21 }
 0x564   :  { %v2709_v35 = vpop.permute.xlu0 %2708 }
 0x565   :  { %3172 = vst.msk [vmem:[%s6182_s4 + $0x148] sm:$0xff] %vm1330_vm1, %v3122_v14  ;;  %v2776_v23 = vmul.f32 %v2709_v35, %v5762_v17  ;;  %v2780_v17 = vmul.f32 %v2729_v52, %v5706_v12 }
 0x567   :  { %v3126_v44 = vadd.f32 %v6339_v15, %v2776_v23 }
 0x569   :  { %3176 = vst.msk [vmem:[%s6182_s4 + $0x168] sm:$0xff] %vm1330_vm1, %v3126_v44 }
 0x578   :  { %v2704_v55 = vpop.permute.xlu1 %2703 }
 0x579   :  { %v2775_v0 = vmul.f32 %v2704_v55, %v5787_v46 }
 0x57b   :  { %v3125_v33 = vadd.f32 %v6340_v31, %v2775_v0 }
 0x57d   :  { %3175 = vst.msk [vmem:[%s6182_s4 + $0x160] sm:$0xff] %vm1330_vm1, %v3125_v33 }
 0x5a5   :  { %v2724_v63 = vpop.permute.xlu0 %2723 }
 0x5a6   :  { %v2779_v40 = vmul.f32 %v2724_v63, %v5815_v25 }
 0x5ad   :  { %v3079_v20 = vpop.permute.xlu0 %3078 }
 0x5ae   :  { %v3130_v39 = vadd.f32 %v3079_v20, %v2780_v17 }
 0x5b0   :  { %3180 = vst.msk [vmem:[%s6182_s4 + $0x188] sm:$0xff] %vm1330_vm1, %v3130_v39 }
 0x5bb   :  { %v2719_v42 = vpop.permute.xlu1 %2718 }
 0x5bc   :  { %v2778_v46 = vmul.f32 %v2719_v42, %v5869_v48 }
 0x5be   :  { %v3128_v61 = vadd.f32 %v3069_v58, %v2778_v46 }
 0x5c0   :  { %3178 = vst.msk [vmem:[%s6182_s4 + $0x178] sm:$0xff] %vm1330_vm1, %v3128_v61 }
 0x5c3   :  { %v3074_v12 = vpop.permute.xlu1 %3073 }
 0x5c4   :  { %v3129_v3 = vadd.f32 %v3074_v12, %v2779_v40 }
 0x5c6   :  { %3179 = vst.msk [vmem:[%s6182_s4 + $0x180] sm:$0xff] %vm1330_vm1, %v3129_v3 }

</bundles_post_ra>
